<compile_context>
chip_gen: v6e
topology: v6e:2x2x1
jax: 0.10.0
libtpu: 0.0.40
codegen_flags: <defaults>
</compile_context>

<pallas_src>
import functools

import jax
import jax.numpy as jnp
from jax import lax
from jax.experimental import pallas as pl
from jax.experimental.pallas import tpu as pltpu

_LANE = 128
_SUBLANE = 8


def _round_up(x, m):
    return ((x + m - 1) // m) * m


def _vmem_capacity_bytes():
    """Per-core VMEM capacity; conservative (v7x) fallback if the query fails."""
    try:
        info = pltpu.get_tpu_info()
        cap = int(getattr(info, "vmem_capacity_bytes", 0))
        if cap > 0:
            return cap
    except Exception:
        pass
    return 64 * 1024 * 1024


def _max_tile_h(wp, cp, halo, n_stages, in_bytes, vmem_cap):
    """Largest tile_h (multiple of halo) whose per-step VMEM footprint fits.

    Per window-row footprint (upper bound):
      2*in_bytes  double-buffered input pipeline
      2*in_bytes  live `top` + pooled temporaries (input dtype)
      8           f32 conv result + masking temp
      2*in_bytes  double-buffered output pipeline
      4           f32 residual accumulator
    """
    budget = int(vmem_cap * 0.55)
    per_row = wp * cp * (6 * in_bytes + 12)
    fixed = 2 * halo * wp * cp * (4 * in_bytes + 8)        # halo rows of window
    fixed += 2 * n_stages * cp * cp * in_bytes             # resident weights
    rows = max((budget - fixed) // per_row, halo)
    return max((rows // halo) * halo, halo)


def _crp_kernel(xp_ref, xm_ref, xn_ref, w_ref, o_ref, *,
                n_stages, img_h, img_w, tile_h, halo):
    """One (batch, H-tile) grid step.

    xp_ref: (1, halo,   Wp, Cp)  rows just above the tile (edge-clamped fetch)
    xm_ref: (1, tile_h, Wp, Cp)  the tile itself
    xn_ref: (1, halo,   Wp, Cp)  rows just below the tile (edge-clamped fetch)
    w_ref : (n_stages, Cp, Cp)   1x1-conv weights, (C_in, C_out) per stage
    o_ref : (1, tile_h, Wp, Cp)
    """
    h_idx = pl.program_id(1)
    _, _, Wp, Cp = xm_ref.shape
    L0 = tile_h + 2 * halo
    cdt = xm_ref.dtype
    neg_inf = jnp.array(-jnp.inf, dtype=cdt)

    # Halo'd window at input dtype (single copy; no f32 upcast).
    top = jnp.concatenate([xp_ref[0], xm_ref[0], xn_ref[0]], axis=0)   # (L0,Wp,Cp)

    # ---- loop-invariant masks (hoisted out of the stage loop) ----------------
    # Intended global image row of each local window row.  The halo fetches are
    # edge-clamped in the index maps, so validity is decided by the *intended*
    # row index, never by the fetched data.
    row_global = (lax.broadcasted_iota(jnp.int32, (L0, 1, 1), 0)
                  + h_idx * tile_h - halo)
    row_valid = (row_global >= 0) & (row_global < img_h)               # (L0,1,1)
    # W-direction source-column validity per shift; built full-lane once so the
    # per-stage where does not re-broadcast a narrow mask.
    col = lax.broadcasted_iota(jnp.int32, (1, Wp, Cp), 1)
    w_valid = {k: (col + k >= 0) & (col + k < img_w) for k in (-2, -1, 1, 2)}

    acc = xm_ref[0].astype(jnp.float32)                 # f32 residual accumulator

    for s in range(n_stages):
        m = halo - 2 * s                                # margin rows this stage
        Ls = tile_h + 2 * m                             # current window length

        # Re-apply the image-boundary -inf padding.  Required every stage: the
        # previous stage's 1x1 conv turns -inf padding rows into garbage.
        top = jnp.where(row_valid[2 * s: 2 * s + Ls], top, neg_inf)

        # 5x1 max along H via static shrinking-window slices (major dim: no
        # rolls, no per-shift selects).  Output covers exactly the rows that
        # later stages / the residual add still need.
        pooled = top[2: Ls - 2]
        for k in (-2, -1, 1, 2):
            pooled = jnp.maximum(pooled, top[2 + k: Ls - 2 + k])

        # 1x5 max along W: XLU sublane rotates + hoisted edge masks.
        r = pooled
        for k in (-2, -1, 1, 2):
            shifted = pltpu.roll(pooled, (-k) % Wp, axis=1)
            r = jnp.maximum(r, jnp.where(w_valid[k], shifted, neg_inf))

        # 1x1 conv == (pixels, C_in) @ (C_in, C_out) on the MXU.  Operands stay
        # in the input dtype (bf16-native for bf16 nets); f32 accumulation.
        Ln = Ls - 4
        t2 = jnp.dot(r.reshape(Ln * Wp, Cp), w_ref[s],
                     preferred_element_type=jnp.float32).reshape(Ln, Wp, Cp)

        acc = acc + t2[m - 2: m - 2 + tile_h]
        if s + 1 < n_stages:
            top = t2.astype(cdt)                        # window for next stage

    o_ref[0] = acc.astype(o_ref.dtype)                  # single final cast/store


def crp_block_nhwc(x_nhwc, weights, n_stages, *, tile_h=None):
    """CRP block on an NHWC tensor.  weights: (n_stages, C_in, C_out), C_in == C_out."""
    N, H, W, C = x_nhwc.shape
    assert weights.shape == (n_stages, C, C), (
        "CRPBlock residual add requires in_planes == out_planes")
    assert jnp.issubdtype(x_nhwc.dtype, jnp.floating)
    orig_dtype = x_nhwc.dtype
    weights = weights.astype(orig_dtype)       # keep MXU operands in the net dtype

    # Lane-dense channels (x128) and sublane-aligned width (x8) so in-kernel
    # reshapes around the matmul are layout no-ops (no-op for real RefineNet C).
    Cp = _round_up(C, _LANE)
    Wp = _round_up(W, _SUBLANE)
    if Cp != C:
        x_nhwc = jnp.pad(x_nhwc, ((0, 0), (0, 0), (0, 0), (0, Cp - C)))
        weights = jnp.pad(weights, ((0, 0), (0, Cp - C), (0, Cp - C)))
    if Wp != W:
        x_nhwc = jnp.pad(x_nhwc, ((0, 0), (0, 0), (0, Wp - W), (0, 0)))

    halo = 2 * n_stages                        # pool radius 2 per chained stage
    in_bytes = jnp.dtype(orig_dtype).itemsize
    vmem_cap = _vmem_capacity_bytes()

    if tile_h is None:
        tile_h_max = _max_tile_h(Wp, Cp, halo, n_stages, in_bytes, vmem_cap)
        grid_h = pl.cdiv(H, tile_h_max)
        # Give megacore (v7x: 2 TCs) at least two parallel steps when N == 1.
        if N == 1 and grid_h == 1 and H >= 2 * halo:
            grid_h = 2
        # Balanced tiles: pads H by < halo rows instead of up to tile_h - 1.
        tile_h = _round_up(pl.cdiv(H, grid_h), halo)
    assert tile_h % halo == 0 and tile_h >= halo
    grid_h = pl.cdiv(H, tile_h)
    Hp = grid_h * tile_h
    if Hp != H:
        x_nhwc = jnp.pad(x_nhwc, ((0, 0), (0, Hp - H), (0, 0), (0, 0)))

    r_blocks = tile_h // halo                  # halo-sized blocks per tile
    n_halo_blocks = Hp // halo

    kernel = functools.partial(
        _crp_kernel, n_stages=n_stages, img_h=H, img_w=W,
        tile_h=tile_h, halo=halo)

    out = pl.pallas_call(
        kernel,
        out_shape=jax.ShapeDtypeStruct((N, Hp, Wp, Cp), orig_dtype),
        grid_spec=pltpu.PrefetchScalarGridSpec(
            num_scalar_prefetch=0,
            grid=(N, grid_h),
            in_specs=[
                # Halo rows above the tile (edge-clamped; out-of-image rows are
                # re-padded to -inf inside the kernel).
                pl.BlockSpec((1, halo, Wp, Cp),
                             lambda n, h: (n, jnp.maximum(h * r_blocks - 1, 0), 0, 0)),
                # The tile itself.  (Bump to pipeline_mode=pl.Buffered(3) only
                # if profiling shows the DMA exposed after the bf16/de-masking
                # changes.)
                pl.BlockSpec((1, tile_h, Wp, Cp), lambda n, h: (n, h, 0, 0)),
                # Halo rows below the tile (edge-clamped).
                pl.BlockSpec((1, halo, Wp, Cp),
                             lambda n, h: (n, jnp.minimum((h + 1) * r_blocks,
                                                          n_halo_blocks - 1), 0, 0)),
                # 1x1-conv weights: constant index map -> stays VMEM resident.
                pl.BlockSpec((n_stages, Cp, Cp), lambda n, h: (0, 0, 0)),
            ],
            out_specs=pl.BlockSpec((1, tile_h, Wp, Cp), lambda n, h: (n, h, 0, 0)),
        ),
        compiler_params=pltpu.CompilerParams(
            dimension_semantics=("parallel", "parallel"),
            vmem_limit_bytes=int(vmem_cap * 0.75),
        ),
    )(x_nhwc, x_nhwc, x_nhwc, weights)

    return out[:, :H, :W, :C]


def crp_block(x_nchw, weights, n_stages, *, tile_h=None):
    """PyTorch-layout entry point (NCHW).  The two transposes are XLA glue;
    in an NHWC pipeline call crp_block_nhwc directly and they disappear."""
    x_nhwc = jnp.transpose(x_nchw, (0, 2, 3, 1))
    out = crp_block_nhwc(x_nhwc, weights, n_stages, tile_h=tile_h)
    return jnp.transpose(out, (0, 3, 1, 2))


def crp_block_reference(x_nchw, weights, n_stages):
    """Pure-JAX reference (NCHW) mirroring the PyTorch forward."""
    top = x_nchw
    out = x_nchw
    for s in range(n_stages):
        top = lax.reduce_window(
            top, -jnp.inf, lax.max,
            window_dimensions=(1, 1, 5, 5),
            window_strides=(1, 1, 1, 1),
            padding=((0, 0), (0, 0), (2, 2), (2, 2)))
        top = jnp.einsum("nchw,cd->ndhw", top, weights[s],
                         precision=lax.Precision.HIGHEST)
        out = out + top
    return out


if __name__ == "__main__":
    import numpy as np

    key = jax.random.PRNGKey(0)

    # Test 1: toy CRPBlock shapes (single H tile; channels padded 4 -> 128).
    N, C, H, W = 2, 4, 16, 16
    n_stages = 4
    kx, kw = jax.random.split(key)
    x = jax.random.normal(kx, (N, C, H, W), dtype=jnp.float32)
    # 1x1-conv weights stored as (stage, C_in, C_out).
    weights = 0.1 * jax.random.normal(kw, (n_stages, C, C), dtype=jnp.float32)

    out = jax.block_until_ready(crp_block(x, weights, n_stages))
    ref = jax.block_until_ready(crp_block_reference(x, weights, n_stages))
    # Tolerance accounts for TPU matmul precision modes (multi-pass bf16 on the
    # MXU); structural / indexing bugs would show up as O(1) errors.
    np.testing.assert_allclose(np.asarray(out), np.asarray(ref), rtol=2e-2, atol=2e-2)

    # Test 2: multi-tile path (exercises halo fetches + boundary re-padding).
    N2, C2, H2, W2, n_stages2 = 1, 4, 32, 16, 2
    kx2, kw2 = jax.random.split(kw)
    x2 = jax.random.normal(kx2, (N2, C2, H2, W2), dtype=jnp.float32)
    w2 = 0.1 * jax.random.normal(kw2, (n_stages2, C2, C2), dtype=jnp.float32)

    out2 = jax.block_until_ready(crp_block(x2, w2, n_stages2, tile_h=8))
    ref2 = jax.block_until_ready(crp_block_reference(x2, w2, n_stages2))
    np.testing.assert_allclose(np.asarray(out2), np.asarray(ref2), rtol=2e-2, atol=2e-2)

    print("KERNEL_OK")
</pallas_src>

<mosaic_0001>
module attributes {stable_mosaic.version = 11 : i64} {
  func.func @_crp_kernel(%arg0: i32, %arg1: i32, %arg2: memref<1x8x16x128xf32, #tpu.memory_space<vmem>>, %arg3: memref<1x16x16x128xf32, #tpu.memory_space<vmem>>, %arg4: memref<1x8x16x128xf32, #tpu.memory_space<vmem>>, %arg5: memref<4x128x128xf32, #tpu.memory_space<vmem>>, %arg6: memref<1x16x16x128xf32, #tpu.memory_space<vmem>>) attributes {dimension_semantics = [#tpu.dimension_semantics<parallel>, #tpu.dimension_semantics<parallel>], iteration_bounds = array<i64: 2, 1>, scalar_prefetch = 0 : i64, scratch_operands = 0 : i64, tpu.core_type = #tpu.core_type<tc>, window_params = [{transform_indices = @transform_0, window_bounds = array<i64: 1, 8, 16, 128>}, {transform_indices = @transform_1, window_bounds = array<i64: 1, 16, 16, 128>}, {transform_indices = @transform_2, window_bounds = array<i64: 1, 8, 16, 128>}, {pipeline_mode = #tpu.pipeline_mode<synchronous>, transform_indices = @transform_3, window_bounds = array<i64: 4, 128, 128>}, {transform_indices = @transform_4, window_bounds = array<i64: 1, 16, 16, 128>}]} {
    %c0 = arith.constant 0 : index
    %c0_0 = arith.constant 0 : index
    %c0_1 = arith.constant 0 : index
    %c0_2 = arith.constant 0 : index
    %0 = vector.load %arg2[%c0, %c0_0, %c0_1, %c0_2] : memref<1x8x16x128xf32, #tpu.memory_space<vmem>>, vector<1x8x16x128xf32>
    %1 = vector.shape_cast %0 : vector<1x8x16x128xf32> to vector<8x16x128xf32>
    %c0_3 = arith.constant 0 : index
    %c0_4 = arith.constant 0 : index
    %c0_5 = arith.constant 0 : index
    %c0_6 = arith.constant 0 : index
    %2 = vector.load %arg3[%c0_3, %c0_4, %c0_5, %c0_6] : memref<1x16x16x128xf32, #tpu.memory_space<vmem>>, vector<1x16x16x128xf32>
    %3 = vector.shape_cast %2 : vector<1x16x16x128xf32> to vector<16x16x128xf32>
    %c0_7 = arith.constant 0 : index
    %c0_8 = arith.constant 0 : index
    %c0_9 = arith.constant 0 : index
    %c0_10 = arith.constant 0 : index
    %4 = vector.load %arg4[%c0_7, %c0_8, %c0_9, %c0_10] : memref<1x8x16x128xf32, #tpu.memory_space<vmem>>, vector<1x8x16x128xf32>
    %5 = vector.shape_cast %4 : vector<1x8x16x128xf32> to vector<8x16x128xf32>
    %6 = tpu.concatenate %1, %3, %5 in 0 : vector<8x16x128xf32>, vector<16x16x128xf32>, vector<8x16x128xf32> -> vector<32x16x128xf32>
    %7 = tpu.iota {dimensions = array<i32: 0>} : vector<32x1x1xi32>
    %c16_i32 = arith.constant 16 : i32
    %8 = arith.muli %arg1, %c16_i32 : i32
    %9 = vector.broadcast %8 : i32 to vector<32x1x1xi32>
    %10 = arith.addi %7, %9 : vector<32x1x1xi32>
    %c8_i32 = arith.constant 8 : i32
    %11 = vector.broadcast %c8_i32 : i32 to vector<32x1x1xi32>
    %12 = arith.subi %10, %11 : vector<32x1x1xi32>
    %c0_i32 = arith.constant 0 : i32
    %13 = vector.broadcast %c0_i32 : i32 to vector<32x1x1xi32>
    %14 = arith.cmpi sge, %12, %13 : vector<32x1x1xi32>
    %c16_i32_11 = arith.constant 16 : i32
    %15 = vector.broadcast %c16_i32_11 : i32 to vector<32x1x1xi32>
    %16 = arith.cmpi slt, %12, %15 : vector<32x1x1xi32>
    %17 = arith.andi %14, %16 : vector<32x1x1xi1>
    %18 = tpu.iota {dimensions = array<i32: 1>} : vector<1x16x128xi32>
    %c-2_i32 = arith.constant -2 : i32
    %19 = vector.broadcast %c-2_i32 : i32 to vector<1x16x128xi32>
    %20 = arith.addi %18, %19 : vector<1x16x128xi32>
    %c0_i32_12 = arith.constant 0 : i32
    %21 = vector.broadcast %c0_i32_12 : i32 to vector<1x16x128xi32>
    %22 = arith.cmpi sge, %20, %21 : vector<1x16x128xi32>
    %c-2_i32_13 = arith.constant -2 : i32
    %23 = vector.broadcast %c-2_i32_13 : i32 to vector<1x16x128xi32>
    %24 = arith.addi %18, %23 : vector<1x16x128xi32>
    %c16_i32_14 = arith.constant 16 : i32
    %25 = vector.broadcast %c16_i32_14 : i32 to vector<1x16x128xi32>
    %26 = arith.cmpi slt, %24, %25 : vector<1x16x128xi32>
    %27 = arith.andi %22, %26 : vector<1x16x128xi1>
    %c-1_i32 = arith.constant -1 : i32
    %28 = vector.broadcast %c-1_i32 : i32 to vector<1x16x128xi32>
    %29 = arith.addi %18, %28 : vector<1x16x128xi32>
    %c0_i32_15 = arith.constant 0 : i32
    %30 = vector.broadcast %c0_i32_15 : i32 to vector<1x16x128xi32>
    %31 = arith.cmpi sge, %29, %30 : vector<1x16x128xi32>
    %c-1_i32_16 = arith.constant -1 : i32
    %32 = vector.broadcast %c-1_i32_16 : i32 to vector<1x16x128xi32>
    %33 = arith.addi %18, %32 : vector<1x16x128xi32>
    %c16_i32_17 = arith.constant 16 : i32
    %34 = vector.broadcast %c16_i32_17 : i32 to vector<1x16x128xi32>
    %35 = arith.cmpi slt, %33, %34 : vector<1x16x128xi32>
    %36 = arith.andi %31, %35 : vector<1x16x128xi1>
    %c1_i32 = arith.constant 1 : i32
    %37 = vector.broadcast %c1_i32 : i32 to vector<1x16x128xi32>
    %38 = arith.addi %18, %37 : vector<1x16x128xi32>
    %c0_i32_18 = arith.constant 0 : i32
    %39 = vector.broadcast %c0_i32_18 : i32 to vector<1x16x128xi32>
    %40 = arith.cmpi sge, %38, %39 : vector<1x16x128xi32>
    %c1_i32_19 = arith.constant 1 : i32
    %41 = vector.broadcast %c1_i32_19 : i32 to vector<1x16x128xi32>
    %42 = arith.addi %18, %41 : vector<1x16x128xi32>
    %c16_i32_20 = arith.constant 16 : i32
    %43 = vector.broadcast %c16_i32_20 : i32 to vector<1x16x128xi32>
    %44 = arith.cmpi slt, %42, %43 : vector<1x16x128xi32>
    %45 = arith.andi %40, %44 : vector<1x16x128xi1>
    %c2_i32 = arith.constant 2 : i32
    %46 = vector.broadcast %c2_i32 : i32 to vector<1x16x128xi32>
    %47 = arith.addi %18, %46 : vector<1x16x128xi32>
    %c0_i32_21 = arith.constant 0 : i32
    %48 = vector.broadcast %c0_i32_21 : i32 to vector<1x16x128xi32>
    %49 = arith.cmpi sge, %47, %48 : vector<1x16x128xi32>
    %c2_i32_22 = arith.constant 2 : i32
    %50 = vector.broadcast %c2_i32_22 : i32 to vector<1x16x128xi32>
    %51 = arith.addi %18, %50 : vector<1x16x128xi32>
    %c16_i32_23 = arith.constant 16 : i32
    %52 = vector.broadcast %c16_i32_23 : i32 to vector<1x16x128xi32>
    %53 = arith.cmpi slt, %51, %52 : vector<1x16x128xi32>
    %54 = arith.andi %49, %53 : vector<1x16x128xi1>
    %c0_24 = arith.constant 0 : index
    %c0_25 = arith.constant 0 : index
    %c0_26 = arith.constant 0 : index
    %c0_27 = arith.constant 0 : index
    %55 = vector.load %arg3[%c0_24, %c0_25, %c0_26, %c0_27] : memref<1x16x16x128xf32, #tpu.memory_space<vmem>>, vector<1x16x16x128xf32>
    %56 = vector.shape_cast %55 : vector<1x16x16x128xf32> to vector<16x16x128xf32>
    %cst = arith.constant 0xFF800000 : f32
    %57 = vector.shape_cast %17 : vector<32x1x1xi1> to vector<32x1x1xi1>
    %58 = vector.broadcast %57 : vector<32x1x1xi1> to vector<32x16x128xi1>
    %59 = vector.broadcast %cst : f32 to vector<32x16x128xf32>
    %60 = arith.select %58, %6, %59 : vector<32x16x128xi1>, vector<32x16x128xf32>
    %61 = vector.extract_strided_slice %60 {offsets = [2, 0, 0], sizes = [28, 16, 128], strides = [1, 1, 1]} : vector<32x16x128xf32> to vector<28x16x128xf32>
    %62 = vector.extract_strided_slice %60 {offsets = [0, 0, 0], sizes = [28, 16, 128], strides = [1, 1, 1]} : vector<32x16x128xf32> to vector<28x16x128xf32>
    %63 = arith.maximumf %61, %62 : vector<28x16x128xf32>
    %64 = vector.extract_strided_slice %60 {offsets = [1, 0, 0], sizes = [28, 16, 128], strides = [1, 1, 1]} : vector<32x16x128xf32> to vector<28x16x128xf32>
    %65 = arith.maximumf %63, %64 : vector<28x16x128xf32>
    %66 = vector.extract_strided_slice %60 {offsets = [3, 0, 0], sizes = [28, 16, 128], strides = [1, 1, 1]} : vector<32x16x128xf32> to vector<28x16x128xf32>
    %67 = arith.maximumf %65, %66 : vector<28x16x128xf32>
    %68 = vector.extract_strided_slice %60 {offsets = [4, 0, 0], sizes = [28, 16, 128], strides = [1, 1, 1]} : vector<32x16x128xf32> to vector<28x16x128xf32>
    %69 = arith.maximumf %67, %68 : vector<28x16x128xf32>
    %c2_i32_28 = arith.constant 2 : i32
    %70 = tpu.dynamic_rotate %69 by %c2_i32_28 dim 1 : vector<28x16x128xf32>, i32 -> vector<28x16x128xf32>
    %cst_29 = arith.constant 0xFF800000 : f32
    %71 = vector.shape_cast %27 : vector<1x16x128xi1> to vector<1x16x128xi1>
    %72 = vector.broadcast %71 : vector<1x16x128xi1> to vector<28x16x128xi1>
    %73 = vector.broadcast %cst_29 : f32 to vector<28x16x128xf32>
    %74 = arith.select %72, %70, %73 : vector<28x16x128xi1>, vector<28x16x128xf32>
    %75 = arith.maximumf %69, %74 : vector<28x16x128xf32>
    %c1_i32_30 = arith.constant 1 : i32
    %76 = tpu.dynamic_rotate %69 by %c1_i32_30 dim 1 : vector<28x16x128xf32>, i32 -> vector<28x16x128xf32>
    %cst_31 = arith.constant 0xFF800000 : f32
    %77 = vector.shape_cast %36 : vector<1x16x128xi1> to vector<1x16x128xi1>
    %78 = vector.broadcast %77 : vector<1x16x128xi1> to vector<28x16x128xi1>
    %79 = vector.broadcast %cst_31 : f32 to vector<28x16x128xf32>
    %80 = arith.select %78, %76, %79 : vector<28x16x128xi1>, vector<28x16x128xf32>
    %81 = arith.maximumf %75, %80 : vector<28x16x128xf32>
    %c15_i32 = arith.constant 15 : i32
    %82 = tpu.dynamic_rotate %69 by %c15_i32 dim 1 : vector<28x16x128xf32>, i32 -> vector<28x16x128xf32>
    %cst_32 = arith.constant 0xFF800000 : f32
    %83 = vector.shape_cast %45 : vector<1x16x128xi1> to vector<1x16x128xi1>
    %84 = vector.broadcast %83 : vector<1x16x128xi1> to vector<28x16x128xi1>
    %85 = vector.broadcast %cst_32 : f32 to vector<28x16x128xf32>
    %86 = arith.select %84, %82, %85 : vector<28x16x128xi1>, vector<28x16x128xf32>
    %87 = arith.maximumf %81, %86 : vector<28x16x128xf32>
    %c14_i32 = arith.constant 14 : i32
    %88 = tpu.dynamic_rotate %69 by %c14_i32 dim 1 : vector<28x16x128xf32>, i32 -> vector<28x16x128xf32>
    %cst_33 = arith.constant 0xFF800000 : f32
    %89 = vector.shape_cast %54 : vector<1x16x128xi1> to vector<1x16x128xi1>
    %90 = vector.broadcast %89 : vector<1x16x128xi1> to vector<28x16x128xi1>
    %91 = vector.broadcast %cst_33 : f32 to vector<28x16x128xf32>
    %92 = arith.select %90, %88, %91 : vector<28x16x128xi1>, vector<28x16x128xf32>
    %93 = arith.maximumf %87, %92 : vector<28x16x128xf32>
    %94 = vector.shape_cast %93 : vector<28x16x128xf32> to vector<448x128xf32>
    %c0_34 = arith.constant 0 : index
    %c0_35 = arith.constant 0 : index
    %c0_36 = arith.constant 0 : index
    %95 = vector.load %arg5[%c0_34, %c0_35, %c0_36] : memref<4x128x128xf32, #tpu.memory_space<vmem>>, vector<1x128x128xf32>
    %96 = vector.shape_cast %95 : vector<1x128x128xf32> to vector<128x128xf32>
    %cst_37 = arith.constant dense<0.000000e+00> : vector<448x128xf32>
    %97 = tpu.matmul %94, %96, %cst_37 {dimension_numbers = #tpu.dot_dimension_numbers<[1], [0], [0], [1], [0, 0, 1, 1], [], []>} : vector<448x128xf32>, vector<128x128xf32>, vector<448x128xf32> -> vector<448x128xf32>
    %98 = vector.shape_cast %97 : vector<448x128xf32> to vector<28x16x128xf32>
    %99 = vector.extract_strided_slice %98 {offsets = [6, 0, 0], sizes = [16, 16, 128], strides = [1, 1, 1]} : vector<28x16x128xf32> to vector<16x16x128xf32>
    %100 = arith.addf %56, %99 : vector<16x16x128xf32>
    %101 = vector.extract_strided_slice %17 {offsets = [2, 0, 0], sizes = [28, 1, 1], strides = [1, 1, 1]} : vector<32x1x1xi1> to vector<28x1x1xi1>
    %cst_38 = arith.constant 0xFF800000 : f32
    %102 = vector.shape_cast %101 : vector<28x1x1xi1> to vector<28x1x1xi1>
    %103 = vector.broadcast %102 : vector<28x1x1xi1> to vector<28x16x128xi1>
    %104 = vector.broadcast %cst_38 : f32 to vector<28x16x128xf32>
    %105 = arith.select %103, %98, %104 : vector<28x16x128xi1>, vector<28x16x128xf32>
    %106 = vector.extract_strided_slice %105 {offsets = [2, 0, 0], sizes = [24, 16, 128], strides = [1, 1, 1]} : vector<28x16x128xf32> to vector<24x16x128xf32>
    %107 = vector.extract_strided_slice %105 {offsets = [0, 0, 0], sizes = [24, 16, 128], strides = [1, 1, 1]} : vector<28x16x128xf32> to vector<24x16x128xf32>
    %108 = arith.maximumf %106, %107 : vector<24x16x128xf32>
    %109 = vector.extract_strided_slice %105 {offsets = [1, 0, 0], sizes = [24, 16, 128], strides = [1, 1, 1]} : vector<28x16x128xf32> to vector<24x16x128xf32>
    %110 = arith.maximumf %108, %109 : vector<24x16x128xf32>
    %111 = vector.extract_strided_slice %105 {offsets = [3, 0, 0], sizes = [24, 16, 128], strides = [1, 1, 1]} : vector<28x16x128xf32> to vector<24x16x128xf32>
    %112 = arith.maximumf %110, %111 : vector<24x16x128xf32>
    %113 = vector.extract_strided_slice %105 {offsets = [4, 0, 0], sizes = [24, 16, 128], strides = [1, 1, 1]} : vector<28x16x128xf32> to vector<24x16x128xf32>
    %114 = arith.maximumf %112, %113 : vector<24x16x128xf32>
    %c2_i32_39 = arith.constant 2 : i32
    %115 = tpu.dynamic_rotate %114 by %c2_i32_39 dim 1 : vector<24x16x128xf32>, i32 -> vector<24x16x128xf32>
    %cst_40 = arith.constant 0xFF800000 : f32
    %116 = vector.shape_cast %27 : vector<1x16x128xi1> to vector<1x16x128xi1>
    %117 = vector.broadcast %116 : vector<1x16x128xi1> to vector<24x16x128xi1>
    %118 = vector.broadcast %cst_40 : f32 to vector<24x16x128xf32>
    %119 = arith.select %117, %115, %118 : vector<24x16x128xi1>, vector<24x16x128xf32>
    %120 = arith.maximumf %114, %119 : vector<24x16x128xf32>
    %c1_i32_41 = arith.constant 1 : i32
    %121 = tpu.dynamic_rotate %114 by %c1_i32_41 dim 1 : vector<24x16x128xf32>, i32 -> vector<24x16x128xf32>
    %cst_42 = arith.constant 0xFF800000 : f32
    %122 = vector.shape_cast %36 : vector<1x16x128xi1> to vector<1x16x128xi1>
    %123 = vector.broadcast %122 : vector<1x16x128xi1> to vector<24x16x128xi1>
    %124 = vector.broadcast %cst_42 : f32 to vector<24x16x128xf32>
    %125 = arith.select %123, %121, %124 : vector<24x16x128xi1>, vector<24x16x128xf32>
    %126 = arith.maximumf %120, %125 : vector<24x16x128xf32>
    %c15_i32_43 = arith.constant 15 : i32
    %127 = tpu.dynamic_rotate %114 by %c15_i32_43 dim 1 : vector<24x16x128xf32>, i32 -> vector<24x16x128xf32>
    %cst_44 = arith.constant 0xFF800000 : f32
    %128 = vector.shape_cast %45 : vector<1x16x128xi1> to vector<1x16x128xi1>
    %129 = vector.broadcast %128 : vector<1x16x128xi1> to vector<24x16x128xi1>
    %130 = vector.broadcast %cst_44 : f32 to vector<24x16x128xf32>
    %131 = arith.select %129, %127, %130 : vector<24x16x128xi1>, vector<24x16x128xf32>
    %132 = arith.maximumf %126, %131 : vector<24x16x128xf32>
    %c14_i32_45 = arith.constant 14 : i32
    %133 = tpu.dynamic_rotate %114 by %c14_i32_45 dim 1 : vector<24x16x128xf32>, i32 -> vector<24x16x128xf32>
    %cst_46 = arith.constant 0xFF800000 : f32
    %134 = vector.shape_cast %54 : vector<1x16x128xi1> to vector<1x16x128xi1>
    %135 = vector.broadcast %134 : vector<1x16x128xi1> to vector<24x16x128xi1>
    %136 = vector.broadcast %cst_46 : f32 to vector<24x16x128xf32>
    %137 = arith.select %135, %133, %136 : vector<24x16x128xi1>, vector<24x16x128xf32>
    %138 = arith.maximumf %132, %137 : vector<24x16x128xf32>
    %139 = vector.shape_cast %138 : vector<24x16x128xf32> to vector<384x128xf32>
    %c1 = arith.constant 1 : index
    %c0_47 = arith.constant 0 : index
    %c0_48 = arith.constant 0 : index
    %140 = vector.load %arg5[%c1, %c0_47, %c0_48] : memref<4x128x128xf32, #tpu.memory_space<vmem>>, vector<1x128x128xf32>
    %141 = vector.shape_cast %140 : vector<1x128x128xf32> to vector<128x128xf32>
    %cst_49 = arith.constant dense<0.000000e+00> : vector<384x128xf32>
    %142 = tpu.matmul %139, %141, %cst_49 {dimension_numbers = #tpu.dot_dimension_numbers<[1], [0], [0], [1], [0, 0, 1, 1], [], []>} : vector<384x128xf32>, vector<128x128xf32>, vector<384x128xf32> -> vector<384x128xf32>
    %143 = vector.shape_cast %142 : vector<384x128xf32> to vector<24x16x128xf32>
    %144 = vector.extract_strided_slice %143 {offsets = [4, 0, 0], sizes = [16, 16, 128], strides = [1, 1, 1]} : vector<24x16x128xf32> to vector<16x16x128xf32>
    %145 = arith.addf %100, %144 : vector<16x16x128xf32>
    %146 = vector.extract_strided_slice %17 {offsets = [4, 0, 0], sizes = [24, 1, 1], strides = [1, 1, 1]} : vector<32x1x1xi1> to vector<24x1x1xi1>
    %cst_50 = arith.constant 0xFF800000 : f32
    %147 = vector.shape_cast %146 : vector<24x1x1xi1> to vector<24x1x1xi1>
    %148 = vector.broadcast %147 : vector<24x1x1xi1> to vector<24x16x128xi1>
    %149 = vector.broadcast %cst_50 : f32 to vector<24x16x128xf32>
    %150 = arith.select %148, %143, %149 : vector<24x16x128xi1>, vector<24x16x128xf32>
    %151 = vector.extract_strided_slice %150 {offsets = [2, 0, 0], sizes = [20, 16, 128], strides = [1, 1, 1]} : vector<24x16x128xf32> to vector<20x16x128xf32>
    %152 = vector.extract_strided_slice %150 {offsets = [0, 0, 0], sizes = [20, 16, 128], strides = [1, 1, 1]} : vector<24x16x128xf32> to vector<20x16x128xf32>
    %153 = arith.maximumf %151, %152 : vector<20x16x128xf32>
    %154 = vector.extract_strided_slice %150 {offsets = [1, 0, 0], sizes = [20, 16, 128], strides = [1, 1, 1]} : vector<24x16x128xf32> to vector<20x16x128xf32>
    %155 = arith.maximumf %153, %154 : vector<20x16x128xf32>
    %156 = vector.extract_strided_slice %150 {offsets = [3, 0, 0], sizes = [20, 16, 128], strides = [1, 1, 1]} : vector<24x16x128xf32> to vector<20x16x128xf32>
    %157 = arith.maximumf %155, %156 : vector<20x16x128xf32>
    %158 = vector.extract_strided_slice %150 {offsets = [4, 0, 0], sizes = [20, 16, 128], strides = [1, 1, 1]} : vector<24x16x128xf32> to vector<20x16x128xf32>
    %159 = arith.maximumf %157, %158 : vector<20x16x128xf32>
    %c2_i32_51 = arith.constant 2 : i32
    %160 = tpu.dynamic_rotate %159 by %c2_i32_51 dim 1 : vector<20x16x128xf32>, i32 -> vector<20x16x128xf32>
    %cst_52 = arith.constant 0xFF800000 : f32
    %161 = vector.shape_cast %27 : vector<1x16x128xi1> to vector<1x16x128xi1>
    %162 = vector.broadcast %161 : vector<1x16x128xi1> to vector<20x16x128xi1>
    %163 = vector.broadcast %cst_52 : f32 to vector<20x16x128xf32>
    %164 = arith.select %162, %160, %163 : vector<20x16x128xi1>, vector<20x16x128xf32>
    %165 = arith.maximumf %159, %164 : vector<20x16x128xf32>
    %c1_i32_53 = arith.constant 1 : i32
    %166 = tpu.dynamic_rotate %159 by %c1_i32_53 dim 1 : vector<20x16x128xf32>, i32 -> vector<20x16x128xf32>
    %cst_54 = arith.constant 0xFF800000 : f32
    %167 = vector.shape_cast %36 : vector<1x16x128xi1> to vector<1x16x128xi1>
    %168 = vector.broadcast %167 : vector<1x16x128xi1> to vector<20x16x128xi1>
    %169 = vector.broadcast %cst_54 : f32 to vector<20x16x128xf32>
    %170 = arith.select %168, %166, %169 : vector<20x16x128xi1>, vector<20x16x128xf32>
    %171 = arith.maximumf %165, %170 : vector<20x16x128xf32>
    %c15_i32_55 = arith.constant 15 : i32
    %172 = tpu.dynamic_rotate %159 by %c15_i32_55 dim 1 : vector<20x16x128xf32>, i32 -> vector<20x16x128xf32>
    %cst_56 = arith.constant 0xFF800000 : f32
    %173 = vector.shape_cast %45 : vector<1x16x128xi1> to vector<1x16x128xi1>
    %174 = vector.broadcast %173 : vector<1x16x128xi1> to vector<20x16x128xi1>
    %175 = vector.broadcast %cst_56 : f32 to vector<20x16x128xf32>
    %176 = arith.select %174, %172, %175 : vector<20x16x128xi1>, vector<20x16x128xf32>
    %177 = arith.maximumf %171, %176 : vector<20x16x128xf32>
    %c14_i32_57 = arith.constant 14 : i32
    %178 = tpu.dynamic_rotate %159 by %c14_i32_57 dim 1 : vector<20x16x128xf32>, i32 -> vector<20x16x128xf32>
    %cst_58 = arith.constant 0xFF800000 : f32
    %179 = vector.shape_cast %54 : vector<1x16x128xi1> to vector<1x16x128xi1>
    %180 = vector.broadcast %179 : vector<1x16x128xi1> to vector<20x16x128xi1>
    %181 = vector.broadcast %cst_58 : f32 to vector<20x16x128xf32>
    %182 = arith.select %180, %178, %181 : vector<20x16x128xi1>, vector<20x16x128xf32>
    %183 = arith.maximumf %177, %182 : vector<20x16x128xf32>
    %184 = vector.shape_cast %183 : vector<20x16x128xf32> to vector<320x128xf32>
    %c2 = arith.constant 2 : index
    %c0_59 = arith.constant 0 : index
    %c0_60 = arith.constant 0 : index
    %185 = vector.load %arg5[%c2, %c0_59, %c0_60] : memref<4x128x128xf32, #tpu.memory_space<vmem>>, vector<1x128x128xf32>
    %186 = vector.shape_cast %185 : vector<1x128x128xf32> to vector<128x128xf32>
    %cst_61 = arith.constant dense<0.000000e+00> : vector<320x128xf32>
    %187 = tpu.matmul %184, %186, %cst_61 {dimension_numbers = #tpu.dot_dimension_numbers<[1], [0], [0], [1], [0, 0, 1, 1], [], []>} : vector<320x128xf32>, vector<128x128xf32>, vector<320x128xf32> -> vector<320x128xf32>
    %188 = vector.shape_cast %187 : vector<320x128xf32> to vector<20x16x128xf32>
    %189 = vector.extract_strided_slice %188 {offsets = [2, 0, 0], sizes = [16, 16, 128], strides = [1, 1, 1]} : vector<20x16x128xf32> to vector<16x16x128xf32>
    %190 = arith.addf %145, %189 : vector<16x16x128xf32>
    %191 = vector.extract_strided_slice %17 {offsets = [6, 0, 0], sizes = [20, 1, 1], strides = [1, 1, 1]} : vector<32x1x1xi1> to vector<20x1x1xi1>
    %cst_62 = arith.constant 0xFF800000 : f32
    %192 = vector.shape_cast %191 : vector<20x1x1xi1> to vector<20x1x1xi1>
    %193 = vector.broadcast %192 : vector<20x1x1xi1> to vector<20x16x128xi1>
    %194 = vector.broadcast %cst_62 : f32 to vector<20x16x128xf32>
    %195 = arith.select %193, %188, %194 : vector<20x16x128xi1>, vector<20x16x128xf32>
    %196 = vector.extract_strided_slice %195 {offsets = [2, 0, 0], sizes = [16, 16, 128], strides = [1, 1, 1]} : vector<20x16x128xf32> to vector<16x16x128xf32>
    %197 = vector.extract_strided_slice %195 {offsets = [0, 0, 0], sizes = [16, 16, 128], strides = [1, 1, 1]} : vector<20x16x128xf32> to vector<16x16x128xf32>
    %198 = arith.maximumf %196, %197 : vector<16x16x128xf32>
    %199 = vector.extract_strided_slice %195 {offsets = [1, 0, 0], sizes = [16, 16, 128], strides = [1, 1, 1]} : vector<20x16x128xf32> to vector<16x16x128xf32>
    %200 = arith.maximumf %198, %199 : vector<16x16x128xf32>
    %201 = vector.extract_strided_slice %195 {offsets = [3, 0, 0], sizes = [16, 16, 128], strides = [1, 1, 1]} : vector<20x16x128xf32> to vector<16x16x128xf32>
    %202 = arith.maximumf %200, %201 : vector<16x16x128xf32>
    %203 = vector.extract_strided_slice %195 {offsets = [4, 0, 0], sizes = [16, 16, 128], strides = [1, 1, 1]} : vector<20x16x128xf32> to vector<16x16x128xf32>
    %204 = arith.maximumf %202, %203 : vector<16x16x128xf32>
    %c2_i32_63 = arith.constant 2 : i32
    %205 = tpu.dynamic_rotate %204 by %c2_i32_63 dim 1 : vector<16x16x128xf32>, i32 -> vector<16x16x128xf32>
    %cst_64 = arith.constant 0xFF800000 : f32
    %206 = vector.shape_cast %27 : vector<1x16x128xi1> to vector<1x16x128xi1>
    %207 = vector.broadcast %206 : vector<1x16x128xi1> to vector<16x16x128xi1>
    %208 = vector.broadcast %cst_64 : f32 to vector<16x16x128xf32>
    %209 = arith.select %207, %205, %208 : vector<16x16x128xi1>, vector<16x16x128xf32>
    %210 = arith.maximumf %204, %209 : vector<16x16x128xf32>
    %c1_i32_65 = arith.constant 1 : i32
    %211 = tpu.dynamic_rotate %204 by %c1_i32_65 dim 1 : vector<16x16x128xf32>, i32 -> vector<16x16x128xf32>
    %cst_66 = arith.constant 0xFF800000 : f32
    %212 = vector.shape_cast %36 : vector<1x16x128xi1> to vector<1x16x128xi1>
    %213 = vector.broadcast %212 : vector<1x16x128xi1> to vector<16x16x128xi1>
    %214 = vector.broadcast %cst_66 : f32 to vector<16x16x128xf32>
    %215 = arith.select %213, %211, %214 : vector<16x16x128xi1>, vector<16x16x128xf32>
    %216 = arith.maximumf %210, %215 : vector<16x16x128xf32>
    %c15_i32_67 = arith.constant 15 : i32
    %217 = tpu.dynamic_rotate %204 by %c15_i32_67 dim 1 : vector<16x16x128xf32>, i32 -> vector<16x16x128xf32>
    %cst_68 = arith.constant 0xFF800000 : f32
    %218 = vector.shape_cast %45 : vector<1x16x128xi1> to vector<1x16x128xi1>
    %219 = vector.broadcast %218 : vector<1x16x128xi1> to vector<16x16x128xi1>
    %220 = vector.broadcast %cst_68 : f32 to vector<16x16x128xf32>
    %221 = arith.select %219, %217, %220 : vector<16x16x128xi1>, vector<16x16x128xf32>
    %222 = arith.maximumf %216, %221 : vector<16x16x128xf32>
    %c14_i32_69 = arith.constant 14 : i32
    %223 = tpu.dynamic_rotate %204 by %c14_i32_69 dim 1 : vector<16x16x128xf32>, i32 -> vector<16x16x128xf32>
    %cst_70 = arith.constant 0xFF800000 : f32
    %224 = vector.shape_cast %54 : vector<1x16x128xi1> to vector<1x16x128xi1>
    %225 = vector.broadcast %224 : vector<1x16x128xi1> to vector<16x16x128xi1>
    %226 = vector.broadcast %cst_70 : f32 to vector<16x16x128xf32>
    %227 = arith.select %225, %223, %226 : vector<16x16x128xi1>, vector<16x16x128xf32>
    %228 = arith.maximumf %222, %227 : vector<16x16x128xf32>
    %229 = vector.shape_cast %228 : vector<16x16x128xf32> to vector<256x128xf32>
    %c3 = arith.constant 3 : index
    %c0_71 = arith.constant 0 : index
    %c0_72 = arith.constant 0 : index
    %230 = vector.load %arg5[%c3, %c0_71, %c0_72] : memref<4x128x128xf32, #tpu.memory_space<vmem>>, vector<1x128x128xf32>
    %231 = vector.shape_cast %230 : vector<1x128x128xf32> to vector<128x128xf32>
    %cst_73 = arith.constant dense<0.000000e+00> : vector<256x128xf32>
    %232 = tpu.matmul %229, %231, %cst_73 {dimension_numbers = #tpu.dot_dimension_numbers<[1], [0], [0], [1], [0, 0, 1, 1], [], []>} : vector<256x128xf32>, vector<128x128xf32>, vector<256x128xf32> -> vector<256x128xf32>
    %233 = vector.shape_cast %232 : vector<256x128xf32> to vector<16x16x128xf32>
    %234 = arith.addf %190, %233 : vector<16x16x128xf32>
    %c0_74 = arith.constant 0 : index
    %c0_75 = arith.constant 0 : index
    %c0_76 = arith.constant 0 : index
    %c0_77 = arith.constant 0 : index
    %235 = vector.load %arg6[%c0_74, %c0_75, %c0_76, %c0_77] : memref<1x16x16x128xf32, #tpu.memory_space<vmem>>, vector<1x16x16x128xf32>
    %236 = vector.shape_cast %235 : vector<1x16x16x128xf32> to vector<16x16x128xf32>
    %237 = vector.shape_cast %234 : vector<16x16x128xf32> to vector<1x16x16x128xf32>
    tpu.vector_store %arg6[%c0_74, %c0_75, %c0_76, %c0_77], %237 {strides = array<i32>} : memref<1x16x16x128xf32, #tpu.memory_space<vmem>>, vector<1x16x16x128xf32>,
    return
  }
  func.func @transform_0(%arg0: i32, %arg1: i32) -> (i32, i32, i32, i32) {
    %c2_i32 = arith.constant 2 : i32
    %0 = arith.muli %arg1, %c2_i32 : i32
    %c1_i32 = arith.constant 1 : i32
    %1 = arith.subi %0, %c1_i32 : i32
    %c0_i32 = arith.constant 0 : i32
    %2 = arith.maxsi %1, %c0_i32 : i32
    %c0_i32_0 = arith.constant 0 : i32
    %c0_i32_1 = arith.constant 0 : i32
    %c0_i32_2 = arith.constant 0 : i32
    return %arg0, %2, %c0_i32_0, %c0_i32_1 : i32, i32, i32, i32
  }
  func.func @transform_1(%arg0: i32, %arg1: i32) -> (i32, i32, i32, i32) {
    %c0_i32 = arith.constant 0 : i32
    %c0_i32_0 = arith.constant 0 : i32
    %c0_i32_1 = arith.constant 0 : i32
    return %arg0, %arg1, %c0_i32, %c0_i32_0 : i32, i32, i32, i32
  }
  func.func @transform_2(%arg0: i32, %arg1: i32) -> (i32, i32, i32, i32) {
    %c1_i32 = arith.constant 1 : i32
    %0 = arith.addi %arg1, %c1_i32 : i32
    %c2_i32 = arith.constant 2 : i32
    %1 = arith.muli %0, %c2_i32 : i32
    %c1_i32_0 = arith.constant 1 : i32
    %2 = arith.minsi %1, %c1_i32_0 : i32
    %c0_i32 = arith.constant 0 : i32
    %c0_i32_1 = arith.constant 0 : i32
    %c0_i32_2 = arith.constant 0 : i32
    return %arg0, %2, %c0_i32, %c0_i32_1 : i32, i32, i32, i32
  }
  func.func @transform_3(%arg0: i32, %arg1: i32) -> (i32, i32, i32) {
    %c0_i32 = arith.constant 0 : i32
    %c0_i32_0 = arith.constant 0 : i32
    %c0_i32_1 = arith.constant 0 : i32
    %c0_i32_2 = arith.constant 0 : i32
    return %c0_i32, %c0_i32_0, %c0_i32_1 : i32, i32, i32
  }
  func.func @transform_4(%arg0: i32, %arg1: i32) -> (i32, i32, i32, i32) {
    %c0_i32 = arith.constant 0 : i32
    %c0_i32_0 = arith.constant 0 : i32
    %c0_i32_1 = arith.constant 0 : i32
    return %arg0, %arg1, %c0_i32, %c0_i32_0 : i32, i32, i32, i32
  }
}

</mosaic_0001>

<bundles_post_ra>
// kernel: tpu_custom_call.1
= control target key start
LH: loop header
LB: loop body
LE: loop exit
PB: predicated region body
PF: predicated region fallthrough
CT: control target
= control target key end

     0   :  { %s10863_s0 = inlined_call_operand.hbm [shape: f32[2,16,16,128], index: 0, kind: input, shape index: {}]   ;;  %s10864_s1 = inlined_call_operand.hbm [shape: f32[2,16,16,128], index: 1, kind: input, shape index: {}]   ;;  %s10865_s2 = inlined_call_operand.hbm [shape: f32[2,16,16,128], index: 2, kind: input, shape index: {}]   ;;  %s10866_s3 = inlined_call_operand.hbm [shape: f32[4,128,128], index: 3, kind: input, shape index: {}]   ;;  %s10867_s4 = inlined_call_operand.hbm [shape: f32[2,16,16,128], index: 4, kind: output, shape index: {}]  }
   0x1   :  { %10934 = sst [smem:[#allocation75_spill]] %s10863_s0 }
   0x2   :  { %10935 = sst [smem:[#allocation76_spill]] %s10864_s1 }
   0x3   :  { %10936 = sst [smem:[#allocation77_spill]] %s10866_s3 }
   0x4   :  { %9 = vsyncpa [#allocation3], 0 }
   0x5   :  { %11 = vsyncpa [#allocation3 + $0x1], 0 }
   0x6   :  { %12 = vsyncpa [#allocation6], 0 }
   0x7   :  { %14 = vsyncpa [#allocation6 + $0x1], 0 }
   0x8   :  { %15 = vsyncpa [#allocation9], 0 }
   0x9   :  { %16 = vsyncpa [#allocation4], 0 }
   0xa   :  { %18 = vsyncpa [#allocation4 + $0x1], 0  ;;  %s6995_s15 = smov 0   ;;  %s6997_s16 = smov 0  }
   0xb   :  { %s6999_s17 = smov 0   ;;  %s7001_s18 = smov 0  }
   0xc   :  { %s7003_s19 = smov 0   ;;  %s7005_s20 = smov 0  }
   0xd LB: > { %10937 = sst [smem:[#allocation15_spill]] %s6954_s19  ;;  %s36_s21 = sadd.s32 1, %s6954_s19  ;;  %s6958_s20 = sphi %s7005_s20, %s24_s20   ;;  %s6954_s19 = sphi %s7003_s19, %s11078_s19   ;;  %s6950_s18 = sphi %s7001_s18, %s11077_s18   ;;  %s6946_s17 = sphi %s6999_s17, %s11081_s17   ;;  %s6942_s16 = sphi %s6997_s16, %s11080_s16   ;;  %s6938_s15 = sphi %s6995_s15, %s11079_s15  }
   0xe   : > { %s53_s22 = sadd.s32 1, %s6946_s17  ;;  %p38_p0 = scmp.ge.s32.totalorder %s36_s21, 2 }
   0xf   : > { %p60_p1 = scmp.ne.s32.totalorder %s6946_s17, %s6942_s16  ;;  %p61_p2 = scmp.eq.s32.totalorder %s6958_s20, 0 }
  0x10   : > { %s11083_s21 = smov (%p38_p0, %s36_s21), 0  ;;  %p6667_p6 = scmp.lt.s32.totalorder %s6958_s20, 2 }
  0x11   : > { %10938 = sst [smem:[#allocation16_spill]] %s11083_s21  ;;  %p62_p3 = por %p61_p2, %p60_p1 }
  0x12   : > { %s48_s23 = ssub.s32 %s6954_s19, %s11083_s21  ;;  %s7040_s24 = sand.u32 1, %s6946_s17  }
  0x13   : > { %p51_p5 = scmp.eq.s32.totalorder %s48_s23, 0  ;;  %s7043_s25 = sshll.u32 %s6954_s19, 12 }
  0x14   : > { %p7048_p7 = pnand %p6667_p6, %p62_p3  ;;  %s244_s28 = sand.u32 1, %s6958_s20  }
  0x15   : > { %s7046_s26 = scalar_select %p51_p5, %s6946_s17, %s53_s22  }
  0x16   : > { %s5981_s29 = sshll.u32 %s7040_s24, 8  ;;  %s10940_s1 = sld [smem:[#allocation76_spill]] }
  0x17   : > { %s248_s7 = scalar_lea.vmem [#allocation5], %s5981_s29  ;;  %s7058_s9 = scalar_lea.sflag [#allocation6], %s244_s28 }
  0x18   : > { %s258_s8 = sshll.u32 %s248_s7, 4  ;;  %p10874_p8 = pneg %p7048_p7  ;;  %s259_s8 = int_to_ptr.vmem [resolvable:$true] %s258_s8 }
  0x19   : > { %s6773_s10 = scalar_lea.vmem %s259_s8, 4096  ;;  %s6960_s11 = smov [#allocation5]  }
  0x1a   : > { %p6774_p9 = scmp.ne.s32.totalorder %s259_s8, %s6773_s10  ;;  %s6778_s12 = sshll.u32 %s6960_s11, 4  ;;  %s6779_s12 = int_to_ptr.vmem [resolvable:$false] %s6778_s12 }
  0x1b   : > { %s6780_s13 = scalar_lea.vmem %s6779_s12, 8192  ;;  %p6781_p12 = scmp.lt.s32.totalorder %s259_s8, %s6779_s12 }
  0x1c   : > { %s257_s6 = scalar_lea.hbm %s10940_s1, %s7043_s25  ;;  %p6776_p10 = pnand %p6774_p9, %p10874_p8 }
  0x1d   : > { %p6782_p13 = scmp.lt.s32.totalorder %s6780_s13, %s6773_s10 }
  0x1e   : > { %p6777_p11 = pneg %p6776_p10 }
  0x1f   : > { %p6783_p0 = por %p6782_p13, %p6781_p12 }
  0x21   : > { %p6784_p2 = pnand %p6783_p0, %p6777_p11 }
  0x23   : > { %6787 = shalt.err (!%p6784_p2)
}
  0x24   : > { %s10868_s14 = smov 128   ;;  %s10870_s22 = smov 8  }
  0x25   : > { %6658 = dma.hbm_to_vmem [thread:$0]  (!%p7048_p7), %s257_s6, 4096, %s259_s8, %s7058_s9, %s10868_s14, %s10868_s14, %s10870_s22  }
  0x26   : > { %s7072_s23 = sadd.s32 4294967295, %s6958_s20   ;;  %s5974_s28 = sadd.s32 4294967294, %s6958_s20  }
  0x27   : > { %p66_p3 = scmp.ne.s32.totalorder %s6942_s16, %s6938_s15  ;;  %p10873_p5 = scmp.eq.s32.totalorder %s7072_s23, 0 }
  0x28   : > { %p177_p6 = scmp.eq.s32.totalorder %s7072_s23, 1  ;;  %p183_p9 = scmp.eq.s32.totalorder %s5974_s28, 1 }
  0x29   : > { %p5975_p10 = scmp.ge.s32.totalorder %s6958_s20, 1  ;;  %p7082_p11 = por %p10873_p5, %p66_p3 }
  0x2a   : > { %p7089_p12 = por %p177_p6, %p60_p1  ;;  %p7093_p13 = por %p183_p9, %p66_p3 }
  0x2b   : > { %p190_p0 = scmp.lt.s32.totalorder %s6958_s20, 3  ;;  %s6963_s7 = smov [#allocation8]  }
  0x2c   : > { %s202_s8 = sshll.u32 %s6963_s7, 4  ;;  %s5978_s10 = sshll.u32 %s7040_s24, 7  ;;  %s203_s8 = int_to_ptr.vmem [resolvable:$true] %s202_s8 }
  0x2d   : > { %p7098_p2 = pnand %p5975_p10, %p190_p0  ;;  %s10945_s0 = sld [smem:[#allocation75_spill]] }
  0x2e   : > { %s220_s14 = scalar_lea.vmem [#allocation2], %s5978_s10  ;;  %s7117_s1 = scalar_lea.vmem [#allocation7], %s5978_s10 }
  0x2f   : > { %p6648_p4 = pneg %p7098_p2  ;;  %s234_s22 = sshll.u32 %s220_s14, 4  ;;  %s7115_s22 = int_to_ptr.vmem [resolvable:$true] %s234_s22 }
  0x30   : > { %s6799_s21 = scalar_lea.vmem %s203_s8, 8192  ;;  %p6807_p0 = scmp.lt.s32.totalorder %s203_s8, %s203_s8 }
  0x31   : > { %p7111_p1 = pnand %p6648_p4, %p10873_p5  ;;  %p6800_p6 = scmp.ne.s32.totalorder %s203_s8, %s6799_s21 }
  0x32   : > { %p6808_p4 = scmp.lt.s32.totalorder %s6799_s21, %s6799_s21 }
  0x33   : > { %p6790_p3 = pneg %p7111_p1 }
  0x34   : > { %p6809_p5 = por %p6808_p4, %p6807_p0 }
  0x35   : > { %p6802_p9 = pnand %p6800_p6, %p6790_p3 }
  0x37   : > { %p6803_p10 = pneg %p6802_p9 }
  0x39   : > { %p6810_p8 = pnand %p6809_p5, %p6803_p10 }
  0x3b   : > { %6813 = shalt.err (!%p6810_p8)
}
  0x3c   : > { %s10947_s14 = smov 8   ;;  %s10948_s11 = smov 128  }
  0x3d   : > { %s10949_s3 = sld [smem:[#allocation77_spill]]  ;;  %s217_s7 = scalar_lea.sflag [#allocation3], %s7040_s24 }
  0x3e   : > { %s6827_s13 = scalar_lea.vmem %s7115_s22, 2048  ;;  %p10950_p5 = pneg %p7048_p7 }
  0x3f   : > { %p6828_p3 = scmp.ne.s32.totalorder %s7115_s22, %s6827_s13  ;;  %s6964_s21 = smov [#allocation2]  }
  0x40   : > { %s6832_s28 = sshll.u32 %s6964_s21, 4  ;;  %s6833_s28 = int_to_ptr.vmem [resolvable:$false] %s6832_s28 }
  0x41   : > { %p6830_p8 = pnand %p6828_p3, %p10950_p5  ;;  %s6834_s19 = scalar_lea.vmem %s6833_s28, 4096 }
  0x42   : > { %p6835_p9 = scmp.lt.s32.totalorder %s7115_s22, %s6833_s28  ;;  %p6836_p10 = scmp.lt.s32.totalorder %s6834_s19, %s6827_s13 }
  0x43   : > { %6651 = dma.hbm_to_vmem [thread:$0]  (!%p7111_p1), %s10949_s3, 8192, %s203_s8, [#allocation9], %s10948_s11, %s10948_s11, %s10947_s14  }
  0x44   : > { %p6831_p6 = pneg %p6830_p8  ;;  %p6837_p0 = por %p6836_p10, %p6835_p9 }
  0x46   : > { %p6838_p4 = pnand %p6837_p0, %p6831_p6 }
  0x48   : > { %6841 = shalt.err (!%p6838_p4)
}
  0x49   : > { %s10951_s10 = scalar_lea.hbm %s10945_s0, %s7043_s25  ;;  %s10952_s12 = sshll.u32 %s7117_s1, 4  ;;  %s287_s12 = int_to_ptr.vmem [resolvable:$true] %s10952_s12 }
  0x4a   : > { %6655 = dma.hbm_to_vmem [thread:$0]  (!%p7048_p7), %s10951_s10, 2048, %s7115_s22, %s217_s7, %s10948_s11, %s10948_s11, %s10947_s14  }
  0x4b   : > { %s6001_s19 = sadd.s32 2048, %s7043_s25  ;;  %s6855_s3 = scalar_lea.vmem %s287_s12, 2048 }
  0x4c   : > { %s285_s28 = scalar_lea.hbm %s10865_s2, %s6001_s19  ;;  %p6856_p1 = scmp.ne.s32.totalorder %s287_s12, %s6855_s3 }
  0x4d   : > { %p10953_p3 = pmov %p10950_p5  ;;  %s6965_s24 = smov [#allocation7]  }
  0x4e   : > { %s6860_s8 = sshll.u32 %s6965_s24, 4  ;;  %s6861_s8 = int_to_ptr.vmem [resolvable:$false] %s6860_s8 }
  0x4f   : > { %p6858_p5 = pnand %p6856_p1, %p10953_p3  ;;  %s6862_s0 = scalar_lea.vmem %s6861_s8, 4096 }
  0x50   : > { %p6863_p6 = scmp.lt.s32.totalorder %s287_s12, %s6861_s8  ;;  %p6864_p9 = scmp.lt.s32.totalorder %s6862_s0, %s6855_s3 }
  0x51   : > { %p6859_p8 = pneg %p6858_p5 }
  0x52   : > { %p6865_p10 = por %p6864_p9, %p6863_p6 }
  0x54   : > { %p6866_p0 = pnand %p6865_p10, %p6859_p8 }
  0x56   : > { %6869 = shalt.err (!%p6866_p0)
}
  0x57   : > { %6661 = dma.hbm_to_vmem [thread:$0]  (!%p7048_p7), %s285_s28, 2048, %s287_s12, %s7058_s9, %s10948_s11, %s10948_s11, %s10947_s14  }
  0x58   : > { %298 = sbr.rel (%p7098_p2) target bundleno = 1192 (0x4a8), region = 36 }
  0x5d   : > { %s7166_s1 = sand.u32 1, %s6942_s16  }
  0x5e   : > { %s301_s25 = scalar_lea.sflag [#allocation3], %s7166_s1 }
  0x5f   : > { %6921 = dma.done.wait (%p7082_p11), %s301_s25, 2048  }
  0x60   : > { %6923 = vsyncadd (%p7082_p11), %s301_s25, 4294965248  ;;  %s309_s0 = sand.u32 1, %s7072_s23   ;;  %s5989_s3 = sshll.u32 %s7166_s1, 8 }
  0x61   : > { %s310_s27 = scalar_lea.sflag [#allocation6], %s309_s0  ;;  %s7177_s9 = scalar_lea.vmem [#allocation5], %s5989_s3 }
  0x62   : > { %6925 = dma.done.wait (%p7082_p11), %s310_s27, 6144  }
  0x63   : > { %6927 = vsyncadd (%p7082_p11), %s310_s27, 4294961152  ;;  %p10954_p7 = scmp.eq.s32.totalorder %s7072_s23, 0 }
  0x65   : > { %6929 = dma.done.wait (%p10954_p7), [#allocation9], 8192   ;;  %p10955_p2 = pmov %p10954_p7 }
  0x66   : > { %v596_v0 = vlaneseq  ;;  %v6966_v2 = vmov -inf   ;;  %v1914_v10 = vld [vmem:[#allocation8 + $0x78] sm:$0xff]  ;;  %v1913_v11 = vld [vmem:[#allocation8 + $0x70] sm:$0xff]  ;;  %v1912_v18 = vld [vmem:[#allocation8 + $0x68] sm:$0xff]  ;;  %s10656_s22 = scalar_lea.vmem [#allocation10], %s5989_s3  ;;  %s6002_s23 = sshll.u32 %s6950_s18, 12 }
  0x67   : > { %6931 = vsyncadd (%p10955_p2), [#allocation9], 4294959104  ;;  %v983_v3 = vrot.slane %v6966_v2, 6  ;;  %v1212_v4 = vrot.slane %v6966_v2, 7  ;;  %v1441_v8 = vrot.slane %v6966_v2, 1  ;;  %v1670_v9 = vrot.slane %v6966_v2, 2  ;;  %6244 = vmatprep.subr.mxu0 %v1914_v10  ;;  %s10811_s14 = scalar_lea.hbm %s10867_s4, %s6002_s23 }
  0x68   : > { %v7187_v1 = vshrl.u32 %v596_v0, 7  ;;  %6245 = vmatpush3.msra.mxu0 %v1914_v10  ;;  %v1911_v21 = vld [vmem:[#allocation8 + $0x60] sm:$0xff]  ;;  %v7222_v26 = vld [vmem:[%s7177_s9 + $0x8] sm:$0xff]  ;;  %v1910_v27 = vld [vmem:[#allocation8 + $0x58] sm:$0xff]  ;;  %s5827_s29 = sshll.u32 %s10656_s22, 4  ;;  %s5811_s18 = scalar_lea.sflag [#allocation4], %s7166_s1  ;;  %s10813_s29 = int_to_ptr.vmem [resolvable:$true] %s5827_s29 }
  0x69   : > { %v1386_v15 = vmax.f32 %v983_v3, %v1212_v4  ;;  %6246 = vmatprep.subr.mxu0 %v1913_v11  ;;  %v7219_v25 = vld [vmem:[%s7177_s9] sm:$0xff]  ;;  %v1015_v30 = vrot.slane %v7222_v26, 6  ;;  %v7230_v32 = vld [vmem:[%s7177_s9 + $0x10] sm:$0xff]  ;;  %v1244_v33 = vrot.slane %v7222_v26, 7  ;;  %v1473_v35 = vrot.slane %v7222_v26, 1  ;;  %v7243_v41 = vld [vmem:[%s7177_s9 + $0x18] sm:$0xff] }
  0x6a   : > { %v7190_v5 = vadd.s32 4294967294, %v7187_v1  ;;  %v7193_v6 = vadd.s32 4294967295, %v7187_v1  ;;  %v598_v7 = vadd.s32 8, %v7187_v1  ;;  %6247 = vmatpush3.msra.mxu0 %v1913_v11  ;;  %vm1039_vm4 = vcmp.lt.s32.totalorder %v7187_v1, 2  ;;  %v1909_v37 = vld [vmem:[#allocation8 + $0x50] sm:$0xff]  ;;  %v1908_v47 = vld [vmem:[#allocation8 + $0x48] sm:$0xff] }
  0x6b   : > { %6248 = vmatprep.subr.mxu0 %v1912_v18  ;;  %vm1268_vm5 = vcmp.lt.s32.totalorder %v7187_v1, 1  ;;  %vm1497_vm6 = vcmp.lt.s32.totalorder %v7187_v1, 7  ;;  %vm1726_vm7 = vcmp.lt.s32.totalorder %v7187_v1, 6  ;;  %v987_v29 = vrot.slane %v7219_v25, 6  ;;  %v1907_v56 = vld [vmem:[#allocation8 + $0x40] sm:$0xff]  ;;  %v1906_v2 = vld [vmem:[#allocation8 + $0x38] sm:$0xff] }
  0x6c   : > { %vm601_vm0 = vcmp.ge.s32.totalorder %v7190_v5, 0  ;;  %vm609_vm1 = vcmp.ge.s32.totalorder %v7193_v6, 0  ;;  %v7202_v14 = vadd.s32 1, %v598_v7  ;;  %v7204_v17 = vadd.s32 2, %v598_v7  ;;  %6249 = vmatpush3.msra.mxu0 %v1912_v18  ;;  %s6870_s11 = scalar_lea.vmem %s10813_s29, 4096  ;;  %s6967_s10 = smov [#allocation10]  }
  0x6d   : > { %v1100_v12 = vsel %vm601_vm0, %v983_v3, -inf  ;;  %v1329_v13 = vsel %vm609_vm1, %v1212_v4, -inf  ;;  %v1216_v31 = vrot.slane %v7219_v25, 7  ;;  %6250 = vmatprep.subr.mxu0 %v1911_v21  ;;  %v1445_v34 = vrot.slane %v7219_v25, 1  ;;  %p6871_p11 = scmp.ne.s32.totalorder %s10813_s29, %s6870_s11  ;;  %s6874_s12 = sshll.u32 %s6967_s10, 4  ;;  %s6875_s12 = int_to_ptr.vmem [resolvable:$false] %s6874_s12 }
  0x6e   : > { %v1385_v16 = vmax.f32 %v1100_v12, %v1329_v13  ;;  %vm620_vm2 = vcmp.lt.s32.totalorder %v7202_v14, 16  ;;  %vm628_vm3 = vcmp.lt.s32.totalorder %v7204_v17, 16  ;;  %v1674_v36 = vrot.slane %v7219_v25, 2  ;;  %6251 = vmatpush3.msra.mxu0 %v1911_v21  ;;  %v7279_v13 = vld [vmem:[%s7177_s9 + $0x20] sm:$0xff]  ;;  %v7290_v21 = vld [vmem:[%s7177_s9 + $0x28] sm:$0xff]  ;;  %s6876_s19 = scalar_lea.vmem %s6875_s12, 8192  ;;  %p6877_p3 = scmp.lt.s32.totalorder %s10813_s29, %s6875_s12 }
  0x6f   : > { %v1559_v20 = vsel %vm620_vm2, %v1441_v8, -inf  ;;  %v1788_v23 = vsel %vm628_vm3, %v1670_v9, -inf  ;;  %v1072_v38 = vsel %vm1039_vm4, %v1015_v30, %v987_v29  ;;  %v1702_v39 = vrot.slane %v7222_v26, 2  ;;  %6252 = vmatprep.subr.mxu0 %v1910_v27  ;;  %p6872_p4 = pnand %p6871_p11, %p7089_p12  ;;  %p6878_p5 = scmp.lt.s32.totalorder %s6876_s19, %s6870_s11 }
  0x70   : > { %v1614_v19 = vmax.f32 %v1385_v16, %v1441_v8  ;;  %v1615_v22 = vmax.f32 %v1386_v15, %v1559_v20  ;;  %v1044_v40 = vsel %vm1039_vm4, %v987_v29, %v1015_v30  ;;  %v883_v42 = vmax.f32 %v7219_v25, %v7230_v32  ;;  %6253 = vmatpush3.msra.mxu0 %v1910_v27  ;;  %v1905_v15 = vld [vmem:[#allocation8 + $0x30] sm:$0xff]  ;;  %v1904_v30 = vld [vmem:[#allocation8 + $0x28] sm:$0xff] }
  0x71   : > { %v1108_v43 = vsel %vm601_vm0, %v1072_v38, -inf  ;;  %v1301_v44 = vsel %vm1268_vm5, %v1244_v33, %v1216_v31  ;;  %v1502_v45 = vsel %vm1497_vm6, %v1445_v34, %v1473_v35  ;;  %v1165_v46 = vmax.f32 %v7222_v26, %v1044_v40  ;;  %6254 = vmatprep.subr.mxu0 %v1909_v37  ;;  %v1903_v40 = vld [vmem:[#allocation8 + $0x20] sm:$0xff]  ;;  %p6873_p1 = pneg %p6872_p4  ;;  %p6879_p8 = por %p6878_p5, %p6877_p3 }
  0x72   : > { %v7216_v24 = vmax.f32 %v1614_v19, %v1670_v9  ;;  %v7224_v28 = vmax.f32 %v1615_v22, %v1788_v23  ;;  %v1164_v48 = vmax.f32 %v7219_v25, %v1108_v43  ;;  %v1337_v49 = vsel %vm609_vm1, %v1301_v44, -inf  ;;  %6255 = vmatpush3.msra.mxu0 %v1909_v37 }
  0x73   : > { %v1731_v50 = vsel %vm1726_vm7, %v1674_v36, %v1702_v39  ;;  %v1273_v51 = vsel %vm1268_vm5, %v1216_v31, %v1244_v33  ;;  %v1530_v53 = vsel %vm1497_vm6, %v1473_v35, %v1445_v34  ;;  %v1759_v54 = vsel %vm1726_vm7, %v1702_v39, %v1674_v36  ;;  %6256 = vmatprep.subr.mxu0 %v1908_v47  ;;  %p6880_p6 = pnand %p6879_p8, %p6873_p1 }
  0x74   : > { %6276 = vmatprep.mubr.f32.mxu0 %v7216_v24  ;;  %6392 = vmatprep.mubr.f32.mxu1 %v7216_v24  ;;  %v1394_v52 = vmax.f32 %v1165_v46, %v1273_v51  ;;  %v884_v55 = vmax.f32 %v7222_v26, %v7243_v41  ;;  %v1393_v57 = vmax.f32 %v1164_v48, %v1337_v49  ;;  %v1567_v58 = vsel %vm620_vm2, %v1530_v53, -inf }
  0x75   : > { %v1796_v59 = vsel %vm628_vm3, %v1759_v54, -inf  ;;  %v988_v60 = vrot.slane %v883_v42, 6  ;;  %v1217_v63 = vrot.slane %v883_v42, 7  ;;  %6257 = vmatpush3.msra.mxu0 %v1908_v47  ;;  %v1446_v4 = vrot.slane %v883_v42, 1 }
  0x76   : > { %v1623_v61 = vmax.f32 %v1394_v52, %v1567_v58  ;;  %v1016_v62 = vrot.slane %v884_v55, 6  ;;  %v1245_v0 = vrot.slane %v884_v55, 7  ;;  %v1622_v3 = vmax.f32 %v1393_v57, %v1502_v45  ;;  %6258 = vmatprep.subr.mxu0 %v1907_v56 }
  0x77   : > { %v1474_v7 = vrot.slane %v884_v55, 1  ;;  %v1675_v8 = vrot.slane %v883_v42, 2  ;;  %v1703_v12 = vrot.slane %v884_v55, 2  ;;  %6259 = vmatpush3.msra.mxu0 %v1907_v56  ;;  %v939_v35 = vmax.f32 %v883_v42, %v7279_v13 }
  0x78   : > { %v7272_v9 = vmax.f32 %v1623_v61, %v1796_v59  ;;  %v1073_v10 = vsel %vm1039_vm4, %v1016_v62, %v988_v60  ;;  %v1302_v11 = vsel %vm1268_vm5, %v1245_v0, %v1217_v63  ;;  %v7281_v16 = vmax.f32 %v1622_v3, %v1731_v50  ;;  %6260 = vmatprep.subr.mxu0 %v1906_v2  ;;  %v1902_v50 = vld [vmem:[#allocation8 + $0x18] sm:$0xff]  ;;  %v1901_v59 = vld [vmem:[#allocation8 + $0x10] sm:$0xff] }
  0x79   : > { %v1110_v18 = vsel %vm601_vm0, %v1073_v10, -inf  ;;  %v1339_v19 = vsel %vm609_vm1, %v1302_v11, -inf  ;;  %v1503_v20 = vsel %vm1497_vm6, %v1446_v4, %v1474_v7  ;;  %v1732_v23 = vsel %vm1726_vm7, %v1675_v8, %v1703_v12  ;;  %6261 = vmatpush3.msra.mxu0 %v1906_v2 }
  0x7a   : > { %v1166_v22 = vmax.f32 %v883_v42, %v1110_v18  ;;  %v1045_v27 = vsel %vm1039_vm4, %v988_v60, %v1016_v62  ;;  %v1274_v29 = vsel %vm1268_vm5, %v1217_v63, %v1245_v0  ;;  %v1531_v33 = vsel %vm1497_vm6, %v1474_v7, %v1446_v4  ;;  %6262 = vmatprep.subr.mxu0 %v1905_v15  ;;  %v1900_v7 = vld [vmem:[#allocation8 + $0x8] sm:$0xff] }
  0x7b   : > { %v1167_v31 = vmax.f32 %v884_v55, %v1045_v27  ;;  %v1760_v34 = vsel %vm1726_vm7, %v1703_v12, %v1675_v8  ;;  %v1569_v37 = vsel %vm620_vm2, %v1531_v33, -inf  ;;  %v940_v39 = vmax.f32 %v884_v55, %v7290_v21  ;;  %6263 = vmatpush3.msra.mxu0 %v1905_v15  ;;  %v7337_v12 = vld [vmem:[%s7177_s9 + $0x30] sm:$0xff]  ;;  %v1899_v27 = vld [vmem:[#allocation8] sm:$0xff] }
  0x7c   : > { %v1395_v36 = vmax.f32 %v1166_v22, %v1339_v19  ;;  %v1798_v38 = vsel %vm628_vm3, %v1760_v34, -inf  ;;  %v989_v44 = vrot.slane %v939_v35, 6  ;;  %v1218_v45 = vrot.slane %v939_v35, 7  ;;  %6264 = vmatprep.subr.mxu0 %v1904_v30 }
  0x7d   : > { %v1396_v43 = vmax.f32 %v1167_v31, %v1274_v29  ;;  %v1447_v46 = vrot.slane %v939_v35, 1  ;;  %v1017_v48 = vrot.slane %v940_v39, 6  ;;  %v1246_v42 = vrot.slane %v940_v39, 7  ;;  %6265 = vmatpush3.msra.mxu0 %v1904_v30 }
  0x7e   : > { %v1624_v47 = vmax.f32 %v1395_v36, %v1503_v20  ;;  %v1475_v49 = vrot.slane %v940_v39, 1  ;;  %v1676_v52 = vrot.slane %v939_v35, 2  ;;  %v1704_v53 = vrot.slane %v940_v39, 2  ;;  %6266 = vmatprep.subr.mxu0 %v1903_v40  ;;  %v7344_v20 = vld [vmem:[%s7177_s9 + $0x38] sm:$0xff] }
  0x7f   : > { %v1625_v51 = vmax.f32 %v1396_v43, %v1569_v37  ;;  %v829_v54 = vmax.f32 %v7230_v32, %v7219_v25  ;;  %v1074_v56 = vsel %vm1039_vm4, %v1017_v48, %v989_v44  ;;  %v1303_v57 = vsel %vm1268_vm5, %v1246_v42, %v1218_v45  ;;  %6267 = vmatpush3.msra.mxu0 %v1903_v40 }
  0x80   : > { %v7310_v55 = vmax.f32 %v1624_v47, %v1732_v23  ;;  %v1504_v58 = vsel %vm1497_vm6, %v1447_v46, %v1475_v49  ;;  %v1112_v61 = vsel %vm601_vm0, %v1074_v56, -inf  ;;  %v1341_v62 = vsel %vm609_vm1, %v1303_v57, -inf  ;;  %6268 = vmatprep.subr.mxu0 %v1902_v50  ;;  %v7380_v56 = vld [vmem:[%s7177_s9 + $0x40] sm:$0xff] }
  0x81   : > { %v7318_v60 = vmax.f32 %v1625_v51, %v1798_v38  ;;  %v1733_v63 = vsel %vm1726_vm7, %v1676_v52, %v1704_v53  ;;  %v1168_v0 = vmax.f32 %v939_v35, %v1112_v61  ;;  %v1046_v2 = vsel %vm1039_vm4, %v989_v44, %v1017_v48  ;;  %6269 = vmatpush3.msra.mxu0 %v1902_v50 }
  0x82   : > { %v1275_v3 = vsel %vm1268_vm5, %v1218_v45, %v1246_v42  ;;  %v1532_v4 = vsel %vm1497_vm6, %v1475_v49, %v1447_v46  ;;  %v1169_v8 = vmax.f32 %v940_v39, %v1046_v2  ;;  %v1761_v11 = vsel %vm1726_vm7, %v1704_v53, %v1676_v52  ;;  %6270 = vmatprep.subr.mxu0 %v1901_v59 }
  0x83   : > { %v1571_v10 = vsel %vm620_vm2, %v1532_v4, -inf  ;;  %v830_v15 = vmax.f32 %v7243_v41, %v7222_v26  ;;  %v1397_v18 = vmax.f32 %v1168_v0, %v1341_v62  ;;  %v1800_v19 = vsel %vm628_vm3, %v1761_v11, -inf  ;;  %6271 = vmatpush3.msra.mxu0 %v1901_v59  ;;  %v7389_v62 = vld [vmem:[%s7177_s9 + $0x48] sm:$0xff] }
  0x84   : > { %v885_v22 = vmax.f32 %v829_v54, %v7279_v13  ;;  %v775_v23 = vmax.f32 %v7279_v13, %v7219_v25  ;;  %v1398_v29 = vmax.f32 %v1169_v8, %v1275_v3  ;;  %v776_v31 = vmax.f32 %v7290_v21, %v7222_v26  ;;  %6272 = vmatprep.subr.mxu0 %v1900_v7 }
  0x85   : > { %v886_v30 = vmax.f32 %v830_v15, %v7290_v21  ;;  %v777_v33 = vmax.f32 %v7337_v12, %v7230_v32  ;;  %v1626_v34 = vmax.f32 %v1397_v18, %v1504_v58  ;;  %v778_v25 = vmax.f32 %v7344_v20, %v7243_v41  ;;  %6273 = vmatpush3.msra.mxu0 %v1900_v7 }
  0x86   : > { %v941_v35 = vmax.f32 %v885_v22, %v7337_v12  ;;  %v831_v36 = vmax.f32 %v775_v23, %v7230_v32  ;;  %v1627_v37 = vmax.f32 %v1398_v29, %v1571_v10  ;;  %v832_v39 = vmax.f32 %v776_v31, %v7243_v41  ;;  %6274 = vmatprep.subr.mxu0 %v1899_v27 }
  0x87   : > { %v942_v38 = vmax.f32 %v886_v30, %v7344_v20  ;;  %v7361_v26 = vmax.f32 %v777_v33, %v7279_v13  ;;  %v7363_v40 = vmax.f32 %v1626_v34, %v1733_v63  ;;  %6275 = vmatpush3.msra.mxu0 %v1899_v27  ;;  %v834_v18 = vmax.f32 %v778_v25, %v7290_v21 }
  0x88   : > { %v990_v43 = vrot.slane %v941_v35, 6  ;;  %v1219_v44 = vrot.slane %v941_v35, 7  ;;  %v1448_v45 = vrot.slane %v941_v35, 1  ;;  %v7365_v32 = vmax.f32 %v1627_v37, %v1800_v19  ;;  %6277 = vmatmul.mubr.f32.vlgmr.msra.gmra.mxu0 %v7224_v28 }
  0x89   : > { %v1018_v46 = vrot.slane %v942_v38, 6  ;;  %v1247_v47 = vrot.slane %v942_v38, 7  ;;  %v1476_v48 = vrot.slane %v942_v38, 1  ;;  %v1677_v41 = vrot.slane %v941_v35, 2  ;;  %6279 = vmatprep.mubr.f32.mxu0 %v7216_v24 }
  0x8a   : > { %v1705_v42 = vrot.slane %v942_v38, 2  ;;  %v887_v49 = vmax.f32 %v831_v36, %v7337_v12  ;;  %v888_v50 = vmax.f32 %v832_v39, %v7344_v20  ;;  %v889_v19 = vmax.f32 %v7361_v26, %v7380_v56 }
  0x8b   : > { %v1075_v51 = vsel %vm1039_vm4, %v1018_v46, %v990_v43  ;;  %v1304_v52 = vsel %vm1268_vm5, %v1247_v47, %v1219_v44  ;;  %v1505_v53 = vsel %vm1497_vm6, %v1448_v45, %v1476_v48  ;;  %v1047_v54 = vsel %vm1039_vm4, %v990_v43, %v1018_v46 }
  0x8c   : > { %v1114_v57 = vsel %vm601_vm0, %v1075_v51, -inf  ;;  %v1343_v58 = vsel %vm609_vm1, %v1304_v52, -inf  ;;  %v1734_v59 = vsel %vm1726_vm7, %v1677_v41, %v1705_v42  ;;  %v1171_v61 = vmax.f32 %v942_v38, %v1047_v54  ;;  %6280 = vmatmul.mubr.f32.gmra.mxu0 %v7224_v28 }
  0x8d   : > { %v1170_v63 = vmax.f32 %v941_v35, %v1114_v57  ;;  %v1276_v0 = vsel %vm1268_vm5, %v1219_v44, %v1247_v47  ;;  %v1533_v2 = vsel %vm1497_vm6, %v1476_v48, %v1448_v45  ;;  %v1762_v3 = vsel %vm1726_vm7, %v1705_v42, %v1677_v41  ;;  %6282 = vmatprep.mubr.f32.mxu0 %v7216_v24  ;;  %v7422_v44 = vld [vmem:[%s7177_s9 + $0x50] sm:$0xff]  ;;  %v7425_v45 = vld [vmem:[%s7177_s9 + $0x58] sm:$0xff] }
  0x8e   : > { %v1400_v4 = vmax.f32 %v1171_v61, %v1276_v0  ;;  %v1573_v7 = vsel %vm620_vm2, %v1533_v2, -inf  ;;  %v1802_v8 = vsel %vm628_vm3, %v1762_v3, -inf  ;;  %v943_v10 = vmax.f32 %v887_v49, %v7380_v56 }
  0x8f   : > { %v1399_v11 = vmax.f32 %v1170_v63, %v1343_v58  ;;  %v944_v15 = vmax.f32 %v888_v50, %v7389_v62  ;;  %v890_v25 = vmax.f32 %v834_v18, %v7389_v62  ;;  %v945_v54 = vmax.f32 %v889_v19, %v7422_v44 }
  0x90   : > { %v1629_v22 = vmax.f32 %v1400_v4, %v1573_v7  ;;  %v991_v23 = vrot.slane %v943_v10, 6  ;;  %v1220_v27 = vrot.slane %v943_v10, 7  ;;  %v1449_v29 = vrot.slane %v943_v10, 1  ;;  %6283 = vmatmul.mubr.f32.gmra.mxu0 %v7224_v28 }
  0x91   : > { %v1628_v30 = vmax.f32 %v1399_v11, %v1505_v53  ;;  %v1019_v31 = vrot.slane %v944_v15, 6  ;;  %v1248_v33 = vrot.slane %v944_v15, 7  ;;  %v1477_v34 = vrot.slane %v944_v15, 1  ;;  %6285 = vmatprep.mubr.f32.mxu0 %v7216_v24 }
  0x92   : > { %v7409_v35 = vmax.f32 %v1629_v22, %v1802_v8  ;;  %v1678_v36 = vrot.slane %v943_v10, 2  ;;  %v1706_v37 = vrot.slane %v944_v15, 2  ;;  %v946_v57 = vmax.f32 %v890_v25, %v7425_v45 }
  0x93   : > { %v7413_v38 = vmax.f32 %v1628_v30, %v1734_v59  ;;  %v1076_v39 = vsel %vm1039_vm4, %v1019_v31, %v991_v23  ;;  %v1305_v26 = vsel %vm1268_vm5, %v1248_v33, %v1220_v27  ;;  %v1506_v43 = vsel %vm1497_vm6, %v1449_v29, %v1477_v34 }
  0x94   : > { %v1116_v46 = vsel %vm601_vm0, %v1076_v39, -inf  ;;  %v1345_v47 = vsel %vm609_vm1, %v1305_v26, -inf  ;;  %v1735_v48 = vsel %vm1726_vm7, %v1678_v36, %v1706_v37  ;;  %v1048_v41 = vsel %vm1039_vm4, %v991_v23, %v1019_v31  ;;  %6286 = vmatmul.mubr.f32.gmra.mxu0 %v7224_v28 }
  0x95   : > { %v1172_v42 = vmax.f32 %v943_v10, %v1116_v46  ;;  %v1173_v49 = vmax.f32 %v944_v15, %v1048_v41  ;;  %v1277_v50 = vsel %vm1268_vm5, %v1220_v27, %v1248_v33  ;;  %v1534_v51 = vsel %vm1497_vm6, %v1477_v34, %v1449_v29  ;;  %6288 = vmatprep.mubr.f32.mxu0 %v7281_v16  ;;  %v7484_v46 = vld [vmem:[%s7177_s9 + $0x60] sm:$0xff] }
  0x96   : > { %v1575_v52 = vsel %vm620_vm2, %v1534_v51, -inf  ;;  %v1763_v53 = vsel %vm1726_vm7, %v1706_v37, %v1678_v36  ;;  %v779_v63 = vmax.f32 %v7380_v56, %v7279_v13  ;;  %v992_v0 = vrot.slane %v945_v54, 6 }
  0x97   : > { %v1401_v58 = vmax.f32 %v1172_v42, %v1345_v47  ;;  %v1402_v59 = vmax.f32 %v1173_v49, %v1277_v50  ;;  %v1804_v61 = vsel %vm628_vm3, %v1763_v53, -inf  ;;  %v1020_v2 = vrot.slane %v946_v57, 6  ;;  %v7487_v47 = vld [vmem:[%s7177_s9 + $0x68] sm:$0xff] }
  0x98   : > { %v1221_v3 = vrot.slane %v945_v54, 7  ;;  %v1249_v4 = vrot.slane %v946_v57, 7  ;;  %v1450_v10 = vrot.slane %v945_v54, 1  ;;  %v1478_v11 = vrot.slane %v946_v57, 1  ;;  %6289 = vmatmul.mubr.f32.gmra.mxu0 %v7272_v9 }
  0x99   : > { %v1630_v7 = vmax.f32 %v1401_v58, %v1506_v43  ;;  %v1631_v8 = vmax.f32 %v1402_v59, %v1575_v52  ;;  %v1077_v16 = vsel %vm1039_vm4, %v1020_v2, %v992_v0  ;;  %v1679_v18 = vrot.slane %v945_v54, 2  ;;  %6291 = vmatprep.mubr.f32.mxu0 %v7310_v55 }
  0x9a   : > { %v1306_v15 = vsel %vm1268_vm5, %v1249_v4, %v1221_v3  ;;  %v1707_v19 = vrot.slane %v946_v57, 2  ;;  %v1118_v23 = vsel %vm601_vm0, %v1077_v16, -inf  ;;  %v1507_v29 = vsel %vm1497_vm6, %v1450_v10, %v1478_v11 }
  0x9b   : > { %v1859_v13 = vmax.f32 %v1630_v7, %v1735_v48  ;;  %v7457_v22 = vmax.f32 %v1631_v8, %v1804_v61  ;;  %v1347_v27 = vsel %vm609_vm1, %v1306_v15, -inf  ;;  %v1174_v9 = vmax.f32 %v945_v54, %v1118_v23  ;;  %v7509_v61 = vld [vmem:[%s7177_s9 + $0x70] sm:$0xff] }
  0x9c   : > { %v1736_v30 = vsel %vm1726_vm7, %v1679_v18, %v1707_v19  ;;  %v1049_v55 = vsel %vm1039_vm4, %v992_v0, %v1020_v2  ;;  %v1278_v33 = vsel %vm1268_vm5, %v1221_v3, %v1249_v4  ;;  %v1535_v34 = vsel %vm1497_vm6, %v1478_v11, %v1450_v10  ;;  %6292 = vmatmul.mubr.f32.gmra.mxu0 %v7318_v60  ;;  %v7518_v0 = vld [vmem:[%s7177_s9 + $0x80] sm:$0xff]  ;;  %v7521_v2 = vld [vmem:[%s7177_s9 + $0x88] sm:$0xff] }
  0x9d   : > { %v1175_v31 = vmax.f32 %v946_v57, %v1049_v55  ;;  %v1764_v36 = vsel %vm1726_vm7, %v1707_v19, %v1679_v18  ;;  %v1403_v37 = vmax.f32 %v1174_v9, %v1347_v27  ;;  %v1577_v25 = vsel %vm620_vm2, %v1535_v34, -inf  ;;  %6294 = vmatprep.mubr.f32.mxu0 %v7363_v40 }
  0x9e   : > { %v1806_v39 = vsel %vm628_vm3, %v1764_v36, -inf  ;;  %v780_v26 = vmax.f32 %v7389_v62, %v7290_v21  ;;  %v835_v48 = vmax.f32 %v779_v63, %v7337_v12  ;;  %v781_v60 = vmax.f32 %v7422_v44, %v7337_v12 }
  0x9f   : > { %v1404_v43 = vmax.f32 %v1175_v31, %v1278_v33  ;;  %v782_v41 = vmax.f32 %v7425_v45, %v7344_v20  ;;  %v1632_v42 = vmax.f32 %v1403_v37, %v1507_v29  ;;  %v783_v21 = vmax.f32 %v7484_v46, %v7380_v56 }
  0xa0   : > { %v836_v49 = vmax.f32 %v780_v26, %v7344_v20  ;;  %v784_v40 = vmax.f32 %v7487_v47, %v7389_v62  ;;  %v891_v51 = vmax.f32 %v835_v48, %v7422_v44  ;;  %v837_v12 = vmax.f32 %v781_v60, %v7380_v56  ;;  %6295 = vmatmul.mubr.f32.gmra.mxu0 %v7365_v32  ;;  %v7512_v56 = vld [vmem:[%s7177_s9 + $0x78] sm:$0xff] }
  0xa1   : > { %v1633_v50 = vmax.f32 %v1404_v43, %v1577_v25  ;;  %v838_v52 = vmax.f32 %v782_v41, %v7389_v62  ;;  %v1861_v53 = vmax.f32 %v1632_v42, %v1736_v30  ;;  %v839_v54 = vmax.f32 %v783_v21, %v7422_v44  ;;  %6297 = vmatprep.mubr.f32.mxu0 %v7413_v38 }
  0xa2   : > { %v892_v20 = vmax.f32 %v836_v49, %v7425_v45  ;;  %v840_v57 = vmax.f32 %v784_v40, %v7425_v45  ;;  %v947_v59 = vmax.f32 %v891_v51, %v7484_v46  ;;  %v893_v62 = vmax.f32 %v837_v12, %v7484_v46 }
  0xa3   : > { %v1862_v58 = vmax.f32 %v1633_v50, %v1806_v39  ;;  %v894_v32 = vmax.f32 %v838_v52, %v7487_v47  ;;  %v895_v3 = vmax.f32 %v839_v54, %v7509_v61  ;;  %v785_v4 = vmax.f32 %v7509_v61, %v7422_v44 }
  0xa4   : > { %v948_v63 = vmax.f32 %v892_v20, %v7487_v47  ;;  %v896_v38 = vmax.f32 %v840_v57, %v7512_v56  ;;  %v993_v7 = vrot.slane %v947_v59, 6  ;;  %v1222_v8 = vrot.slane %v947_v59, 7  ;;  %6298 = vmatmul.mubr.f32.gmra.mxu0 %v7409_v35 }
  0xa5   : > { %v1451_v10 = vrot.slane %v947_v59, 1  ;;  %v1680_v11 = vrot.slane %v947_v59, 2  ;;  %6300 = vmatprep.mubr.f32.mxu0 %v1859_v13  ;;  %v949_v23 = vmax.f32 %v893_v62, %v7509_v61  ;;  %v950_v27 = vmax.f32 %v894_v32, %v7512_v56 }
  0xa6   : > { %v1021_v16 = vrot.slane %v948_v63, 6  ;;  %v1250_v15 = vrot.slane %v948_v63, 7  ;;  %v1479_v18 = vrot.slane %v948_v63, 1  ;;  %v1708_v19 = vrot.slane %v948_v63, 2 }
  0xa7   : > { %v7531_v9 = vmax.f32 %v895_v3, %v7518_v0  ;;  %v7534_v29 = vmax.f32 %v896_v38, %v7521_v2  ;;  %v994_v60 = vrot.slane %v949_v23, 6  ;;  %v1022_v41 = vrot.slane %v950_v27, 6 }
  0xa8   : > { %v1078_v30 = vsel %vm1039_vm4, %v1021_v16, %v993_v7  ;;  %v1307_v35 = vsel %vm1268_vm5, %v1250_v15, %v1222_v8  ;;  %v1508_v55 = vsel %vm1497_vm6, %v1451_v10, %v1479_v18  ;;  %v1737_v13 = vsel %vm1726_vm7, %v1680_v11, %v1708_v19  ;;  %6301 = vmatmul.mubr.f32.gmra.mxu0 %v7457_v22 }
  0xa9   : > { %v1120_v31 = vsel %vm601_vm0, %v1078_v30, -inf  ;;  %v1349_v33 = vsel %vm609_vm1, %v1307_v35, -inf  ;;  %v1050_v34 = vsel %vm1039_vm4, %v993_v7, %v1021_v16  ;;  %v1279_v36 = vsel %vm1268_vm5, %v1222_v8, %v1250_v15  ;;  %6303 = vmatprep.mubr.f32.mxu0 %v1861_v53 }
  0xaa   : > { %v1176_v37 = vmax.f32 %v947_v59, %v1120_v31  ;;  %v1177_v25 = vmax.f32 %v948_v63, %v1050_v34  ;;  %v1536_v39 = vsel %vm1497_vm6, %v1479_v18, %v1451_v10  ;;  %v1765_v26 = vsel %vm1726_vm7, %v1708_v19, %v1680_v11 }
  0xab   : > { %v1579_v43 = vsel %vm620_vm2, %v1536_v39, -inf  ;;  %v1808_v48 = vsel %vm628_vm3, %v1765_v26, -inf  ;;  %v1223_v22 = vrot.slane %v949_v23, 7  ;;  %v1251_v21 = vrot.slane %v950_v27, 7 }
  0xac   : > { %v1405_v42 = vmax.f32 %v1176_v37, %v1349_v33  ;;  %v1406_v49 = vmax.f32 %v1177_v25, %v1279_v36  ;;  %v1079_v40 = vsel %vm1039_vm4, %v1022_v41, %v994_v60  ;;  %v1452_v50 = vrot.slane %v949_v23, 1  ;;  %6304 = vmatmul.mubr.f32.gmra.mxu0 %v1862_v58 }
  0xad   : > { %v1480_v51 = vrot.slane %v950_v27, 1  ;;  %v1681_v12 = vrot.slane %v949_v23, 2  ;;  %v1122_v20 = vsel %vm601_vm0, %v1079_v40, -inf  ;;  %v1308_v54 = vsel %vm1268_vm5, %v1251_v21, %v1223_v22 }
  0xae   : > { %v1634_v52 = vmax.f32 %v1405_v42, %v1508_v55  ;;  %v1635_v53 = vmax.f32 %v1406_v49, %v1579_v43  ;;  %v1178_v57 = vmax.f32 %v949_v23, %v1122_v20  ;;  %v1351_v59 = vsel %vm609_vm1, %v1308_v54, -inf  ;;  %v7626_v54 = vld [vmem:[%s7177_s9 + $0x90] sm:$0xff] }
  0xaf   : > { %v1509_v62 = vsel %vm1497_vm6, %v1452_v50, %v1480_v51  ;;  %v1709_v32 = vrot.slane %v950_v27, 2  ;;  %v1051_v58 = vsel %vm1039_vm4, %v994_v60, %v1022_v41  ;;  %v1280_v38 = vsel %vm1268_vm5, %v1223_v22, %v1251_v21 }
  0xb0   : > { %v1863_v63 = vmax.f32 %v1634_v52, %v1737_v13  ;;  %v1864_v3 = vmax.f32 %v1635_v53, %v1808_v48  ;;  %v1407_v7 = vmax.f32 %v1178_v57, %v1351_v59  ;;  %v1179_v10 = vmax.f32 %v950_v27, %v1051_v58  ;;  %v7631_v59 = vld [vmem:[%s7177_s9 + $0x98] sm:$0xff] }
  0xb1   : > { %v1738_v8 = vsel %vm1726_vm7, %v1681_v12, %v1709_v32  ;;  %v1537_v11 = vsel %vm1497_vm6, %v1480_v51, %v1452_v50  ;;  %v1766_v15 = vsel %vm1726_vm7, %v1709_v32, %v1681_v12  ;;  %v995_v18 = vrot.slane %v7531_v9, 6 }
  0xb2   : > { %6306 = vmatprep.mubr.f32.mxu0 %v1863_v63  ;;  %v1581_v16 = vsel %vm620_vm2, %v1537_v11, -inf  ;;  %v1023_v19 = vrot.slane %v7534_v29, 6  ;;  %v1636_v23 = vmax.f32 %v1407_v7, %v1509_v62  ;;  %v1408_v30 = vmax.f32 %v1179_v10, %v1280_v38  ;;  %v7645_v7 = vld [vmem:[%s7177_s9 + $0xa0] sm:$0xff] }
  0xb3   : > { %6307 = vmatmul.mubr.f32.gmra.mxu0 %v1864_v3  ;;  %v1810_v27 = vsel %vm628_vm3, %v1766_v15, -inf  ;;  %v1224_v35 = vrot.slane %v7531_v9, 7  ;;  %v1252_v13 = vrot.slane %v7534_v29, 7  ;;  %v1453_v31 = vrot.slane %v7531_v9, 1 }
  0xb4   : > { %v1080_v55 = vsel %vm1039_vm4, %v1023_v19, %v995_v18  ;;  %v1481_v33 = vrot.slane %v7534_v29, 1  ;;  %v1865_v34 = vmax.f32 %v1636_v23, %v1738_v8  ;;  %v1637_v36 = vmax.f32 %v1408_v30, %v1581_v16  ;;  %v7659_v30 = vld [vmem:[%s7177_s9 + $0xa8] sm:$0xff] }
  0xb5   : > { %v1124_v37 = vsel %vm601_vm0, %v1080_v55, -inf  ;;  %v1682_v25 = vrot.slane %v7531_v9, 2  ;;  %v1309_v26 = vsel %vm1268_vm5, %v1252_v13, %v1224_v35  ;;  %v1710_v48 = vrot.slane %v7534_v29, 2 }
  0xb6   : > { %v1180_v39 = vmax.f32 %v7531_v9, %v1124_v37  ;;  %v1510_v43 = vsel %vm1497_vm6, %v1453_v31, %v1481_v33  ;;  %6309 = vmatprep.mubr.f32.mxu0 %v1865_v34  ;;  %v1866_v60 = vmax.f32 %v1637_v36, %v1810_v27  ;;  %v1353_v41 = vsel %vm609_vm1, %v1309_v26, -inf }
  0xb7   : > { %v1052_v42 = vsel %vm1039_vm4, %v995_v18, %v1023_v19  ;;  %v1281_v9 = vsel %vm1268_vm5, %v1224_v35, %v1252_v13  ;;  %v1739_v22 = vsel %vm1726_vm7, %v1682_v25, %v1710_v48  ;;  %v1538_v40 = vsel %vm1497_vm6, %v1481_v33, %v1453_v31 }
  0xb8   : > { %v1409_v49 = vmax.f32 %v1180_v39, %v1353_v41  ;;  %v1181_v21 = vmax.f32 %v7534_v29, %v1052_v42  ;;  %6310 = vmatmul.mubr.f32.gmra.mxu0 %v1866_v60  ;;  %v1583_v50 = vsel %vm620_vm2, %v1538_v40, -inf  ;;  %v1767_v51 = vsel %vm1726_vm7, %v1710_v48, %v1682_v25 }
  0xb9   : > { %v786_v12 = vmax.f32 %v7512_v56, %v7425_v45  ;;  %v841_v52 = vmax.f32 %v785_v4, %v7484_v46  ;;  %v1812_v20 = vsel %vm628_vm3, %v1767_v51, -inf  ;;  %v787_v57 = vmax.f32 %v7518_v0, %v7484_v46 }
  0xba   : > { %v1638_v53 = vmax.f32 %v1409_v49, %v1510_v43  ;;  %v1410_v29 = vmax.f32 %v1181_v21, %v1281_v9  ;;  %v788_v44 = vmax.f32 %v7521_v2, %v7487_v47  ;;  %v789_v4 = vmax.f32 %v7626_v54, %v7509_v61 }
  0xbb   : > { %v842_v45 = vmax.f32 %v786_v12, %v7487_v47  ;;  %v897_v62 = vmax.f32 %v841_v52, %v7518_v0  ;;  %v843_v3 = vmax.f32 %v787_v57, %v7509_v61  ;;  %v790_v46 = vmax.f32 %v7631_v59, %v7512_v56 }
  0xbc   : > { %v1867_v32 = vmax.f32 %v1638_v53, %v1739_v22  ;;  %v1639_v63 = vmax.f32 %v1410_v29, %v1583_v50  ;;  %v844_v8 = vmax.f32 %v788_v44, %v7512_v56  ;;  %v7649_v47 = vmax.f32 %v789_v4, %v7518_v0 }
  0xbd   : > { %v898_v58 = vmax.f32 %v842_v45, %v7521_v2  ;;  %v953_v38 = vmax.f32 %v897_v62, %v7626_v54  ;;  %v899_v11 = vmax.f32 %v843_v3, %v7626_v54  ;;  %v7653_v61 = vmax.f32 %v790_v46, %v7521_v2 }
  0xbe   : > { %6312 = vmatprep.mubr.f32.mxu0 %v1867_v32  ;;  %v1868_v10 = vmax.f32 %v1639_v63, %v1812_v20  ;;  %v791_v16 = vmax.f32 %v7645_v7, %v7518_v0  ;;  %v900_v27 = vmax.f32 %v844_v8, %v7631_v59  ;;  %v901_v55 = vmax.f32 %v7649_v47, %v7645_v7 }
  0xbf   : > { %v954_v15 = vmax.f32 %v898_v58, %v7631_v59  ;;  %v996_v18 = vrot.slane %v953_v38, 6  ;;  %v1225_v19 = vrot.slane %v953_v38, 7  ;;  %v1454_v23 = vrot.slane %v953_v38, 1 }
  0xc0   : > { %6313 = vmatmul.mubr.f32.gmra.mxu0 %v1868_v10  ;;  %v1683_v56 = vrot.slane %v953_v38, 2  ;;  %v955_v35 = vmax.f32 %v899_v11, %v7645_v7  ;;  %v956_v36 = vmax.f32 %v900_v27, %v7659_v30  ;;  %v7705_v11 = vld [vmem:[%s7177_s9 + $0xb0] sm:$0xff] }
  0xc1   : > { %v1024_v13 = vrot.slane %v954_v15, 6  ;;  %v1253_v31 = vrot.slane %v954_v15, 7  ;;  %v1482_v33 = vrot.slane %v954_v15, 1  ;;  %v1711_v34 = vrot.slane %v954_v15, 2 }
  0xc2   : > { %v997_v37 = vrot.slane %v955_v35, 6  ;;  %v1226_v25 = vrot.slane %v955_v35, 7  ;;  %v1455_v39 = vrot.slane %v955_v35, 1  ;;  %v1025_v52 = vrot.slane %v956_v36, 6 }
  0xc3   : > { %v1081_v26 = vsel %vm1039_vm4, %v1024_v13, %v996_v18  ;;  %v1310_v43 = vsel %vm1268_vm5, %v1253_v31, %v1225_v19  ;;  %v1511_v48 = vsel %vm1497_vm6, %v1454_v23, %v1482_v33  ;;  %v1740_v60 = vsel %vm1726_vm7, %v1683_v56, %v1711_v34 }
  0xc4   : > { %v1126_v41 = vsel %vm601_vm0, %v1081_v26, -inf  ;;  %v1355_v42 = vsel %vm609_vm1, %v1310_v43, -inf  ;;  %v1053_v9 = vsel %vm1039_vm4, %v996_v18, %v1024_v13  ;;  %v1282_v49 = vsel %vm1268_vm5, %v1225_v19, %v1253_v31 }
  0xc5   : > { %v1182_v22 = vmax.f32 %v953_v38, %v1126_v41  ;;  %v1183_v21 = vmax.f32 %v954_v15, %v1053_v9  ;;  %v1539_v40 = vsel %vm1497_vm6, %v1482_v33, %v1454_v23  ;;  %v1768_v50 = vsel %vm1726_vm7, %v1711_v34, %v1683_v56  ;;  %v3324_v15 = vld [vmem:[#allocation8 + $0xf8] sm:$0xff]  ;;  %v3323_v34 = vld [vmem:[#allocation8 + $0xf0] sm:$0xff]  ;;  %v3322_v41 = vld [vmem:[#allocation8 + $0xe8] sm:$0xff] }
  0xc6   : > { %v1585_v51 = vsel %vm620_vm2, %v1539_v40, -inf  ;;  %v1814_v12 = vsel %vm628_vm3, %v1768_v50, -inf  ;;  %v1254_v53 = vrot.slane %v956_v36, 7  ;;  %v1483_v57 = vrot.slane %v956_v36, 1  ;;  %6360 = vmatprep.subr.mxu1 %v3324_v15  ;;  %v7716_v33 = vld [vmem:[%s7177_s9 + $0xb8] sm:$0xff] }
  0xc7   : > { %v1411_v29 = vmax.f32 %v1182_v22, %v1355_v42  ;;  %v1412_v20 = vmax.f32 %v1183_v21, %v1282_v49  ;;  %v1684_v45 = vrot.slane %v955_v35, 2  ;;  %v1082_v62 = vsel %vm1039_vm4, %v1025_v52, %v997_v37  ;;  %6361 = vmatpush3.msra.mxu1 %v3324_v15 }
  0xc8   : > { %v1311_v44 = vsel %vm1268_vm5, %v1254_v53, %v1226_v25  ;;  %v1712_v4 = vrot.slane %v956_v36, 2  ;;  %v1054_v32 = vsel %vm1039_vm4, %v997_v37, %v1025_v52  ;;  %v1128_v46 = vsel %vm601_vm0, %v1082_v62, -inf  ;;  %6362 = vmatprep.subr.mxu1 %v3323_v34  ;;  %v7749_v62 = vld [vmem:[%s7177_s9 + $0xc0] sm:$0xff] }
  0xc9   : > { %v1640_v63 = vmax.f32 %v1411_v29, %v1511_v48  ;;  %v1641_v3 = vmax.f32 %v1412_v20, %v1585_v51  ;;  %v1357_v58 = vsel %vm609_vm1, %v1311_v44, -inf  ;;  %v1184_v38 = vmax.f32 %v955_v35, %v1128_v46  ;;  %6363 = vmatpush3.msra.mxu1 %v3323_v34  ;;  %v7752_v44 = vld [vmem:[%s7177_s9 + $0xc8] sm:$0xff] }
  0xca   : > { %v1512_v8 = vsel %vm1497_vm6, %v1455_v39, %v1483_v57  ;;  %v1741_v47 = vsel %vm1726_vm7, %v1684_v45, %v1712_v4  ;;  %v1185_v10 = vmax.f32 %v956_v36, %v1054_v32  ;;  %v1283_v23 = vsel %vm1268_vm5, %v1226_v25, %v1254_v53  ;;  %6364 = vmatprep.subr.mxu1 %v3322_v41 }
  0xcb   : > { %v1869_v18 = vmax.f32 %v1640_v63, %v1740_v60  ;;  %v1870_v19 = vmax.f32 %v1641_v3, %v1814_v12  ;;  %v1540_v56 = vsel %vm1497_vm6, %v1483_v57, %v1455_v39  ;;  %v1413_v27 = vmax.f32 %v1184_v38, %v1357_v58  ;;  %6365 = vmatpush3.msra.mxu1 %v3322_v41 }
  0xcc   : > { %v1414_v35 = vmax.f32 %v1185_v10, %v1283_v23  ;;  %v1587_v13 = vsel %vm620_vm2, %v1540_v56, -inf  ;;  %v1769_v31 = vsel %vm1726_vm7, %v1712_v4, %v1684_v45  ;;  %v902_v37 = vmax.f32 %v7653_v61, %v7659_v30 }
  0xcd   : > { %6315 = vmatprep.mubr.f32.mxu0 %v1869_v18  ;;  %v1816_v36 = vsel %vm628_vm3, %v1769_v31, -inf  ;;  %v957_v25 = vmax.f32 %v901_v55, %v7705_v11  ;;  %v792_v39 = vmax.f32 %v7659_v30, %v7521_v2  ;;  %v1642_v26 = vmax.f32 %v1413_v27, %v1512_v8 }
  0xce   : > { %6316 = vmatmul.mubr.f32.gmra.mxu0 %v1870_v19  ;;  %v1643_v43 = vmax.f32 %v1414_v35, %v1587_v13  ;;  %v847_v48 = vmax.f32 %v791_v16, %v7626_v54  ;;  %v793_v60 = vmax.f32 %v7705_v11, %v7626_v54  ;;  %v958_v61 = vmax.f32 %v902_v37, %v7716_v33  ;;  %v3321_v54 = vld [vmem:[#allocation8 + $0xe0] sm:$0xff]  ;;  %v3318_v13 = vld [vmem:[#allocation8 + $0xc8] sm:$0xff] }
  0xcf   : > { %v998_v42 = vrot.slane %v957_v25, 6  ;;  %v1227_v55 = vrot.slane %v957_v25, 7  ;;  %v1456_v9 = vrot.slane %v957_v25, 1  ;;  %v1871_v2 = vmax.f32 %v1642_v26, %v1741_v47  ;;  %6366 = vmatprep.subr.mxu1 %v3321_v54  ;;  %v3319_v47 = vld [vmem:[#allocation8 + $0xd0] sm:$0xff] }
  0xd0   : > { %v1872_v49 = vmax.f32 %v1643_v43, %v1816_v36  ;;  %v1685_v22 = vrot.slane %v957_v25, 2  ;;  %v848_v21 = vmax.f32 %v792_v39, %v7631_v59  ;;  %v1026_v40 = vrot.slane %v958_v61, 6  ;;  %6367 = vmatpush3.msra.mxu1 %v3321_v54 }
  0xd1   : > { %v1255_v0 = vrot.slane %v958_v61, 7  ;;  %v1484_v16 = vrot.slane %v958_v61, 1  ;;  %v1713_v50 = vrot.slane %v958_v61, 2  ;;  %6318 = vmatprep.mubr.f32.mxu0 %v1871_v2  ;;  %v903_v51 = vmax.f32 %v847_v48, %v7705_v11  ;;  %v3317_v48 = vld [vmem:[#allocation8 + $0xc0] sm:$0xff] }
  0xd2   : > { %v904_v12 = vmax.f32 %v848_v21, %v7716_v33  ;;  %v794_v52 = vmax.f32 %v7716_v33, %v7631_v59  ;;  %v7738_v53 = vmax.f32 %v793_v60, %v7645_v7  ;;  %6319 = vmatmul.mubr.f32.gmra.mxu0 %v1872_v49  ;;  %v1083_v29 = vsel %vm1039_vm4, %v1026_v40, %v998_v42  ;;  %v3320_v59 = vld [vmem:[#allocation8 + $0xd8] sm:$0xff] }
  0xd3   : > { %v1312_v20 = vsel %vm1268_vm5, %v1255_v0, %v1227_v55  ;;  %v1513_v57 = vsel %vm1497_vm6, %v1456_v9, %v1484_v16  ;;  %v1742_v45 = vsel %vm1726_vm7, %v1685_v22, %v1713_v50  ;;  %v1130_v4 = vsel %vm601_vm0, %v1083_v29, -inf  ;;  %6368 = vmatprep.subr.mxu1 %v3320_v59 }
  0xd4   : > { %v1359_v32 = vsel %vm609_vm1, %v1312_v20, -inf  ;;  %v1055_v63 = vsel %vm1039_vm4, %v998_v42, %v1026_v40  ;;  %v1284_v3 = vsel %vm1268_vm5, %v1227_v55, %v1255_v0  ;;  %v1186_v46 = vmax.f32 %v957_v25, %v1130_v4  ;;  %6369 = vmatpush3.msra.mxu1 %v3320_v59  ;;  %v3315_v59 = vld [vmem:[#allocation8 + $0xb0] sm:$0xff] }
  0xd5   : > { %v1187_v58 = vmax.f32 %v958_v61, %v1055_v63  ;;  %v1541_v38 = vsel %vm1497_vm6, %v1484_v16, %v1456_v9  ;;  %v1770_v8 = vsel %vm1726_vm7, %v1713_v50, %v1685_v22  ;;  %v959_v18 = vmax.f32 %v903_v51, %v7749_v62  ;;  %6370 = vmatprep.subr.mxu1 %v3319_v47  ;;  %v7790_v16 = vld [vmem:[%s7177_s9 + $0xd0] sm:$0xff]  ;;  %v3316_v50 = vld [vmem:[#allocation8 + $0xb8] sm:$0xff] }
  0xd6   : > { %v1589_v10 = vsel %vm620_vm2, %v1541_v38, -inf  ;;  %v1818_v15 = vsel %vm628_vm3, %v1770_v8, -inf  ;;  %v960_v19 = vmax.f32 %v904_v12, %v7752_v44  ;;  %v1415_v23 = vmax.f32 %v1186_v46, %v1359_v32  ;;  %6371 = vmatpush3.msra.mxu1 %v3319_v47  ;;  %v3314_v47 = vld [vmem:[#allocation8 + $0xa8] sm:$0xff] }
  0xd7   : > { %v1416_v56 = vmax.f32 %v1187_v58, %v1284_v3  ;;  %v850_v27 = vmax.f32 %v794_v52, %v7659_v30  ;;  %v905_v35 = vmax.f32 %v7738_v53, %v7749_v62  ;;  %v999_v31 = vrot.slane %v959_v18, 6  ;;  %6372 = vmatprep.subr.mxu1 %v3318_v13  ;;  %v7799_v53 = vld [vmem:[%s7177_s9 + $0xd8] sm:$0xff] }
  0xd8   : > { %v1027_v34 = vrot.slane %v960_v19, 6  ;;  %v1228_v36 = vrot.slane %v959_v18, 7  ;;  %v1256_v37 = vrot.slane %v960_v19, 7  ;;  %v1644_v25 = vmax.f32 %v1415_v23, %v1513_v57  ;;  %6373 = vmatpush3.msra.mxu1 %v3318_v13 }
  0xd9   : > { %v1645_v39 = vmax.f32 %v1416_v56, %v1589_v10  ;;  %v1457_v26 = vrot.slane %v959_v18, 1  ;;  %v1485_v43 = vrot.slane %v960_v19, 1  ;;  %v1686_v61 = vrot.slane %v959_v18, 2  ;;  %6374 = vmatprep.subr.mxu1 %v3317_v48 }
  0xda   : > { %v1084_v60 = vsel %vm1039_vm4, %v1027_v34, %v999_v31  ;;  %v1313_v41 = vsel %vm1268_vm5, %v1256_v37, %v1228_v36  ;;  %v1714_v42 = vrot.slane %v960_v19, 2  ;;  %v1873_v55 = vmax.f32 %v1644_v25, %v1742_v45  ;;  %6375 = vmatpush3.msra.mxu1 %v3317_v48 }
  0xdb   : > { %v1874_v9 = vmax.f32 %v1645_v39, %v1818_v15  ;;  %v1132_v2 = vsel %vm601_vm0, %v1084_v60, -inf  ;;  %v1361_v49 = vsel %vm609_vm1, %v1313_v41, -inf  ;;  %v1514_v21 = vsel %vm1497_vm6, %v1457_v26, %v1485_v43  ;;  %6376 = vmatprep.subr.mxu1 %v3316_v50  ;;  %v3312_v60 = vld [vmem:[#allocation8 + $0x98] sm:$0xff] }
  0xdc   : > { %v1188_v22 = vmax.f32 %v959_v18, %v1132_v2  ;;  %v1743_v40 = vsel %vm1726_vm7, %v1686_v61, %v1714_v42  ;;  %v1056_v0 = vsel %vm1039_vm4, %v999_v31, %v1027_v34  ;;  %6321 = vmatprep.mubr.f32.mxu0 %v1873_v55  ;;  %v1285_v51 = vsel %vm1268_vm5, %v1228_v36, %v1256_v37  ;;  %v3313_v34 = vld [vmem:[#allocation8 + $0xa0] sm:$0xff] }
  0xdd   : > { %v1189_v54 = vmax.f32 %v960_v19, %v1056_v0  ;;  %v1542_v12 = vsel %vm1497_vm6, %v1485_v43, %v1457_v26  ;;  %v1771_v52 = vsel %vm1726_vm7, %v1714_v42, %v1686_v61  ;;  %6322 = vmatmul.mubr.f32.gmra.mxu0 %v1874_v9  ;;  %v906_v45 = vmax.f32 %v850_v27, %v7752_v44 }
  0xde   : > { %v1417_v29 = vmax.f32 %v1188_v22, %v1361_v49  ;;  %v1591_v20 = vsel %vm620_vm2, %v1542_v12, -inf  ;;  %v1820_v57 = vsel %vm628_vm3, %v1771_v52, -inf  ;;  %v961_v32 = vmax.f32 %v905_v35, %v7790_v16  ;;  %6377 = vmatpush3.msra.mxu1 %v3316_v50  ;;  %v7842_v22 = vld [vmem:[%s7177_s9 + $0xe0] sm:$0xff]  ;;  %v7846_v50 = vld [vmem:[%s7177_s9 + $0xe8] sm:$0xff] }
  0xdf   : > { %v1418_v4 = vmax.f32 %v1189_v54, %v1285_v51  ;;  %v795_v63 = vmax.f32 %v7749_v62, %v7645_v7  ;;  %v796_v3 = vmax.f32 %v7752_v44, %v7659_v30  ;;  %v962_v58 = vmax.f32 %v906_v45, %v7799_v53  ;;  %6378 = vmatprep.subr.mxu1 %v3315_v59 }
  0xe0   : > { %v1646_v46 = vmax.f32 %v1417_v29, %v1514_v21  ;;  %v797_v38 = vmax.f32 %v7790_v16, %v7705_v11  ;;  %v798_v8 = vmax.f32 %v7799_v53, %v7716_v33  ;;  %v1000_v15 = vrot.slane %v961_v32, 6  ;;  %6379 = vmatpush3.msra.mxu1 %v3315_v59 }
  0xe1   : > { %v1647_v10 = vmax.f32 %v1418_v4, %v1591_v20  ;;  %v1229_v18 = vrot.slane %v961_v32, 7  ;;  %v1458_v19 = vrot.slane %v961_v32, 1  ;;  %v1028_v23 = vrot.slane %v962_v58, 6  ;;  %6380 = vmatprep.subr.mxu1 %v3314_v47 }
  0xe2   : > { %v1875_v7 = vmax.f32 %v1646_v46, %v1743_v40  ;;  %v1257_v30 = vrot.slane %v962_v58, 7  ;;  %v1486_v56 = vrot.slane %v962_v58, 1  ;;  %v1687_v35 = vrot.slane %v961_v32, 2  ;;  %6381 = vmatpush3.msra.mxu1 %v3314_v47  ;;  %v3311_v40 = vld [vmem:[#allocation8 + $0x90] sm:$0xff] }
  0xe3   : > { %v1876_v27 = vmax.f32 %v1647_v10, %v1820_v57  ;;  %v1715_v13 = vrot.slane %v962_v58, 2  ;;  %v851_v31 = vmax.f32 %v795_v63, %v7705_v11  ;;  %v1085_v36 = vsel %vm1039_vm4, %v1028_v23, %v1000_v15  ;;  %6382 = vmatprep.subr.mxu1 %v3313_v34  ;;  %v3310_v57 = vld [vmem:[#allocation8 + $0x88] sm:$0xff]  ;;  %v7861_v46 = vld [vmem:[%s7177_s9 + $0xf0] sm:$0xff] }
  0xe4   : > { %6324 = vmatprep.mubr.f32.mxu0 %v1875_v7  ;;  %v1314_v37 = vsel %vm1268_vm5, %v1257_v30, %v1229_v18  ;;  %v1515_v25 = vsel %vm1497_vm6, %v1458_v19, %v1486_v56  ;;  %v1057_v39 = vsel %vm1039_vm4, %v1000_v15, %v1028_v23  ;;  %v1134_v11 = vsel %vm601_vm0, %v1085_v36, -inf  ;;  %6383 = vmatpush3.msra.mxu1 %v3313_v34 }
  0xe5   : > { %6325 = vmatmul.mubr.f32.gmra.mxu0 %v1876_v27  ;;  %v1363_v26 = vsel %vm609_vm1, %v1314_v37, -inf  ;;  %v1744_v43 = vsel %vm1726_vm7, %v1687_v35, %v1715_v13  ;;  %v1191_v48 = vmax.f32 %v962_v58, %v1057_v39  ;;  %v1190_v41 = vmax.f32 %v961_v32, %v1134_v11  ;;  %6384 = vmatprep.subr.mxu1 %v3312_v60  ;;  %v7864_v58 = vld [vmem:[%s7177_s9 + $0xf8] sm:$0xff] }
  0xe6   : > { %v1286_v61 = vsel %vm1268_vm5, %v1229_v18, %v1257_v30  ;;  %v1543_v42 = vsel %vm1497_vm6, %v1486_v56, %v1458_v19  ;;  %v1772_v55 = vsel %vm1726_vm7, %v1715_v13, %v1687_v35  ;;  %v852_v21 = vmax.f32 %v796_v3, %v7716_v33  ;;  %6385 = vmatpush3.msra.mxu1 %v3312_v60 }
  0xe7   : > { %v1420_v9 = vmax.f32 %v1191_v48, %v1286_v61  ;;  %v1593_v2 = vsel %vm620_vm2, %v1543_v42, -inf  ;;  %v1822_v49 = vsel %vm628_vm3, %v1772_v55, -inf  ;;  %v1419_v0 = vmax.f32 %v1190_v41, %v1363_v26  ;;  %6386 = vmatprep.subr.mxu1 %v3311_v40 }
  0xe8   : > { %v907_v54 = vmax.f32 %v851_v31, %v7790_v16  ;;  %v853_v51 = vmax.f32 %v797_v38, %v7749_v62  ;;  %v854_v12 = vmax.f32 %v798_v8, %v7752_v44  ;;  %v908_v29 = vmax.f32 %v852_v21, %v7799_v53  ;;  %6387 = vmatpush3.msra.mxu1 %v3311_v40  ;;  %v3309_v38 = vld [vmem:[#allocation8 + $0x80] sm:$0xff] }
  0xe9   : > { %v1649_v52 = vmax.f32 %v1420_v9, %v1593_v2  ;;  %v799_v33 = vmax.f32 %v7842_v22, %v7749_v62  ;;  %v800_v20 = vmax.f32 %v7846_v50, %v7752_v44  ;;  %v1648_v45 = vmax.f32 %v1419_v0, %v1515_v25  ;;  %6388 = vmatprep.subr.mxu1 %v3310_v57 }
  0xea   : > { %v963_v59 = vmax.f32 %v907_v54, %v7842_v22  ;;  %v909_v4 = vmax.f32 %v853_v51, %v7842_v22  ;;  %v910_v32 = vmax.f32 %v854_v12, %v7846_v50  ;;  %v964_v3 = vmax.f32 %v908_v29, %v7846_v50  ;;  %6389 = vmatpush3.msra.mxu1 %v3310_v57 }
  0xeb   : > { %v1878_v63 = vmax.f32 %v1649_v52, %v1822_v49  ;;  %v855_v62 = vmax.f32 %v799_v33, %v7790_v16  ;;  %v7868_v44 = vmax.f32 %v800_v20, %v7799_v53  ;;  %v1877_v8 = vmax.f32 %v1648_v45, %v1744_v43  ;;  %6390 = vmatprep.subr.mxu1 %v3309_v38 }
  0xec   : > { %v1001_v47 = vrot.slane %v963_v59, 6  ;;  %v1230_v10 = vrot.slane %v963_v59, 7  ;;  %v1459_v15 = vrot.slane %v963_v59, 1  ;;  %v1029_v18 = vrot.slane %v964_v3, 6  ;;  %6391 = vmatpush3.msra.mxu1 %v3309_v38 }
  0xed   : > { %v1258_v19 = vrot.slane %v964_v3, 7  ;;  %v1487_v7 = vrot.slane %v964_v3, 1  ;;  %v1688_v23 = vrot.slane %v963_v59, 2  ;;  %6327 = vmatprep.mubr.f32.mxu0 %v1877_v8  ;;  %v1716_v30 = vrot.slane %v964_v3, 2  ;;  %6393 = vmatmul.mubr.f32.vlgmr.msra.gmra.mxu1 %v7224_v28 }
  0xee   : > { %v965_v56 = vmax.f32 %v909_v4, %v7861_v46  ;;  %v966_v27 = vmax.f32 %v910_v32, %v7864_v58  ;;  %v7873_v35 = vmax.f32 %v855_v62, %v7861_v46  ;;  %6328 = vmatmul.mubr.f32.gmra.mxu0 %v1878_v63  ;;  %v1086_v13 = vsel %vm1039_vm4, %v1029_v18, %v1001_v47 }
  0xef   : > { %v1315_v31 = vsel %vm1268_vm5, %v1258_v19, %v1230_v10  ;;  %v1516_v34 = vsel %vm1497_vm6, %v1459_v15, %v1487_v7  ;;  %v1058_v36 = vsel %vm1039_vm4, %v1001_v47, %v1029_v18  ;;  %v1136_v37 = vsel %vm601_vm0, %v1086_v13, -inf  ;;  %6395 = vmatprep.mubr.f32.mxu1 %v7216_v24 }
  0xf0   : > { %v1365_v25 = vsel %vm609_vm1, %v1315_v31, -inf  ;;  %v1745_v39 = vsel %vm1726_vm7, %v1688_v23, %v1716_v30  ;;  %v1193_v11 = vmax.f32 %v964_v3, %v1058_v36  ;;  %v1192_v26 = vmax.f32 %v963_v59, %v1136_v37 }
  0xf1   : > { %v1287_v43 = vsel %vm1268_vm5, %v1230_v10, %v1258_v19  ;;  %v1544_v48 = vsel %vm1497_vm6, %v1487_v7, %v1459_v15  ;;  %v1773_v60 = vsel %vm1726_vm7, %v1716_v30, %v1688_v23  ;;  %v1002_v55 = vrot.slane %v965_v56, 6  ;;  %6396 = vmatmul.mubr.f32.gmra.mxu1 %v7224_v28 }
  0xf2   : > { %v1422_v41 = vmax.f32 %v1193_v11, %v1287_v43  ;;  %v1595_v61 = vsel %vm620_vm2, %v1544_v48, -inf  ;;  %v1824_v42 = vsel %vm628_vm3, %v1773_v60, -inf  ;;  %v1421_v9 = vmax.f32 %v1192_v26, %v1365_v25 }
  0xf3   : > { %v1030_v2 = vrot.slane %v966_v27, 6  ;;  %v1231_v49 = vrot.slane %v965_v56, 7  ;;  %v1259_v21 = vrot.slane %v966_v27, 7  ;;  %v1460_v0 = vrot.slane %v965_v56, 1 }
  0xf4   : > { %v1651_v40 = vmax.f32 %v1422_v41, %v1595_v61  ;;  %v1488_v54 = vrot.slane %v966_v27, 1  ;;  %v1689_v51 = vrot.slane %v965_v56, 2  ;;  %v1650_v12 = vmax.f32 %v1421_v9, %v1516_v34 }
  0xf5   : > { %v1087_v52 = vsel %vm1039_vm4, %v1030_v2, %v1002_v55  ;;  %v1316_v29 = vsel %vm1268_vm5, %v1259_v21, %v1231_v49  ;;  %v1717_v33 = vrot.slane %v966_v27, 2  ;;  %v1059_v3 = vsel %vm1039_vm4, %v1002_v55, %v1030_v2 }
  0xf6   : > { %v1880_v20 = vmax.f32 %v1651_v40, %v1824_v42  ;;  %v1138_v57 = vsel %vm601_vm0, %v1087_v52, -inf  ;;  %v1367_v45 = vsel %vm609_vm1, %v1316_v29, -inf  ;;  %v1517_v59 = vsel %vm1497_vm6, %v1460_v0, %v1488_v54 }
  0xf7   : > { %v1879_v4 = vmax.f32 %v1650_v12, %v1745_v39  ;;  %v1194_v32 = vmax.f32 %v965_v56, %v1138_v57  ;;  %v1746_v63 = vsel %vm1726_vm7, %v1689_v51, %v1717_v33  ;;  %v1195_v62 = vmax.f32 %v966_v27, %v1059_v3 }
  0xf8   : > { %v1288_v38 = vsel %vm1268_vm5, %v1231_v49, %v1259_v21  ;;  %v1545_v8 = vsel %vm1497_vm6, %v1488_v54, %v1460_v0  ;;  %v1774_v47 = vsel %vm1726_vm7, %v1717_v33, %v1689_v51  ;;  %v912_v19 = vmax.f32 %v7868_v44, %v7864_v58 }
  0xf9   : > { %6330 = vmatprep.mubr.f32.mxu0 %v1879_v4  ;;  %v1423_v10 = vmax.f32 %v1194_v32, %v1367_v45  ;;  %v1597_v15 = vsel %vm620_vm2, %v1545_v8, -inf  ;;  %v1826_v18 = vsel %vm628_vm3, %v1774_v47, -inf  ;;  %v1424_v7 = vmax.f32 %v1195_v62, %v1288_v38 }
  0xfa   : > { %6331 = vmatmul.mubr.f32.gmra.mxu0 %v1880_v20  ;;  %v1003_v23 = vrot.slane %v7873_v35, 6  ;;  %v1232_v30 = vrot.slane %v7873_v35, 7  ;;  %v1461_v56 = vrot.slane %v7873_v35, 1  ;;  %v1031_v13 = vrot.slane %v912_v19, 6 }
  0xfb   : > { %v1652_v27 = vmax.f32 %v1423_v10, %v1517_v59  ;;  %v1260_v31 = vrot.slane %v912_v19, 7  ;;  %v1489_v34 = vrot.slane %v912_v19, 1  ;;  %v1653_v36 = vmax.f32 %v1424_v7, %v1597_v15 }
  0xfc   : > { %v1690_v37 = vrot.slane %v7873_v35, 2  ;;  %v1718_v25 = vrot.slane %v912_v19, 2  ;;  %v1088_v44 = vsel %vm1039_vm4, %v1031_v13, %v1003_v23  ;;  %v801_v26 = vmax.f32 %v7861_v46, %v7790_v16 }
  0xfd   : > { %v1881_v39 = vmax.f32 %v1652_v27, %v1746_v63  ;;  %v1317_v11 = vsel %vm1268_vm5, %v1260_v31, %v1232_v30  ;;  %v1882_v43 = vmax.f32 %v1653_v36, %v1826_v18  ;;  %v1140_v48 = vsel %vm601_vm0, %v1088_v44, -inf }
  0xfe   : > { %v1369_v60 = vsel %vm609_vm1, %v1317_v11, -inf  ;;  %v1196_v41 = vmax.f32 %v7873_v35, %v1140_v48  ;;  %v1060_v61 = vsel %vm1039_vm4, %v1003_v23, %v1031_v13  ;;  %v1289_v42 = vsel %vm1268_vm5, %v1232_v30, %v1260_v31 }
  0xff   : > { %6333 = vmatprep.mubr.f32.mxu0 %v1881_v39  ;;  %v1546_v55 = vsel %vm1497_vm6, %v1489_v34, %v1461_v56  ;;  %v1518_v16 = vsel %vm1497_vm6, %v1461_v56, %v1489_v34  ;;  %v1197_v46 = vmax.f32 %v912_v19, %v1060_v61  ;;  %v1775_v9 = vsel %vm1726_vm7, %v1718_v25, %v1690_v37 }
 0x100   : > { %6334 = vmatmul.mubr.f32.gmra.mxu0 %v1882_v43  ;;  %v802_v35 = vmax.f32 %v7864_v58, %v7799_v53  ;;  %v1425_v2 = vmax.f32 %v1196_v41, %v1369_v60  ;;  %v1599_v49 = vsel %vm620_vm2, %v1546_v55, -inf  ;;  %v857_v21 = vmax.f32 %v801_v26, %v7842_v22 }
 0x101   : > { %v1747_v40 = vsel %vm1726_vm7, %v1690_v37, %v1718_v25  ;;  %v1426_v0 = vmax.f32 %v1197_v46, %v1289_v42  ;;  %v1828_v54 = vsel %vm628_vm3, %v1775_v9, -inf }
 0x102   : > { %v858_v51 = vmax.f32 %v802_v35, %v7846_v50  ;;  %v1654_v12 = vmax.f32 %v1425_v2, %v1518_v16  ;;  %v1004_v52 = vrot.slane %v857_v21, 6  ;;  %v1233_v29 = vrot.slane %v857_v21, 7 }
 0x103   : > { %v1462_v33 = vrot.slane %v857_v21, 1  ;;  %v1655_v53 = vmax.f32 %v1426_v0, %v1599_v49  ;;  %v1691_v59 = vrot.slane %v857_v21, 2 }
 0x104   : > { %v1032_v58 = vrot.slane %v858_v51, 6  ;;  %v1261_v20 = vrot.slane %v858_v51, 7  ;;  %v1490_v57 = vrot.slane %v858_v51, 1  ;;  %v1883_v45 = vmax.f32 %v1654_v12, %v1747_v40 }
 0x105   : > { %v1719_v22 = vrot.slane %v858_v51, 2  ;;  %v1884_v4 = vmax.f32 %v1655_v53, %v1828_v54 }
 0x106   : > { %v1089_v32 = vsel %vm1039_vm4, %v1032_v58, %v1004_v52  ;;  %v1318_v63 = vsel %vm1268_vm5, %v1261_v20, %v1233_v29  ;;  %6336 = vmatprep.mubr.f32.mxu0 %v1883_v45  ;;  %v1061_v62 = vsel %vm1039_vm4, %v1004_v52, %v1032_v58  ;;  %v1290_v47 = vsel %vm1268_vm5, %v1233_v29, %v1261_v20 }
 0x107   : > { %v1142_v50 = vsel %vm601_vm0, %v1089_v32, -inf  ;;  %v1371_v3 = vsel %vm609_vm1, %v1318_v63, -inf  ;;  %6337 = vmatmul.mubr.f32.gmra.mxu0 %v1884_v4  ;;  %v1199_v8 = vmax.f32 %v858_v51, %v1061_v62  ;;  %v1547_v10 = vsel %vm1497_vm6, %v1490_v57, %v1462_v33 }
 0x108   : > { %v1198_v38 = vmax.f32 %v857_v21, %v1142_v50  ;;  %v1519_v15 = vsel %vm1497_vm6, %v1462_v33, %v1490_v57  ;;  %v1601_v18 = vsel %vm620_vm2, %v1547_v10, -inf  ;;  %v1776_v19 = vsel %vm1726_vm7, %v1719_v22, %v1691_v59 }
 0x109   : > { %v1428_v23 = vmax.f32 %v1199_v8, %v1290_v47  ;;  %v1748_v30 = vsel %vm1726_vm7, %v1691_v59, %v1719_v22  ;;  %v1830_v56 = vsel %vm628_vm3, %v1776_v19, -inf }
 0x10a   : > { %v1427_v7 = vmax.f32 %v1198_v38, %v1371_v3 }
 0x10b   : > { %v1657_v13 = vmax.f32 %v1428_v23, %v1601_v18 }
 0x10c   : > { %v1656_v27 = vmax.f32 %v1427_v7, %v1519_v15 }
 0x10d   : > { %v1886_v34 = vmax.f32 %v1657_v13, %v1830_v56 }
 0x10e   : > { %v1885_v31 = vmax.f32 %v1656_v27, %v1748_v30 }
 0x110   : > { %6339 = vmatprep.mubr.f32.mxu0 %v1885_v31 }
 0x111   : > { %6340 = vmatmul.mubr.f32.gmra.mxu0 %v1886_v34 }
 0x148   : > { %v6278_v36 = vpop.f32.mrf.mxu0 }
 0x14a   : > { %v1981_v37 = vpop.f32.mrf.mxu0 }
 0x14c   : > { %v6281_v25 = vpop.f32.mrf.mxu0 }
 0x14e   : > { %v1991_v39 = vpop.f32.mrf.mxu0 }
 0x150   : > { %v6284_v44 = vpop.f32.mrf.mxu0 }
 0x152   : > { %v2001_v11 = vpop.f32.mrf.mxu0 }
 0x154   : > { %v6287_v26 = vpop.f32.mrf.mxu0 }
 0x156   : > { %v2011_v43 = vpop.f32.mrf.mxu0 }
 0x158   : > { %v6290_v48 = vpop.f32.mrf.mxu0 }
 0x15a   : > { %v2021_v60 = vpop.f32.mrf.mxu0 }
 0x15c   : > { %v6293_v41 = vpop.f32.mrf.mxu0 }
 0x15e   : > { %v2031_v61 = vpop.f32.mrf.mxu0 }
 0x160   : > { %v7987_v42 = vpop.f32.mrf.mxu0 }
 0x161   : > { %v2566_v16 = vrot.slane %v7987_v42, 6  ;;  %v2758_v35 = vrot.slane %v7987_v42, 7  ;;  %v2950_v54 = vrot.slane %v7987_v42, 1  ;;  %v3142_v51 = vrot.slane %v7987_v42, 2 }
 0x162   : > { %v7989_v55 = vpop.f32.mrf.mxu0 }
 0x163   : > { %v2542_v46 = vrot.slane %v7989_v55, 6  ;;  %v2734_v9 = vrot.slane %v7989_v55, 7  ;;  %v2926_v2 = vrot.slane %v7989_v55, 1  ;;  %v3118_v21 = vrot.slane %v7989_v55, 2 }
 0x164   : > { %v7996_v49 = vpop.f32.mrf.mxu0 }
 0x165   : > { %v2614_v40 = vsel %vm1039_vm4, %v2566_v16, %v2542_v46  ;;  %v2806_v0 = vsel %vm1268_vm5, %v2758_v35, %v2734_v9  ;;  %v2407_v12 = vmax.f32 %v7996_v49, %v7987_v42  ;;  %v8009_v52 = vmax.f32 %v7987_v42, %v7996_v49 }
 0x166   : > { %v8011_v29 = vpop.f32.mrf.mxu0  ;;  %v2640_v33 = vsel %vm601_vm0, %v2614_v40, -inf  ;;  %v2832_v53 = vsel %vm609_vm1, %v2806_v0, -inf  ;;  %v2974_v57 = vsel %vm1497_vm6, %v2926_v2, %v2950_v54  ;;  %v2590_v45 = vsel %vm1039_vm4, %v2542_v46, %v2566_v16 }
 0x167   : > { %v8019_v58 = vmax.f32 %v7989_v55, %v8011_v29  ;;  %v2688_v20 = vmax.f32 %v7989_v55, %v2640_v33  ;;  %v3166_v22 = vsel %vm1726_vm7, %v3118_v21, %v3142_v51  ;;  %v2689_v4 = vmax.f32 %v7987_v42, %v2590_v45 }
 0x168   : > { %v8026_v59 = vpop.f32.mrf.mxu0  ;;  %v2998_v32 = vsel %vm1497_vm6, %v2950_v54, %v2926_v2  ;;  %v3190_v63 = vsel %vm1726_vm7, %v3142_v51, %v3118_v21  ;;  %v2406_v50 = vmax.f32 %v8011_v29, %v7989_v55  ;;  %v2782_v38 = vsel %vm1268_vm5, %v2734_v9, %v2758_v35 }
 0x169   : > { %v2361_v3 = vmax.f32 %v8026_v59, %v7987_v42  ;;  %v2880_v62 = vmax.f32 %v2688_v20, %v2832_v53  ;;  %v2455_v8 = vmax.f32 %v2407_v12, %v8026_v59  ;;  %v8044_v47 = vmax.f32 %v8009_v52, %v8026_v59 }
 0x16a   : > { %v8046_v10 = vpop.f32.mrf.mxu0  ;;  %v2881_v15 = vmax.f32 %v2689_v4, %v2782_v38  ;;  %v2543_v18 = vrot.slane %v8019_v58, 6  ;;  %v3025_v23 = vsel %vm620_vm2, %v2998_v32, -inf  ;;  %v3217_v30 = vsel %vm628_vm3, %v3190_v63, -inf }
 0x16b   : > { %v2360_v19 = vmax.f32 %v8046_v10, %v7989_v55  ;;  %v2409_v7 = vmax.f32 %v2361_v3, %v7996_v49  ;;  %v3072_v27 = vmax.f32 %v2880_v62, %v2974_v57  ;;  %v2567_v31 = vrot.slane %v8009_v52, 6 }
 0x16c   : > { %v8056_v56 = vpop.f32.mrf.mxu0  ;;  %v3073_v13 = vmax.f32 %v2881_v15, %v3025_v23  ;;  %v2735_v34 = vrot.slane %v8019_v58, 7  ;;  %v2454_v36 = vmax.f32 %v2406_v50, %v8046_v10  ;;  %v8063_v37 = vmax.f32 %v8019_v58, %v8046_v10 }
 0x16d   : > { %v2363_v25 = vmax.f32 %v8056_v56, %v7996_v49  ;;  %v2408_v39 = vmax.f32 %v2360_v19, %v8011_v29  ;;  %v2457_v44 = vmax.f32 %v2409_v7, %v8056_v56  ;;  %v3264_v26 = vmax.f32 %v3072_v27, %v3166_v22 }
 0x16e   : > { %v8069_v11 = vpop.f32.mrf.mxu0  ;;  %v2615_v43 = vsel %vm1039_vm4, %v2567_v31, %v2543_v18  ;;  %v2759_v48 = vrot.slane %v8009_v52, 7  ;;  %v8075_v60 = vmax.f32 %v2455_v8, %v8056_v56  ;;  %v3265_v16 = vmax.f32 %v3073_v13, %v3217_v30 }
 0x16f   : > { %v2362_v41 = vmax.f32 %v8069_v11, %v8011_v29  ;;  %v2411_v61 = vmax.f32 %v2363_v25, %v8026_v59  ;;  %v2456_v46 = vmax.f32 %v2408_v39, %v8069_v11  ;;  %6398 = vmatprep.mubr.f32.mxu1 %v3264_v26  ;;  %v2642_v9 = vsel %vm601_vm0, %v2615_v43, -inf }
 0x170   : > { %v2807_v35 = vsel %vm1268_vm5, %v2759_v48, %v2735_v34  ;;  %v2927_v2 = vrot.slane %v8019_v58, 1  ;;  %v8087_v21 = vmax.f32 %v2454_v36, %v8069_v11  ;;  %6399 = vmatmul.mubr.f32.gmra.mxu1 %v3265_v16  ;;  %v2690_v54 = vmax.f32 %v8019_v58, %v2642_v9 }
 0x171   : > { %v2410_v0 = vmax.f32 %v2362_v41, %v8046_v10  ;;  %v2951_v51 = vrot.slane %v8009_v52, 1  ;;  %v2834_v53 = vsel %vm609_vm1, %v2807_v35, -inf  ;;  %v3119_v20 = vrot.slane %v8019_v58, 2 }
 0x172   : > { %v2882_v22 = vmax.f32 %v2690_v54, %v2834_v53  ;;  %v2591_v32 = vsel %vm1039_vm4, %v2543_v18, %v2567_v31  ;;  %v3143_v3 = vrot.slane %v8009_v52, 2  ;;  %v2783_v58 = vsel %vm1268_vm5, %v2735_v34, %v2759_v48 }
 0x173   : > { %v8089_v40 = vpop.f32.mrf.mxu0  ;;  %v2975_v4 = vsel %vm1497_vm6, %v2927_v2, %v2951_v51  ;;  %v2691_v8 = vmax.f32 %v8009_v52, %v2591_v32  ;;  %v2999_v15 = vsel %vm1497_vm6, %v2951_v51, %v2927_v2  ;;  %v2544_v23 = vrot.slane %v8063_v37, 6 }
 0x174   : > { %v2365_v12 = vmax.f32 %v8089_v40, %v8026_v59  ;;  %v2459_v33 = vmax.f32 %v2411_v61, %v8089_v40  ;;  %v8101_v57 = vmax.f32 %v2457_v44, %v8089_v40  ;;  %v3074_v38 = vmax.f32 %v2882_v22, %v2975_v4 }
 0x175   : > { %v8103_v45 = vpop.f32.mrf.mxu0  ;;  %v3167_v18 = vsel %vm1726_vm7, %v3119_v20, %v3143_v3  ;;  %v3191_v7 = vsel %vm1726_vm7, %v3143_v3, %v3119_v20  ;;  %v2883_v52 = vmax.f32 %v2691_v8, %v2783_v58  ;;  %v2568_v31 = vrot.slane %v8044_v47, 6 }
 0x176   : > { %v2364_v63 = vmax.f32 %v8103_v45, %v8046_v10  ;;  %v2458_v50 = vmax.f32 %v2410_v0, %v8103_v45  ;;  %v2413_v62 = vmax.f32 %v2365_v12, %v8056_v56  ;;  %v8126_v30 = vmax.f32 %v2456_v46, %v8103_v45 }
 0x177   : > { %v3266_v13 = vmax.f32 %v3074_v38, %v3167_v18  ;;  %v3027_v36 = vsel %vm620_vm2, %v2999_v15, -inf  ;;  %v3219_v25 = vsel %vm628_vm3, %v3191_v7, -inf  ;;  %v2736_v39 = vrot.slane %v8063_v37, 7 }
 0x178   : > { %v2412_v19 = vmax.f32 %v2364_v63, %v8069_v11  ;;  %v8128_v27 = vpop.f32.mrf.mxu0  ;;  %v3075_v43 = vmax.f32 %v2883_v52, %v3027_v36  ;;  %v2616_v48 = vsel %vm1039_vm4, %v2568_v31, %v2544_v23  ;;  %v2760_v41 = vrot.slane %v8044_v47, 7 }
 0x179   : > { %v2367_v34 = vmax.f32 %v8128_v27, %v8056_v56  ;;  %v2461_v44 = vmax.f32 %v2413_v62, %v8128_v27  ;;  %6401 = vmatprep.mubr.f32.mxu1 %v3266_v13  ;;  %v8145_v61 = vmax.f32 %v2459_v33, %v8128_v27  ;;  %v2928_v9 = vrot.slane %v8063_v37, 1 }
 0x17a   : > { %v8139_v26 = vpop.f32.mrf.mxu0  ;;  %v3267_v35 = vmax.f32 %v3075_v43, %v3219_v25  ;;  %v2644_v0 = vsel %vm601_vm0, %v2616_v48, -inf  ;;  %v2808_v54 = vsel %vm1268_vm5, %v2760_v41, %v2736_v39  ;;  %v2952_v33 = vrot.slane %v8044_v47, 1 }
 0x17b   : > { %10956 = vst [vmem:[#allocation17_spill] sm:$0xff] %v8139_v26  ;;  %v2366_v16 = vmax.f32 %v8139_v26, %v8069_v11  ;;  %v2460_v46 = vmax.f32 %v2412_v19, %v8139_v26  ;;  %v8152_v2 = vmax.f32 %v2367_v34, %v8089_v40  ;;  %v8159_v51 = vmax.f32 %v2458_v50, %v8139_v26 }
 0x17c   : > { %v2692_v12 = vmax.f32 %v8063_v37, %v2644_v0  ;;  %v3120_v53 = vrot.slane %v8063_v37, 2  ;;  %6402 = vmatmul.mubr.f32.gmra.mxu1 %v3267_v35  ;;  %v2836_v20 = vsel %vm609_vm1, %v2808_v54, -inf  ;;  %v3144_v22 = vrot.slane %v8044_v47, 2 }
 0x17d   : > { %v8168_v4 = vmax.f32 %v2366_v16, %v8103_v45  ;;  %v2592_v32 = vsel %vm1039_vm4, %v2544_v23, %v2568_v31  ;;  %v2976_v3 = vsel %vm1497_vm6, %v2928_v9, %v2952_v33  ;;  %v3000_v58 = vsel %vm1497_vm6, %v2952_v33, %v2928_v9 }
 0x17e   : > { %v2884_v50 = vmax.f32 %v2692_v12, %v2836_v20  ;;  %v2693_v37 = vmax.f32 %v8044_v47, %v2592_v32  ;;  %v3168_v8 = vsel %vm1726_vm7, %v3120_v53, %v3144_v22  ;;  %v2784_v15 = vsel %vm1268_vm5, %v2736_v39, %v2760_v41 }
 0x17f   : > { %v3192_v47 = vsel %vm1726_vm7, %v3144_v22, %v3120_v53  ;;  %v2545_v23 = vrot.slane %v8087_v21, 6  ;;  %v3029_v34 = vsel %vm620_vm2, %v3000_v58, -inf  ;;  %v2569_v43 = vrot.slane %v8075_v60, 6 }
 0x180   : > { %v8172_v63 = vpop.f32.mrf.mxu0  ;;  %v3076_v18 = vmax.f32 %v2884_v50, %v2976_v3  ;;  %v2885_v7 = vmax.f32 %v2693_v37, %v2784_v15  ;;  %v2737_v48 = vrot.slane %v8087_v21, 7  ;;  %v2761_v41 = vrot.slane %v8075_v60, 7 }
 0x181   : > { %10957 = vst [vmem:[#allocation18_spill] sm:$0xff] %v8172_v63  ;;  %v2369_v62 = vmax.f32 %v8172_v63, %v8089_v40  ;;  %v2463_v38 = vmax.f32 %v8152_v2, %v8172_v63  ;;  %v8193_v13 = vmax.f32 %v2461_v44, %v8172_v63  ;;  %v3221_v44 = vsel %vm628_vm3, %v3192_v47, -inf }
 0x182   : > { %v8187_v19 = vpop.f32.mrf.mxu0  ;;  %v3268_v36 = vmax.f32 %v3076_v18, %v3168_v8  ;;  %v3077_v39 = vmax.f32 %v2885_v7, %v3029_v34  ;;  %v2929_v16 = vrot.slane %v8087_v21, 1  ;;  %v2617_v35 = vsel %vm1039_vm4, %v2569_v43, %v2545_v23 }
 0x183   : > { %10958 = vst [vmem:[#allocation19_spill] sm:$0xff] %v8187_v19  ;;  %v2368_v52 = vmax.f32 %v8187_v19, %v8103_v45  ;;  %v2462_v31 = vmax.f32 %v8168_v4, %v8187_v19  ;;  %v8202_v25 = vmax.f32 %v2460_v46, %v8187_v19  ;;  %v2953_v46 = vrot.slane %v8075_v60, 1  ;;  %v4526_v4 = vld [vmem:[#allocation8 + $0x178] sm:$0xff] }
 0x184   : > { %6404 = vmatprep.mubr.f32.mxu1 %v3268_v36  ;;  %v3269_v9 = vmax.f32 %v3077_v39, %v3221_v44  ;;  %v3121_v0 = vrot.slane %v8087_v21, 2  ;;  %v8215_v54 = vmax.f32 %v2369_v62, %v8128_v27  ;;  %v2646_v12 = vsel %vm601_vm0, %v2617_v35, -inf  ;;  %6464 = vmatprep.subr.mxu1 %v4526_v4 }
 0x185   : > { %v2809_v33 = vsel %vm1268_vm5, %v2761_v41, %v2737_v48  ;;  %v3145_v53 = vrot.slane %v8075_v60, 2  ;;  %v2694_v20 = vmax.f32 %v8087_v21, %v2646_v12  ;;  %v2977_v22 = vsel %vm1497_vm6, %v2929_v16, %v2953_v46  ;;  %6465 = vmatpush3.msra.mxu1 %v4526_v4 }
 0x186   : > { %6405 = vmatmul.mubr.f32.gmra.mxu1 %v3269_v9  ;;  %v8226_v32 = vmax.f32 %v2368_v52, %v8139_v26  ;;  %v2593_v50 = vsel %vm1039_vm4, %v2545_v23, %v2569_v43  ;;  %v2838_v3 = vsel %vm609_vm1, %v2809_v33, -inf  ;;  %v3001_v21 = vsel %vm1497_vm6, %v2953_v46, %v2929_v16 }
 0x187   : > { %v3169_v37 = vsel %vm1726_vm7, %v3121_v0, %v3145_v53  ;;  %v2695_v58 = vmax.f32 %v8075_v60, %v2593_v50  ;;  %v2886_v62 = vmax.f32 %v2694_v20, %v2838_v3  ;;  %v2785_v8 = vsel %vm1268_vm5, %v2737_v48, %v2761_v41 }
 0x188   : > { %v3193_v15 = vsel %vm1726_vm7, %v3145_v53, %v3121_v0  ;;  %v2546_v18 = vrot.slane %v8126_v30, 6  ;;  %v2570_v47 = vrot.slane %v8101_v57, 6  ;;  %v2738_v23 = vrot.slane %v8126_v30, 7 }
 0x189   : > { %v2887_v7 = vmax.f32 %v2695_v58, %v2785_v8  ;;  %v2762_v52 = vrot.slane %v8101_v57, 7  ;;  %v3078_v60 = vmax.f32 %v2886_v62, %v2977_v22  ;;  %v3031_v34 = vsel %vm620_vm2, %v3001_v21, -inf }
 0x18a   : > { %v2930_v36 = vrot.slane %v8126_v30, 1  ;;  %v2954_v39 = vrot.slane %v8101_v57, 1  ;;  %v2618_v44 = vsel %vm1039_vm4, %v2570_v47, %v2546_v18  ;;  %v3122_v41 = vrot.slane %v8126_v30, 2 }
 0x18b   : > { %v3079_v43 = vmax.f32 %v2887_v7, %v3031_v34  ;;  %v2810_v48 = vsel %vm1268_vm5, %v2762_v52, %v2738_v23  ;;  %v3270_v9 = vmax.f32 %v3078_v60, %v3169_v37  ;;  %v3223_v35 = vsel %vm628_vm3, %v3193_v15, -inf }
 0x18c   : > { %v2648_v46 = vsel %vm601_vm0, %v2618_v44, -inf  ;;  %v3146_v0 = vrot.slane %v8101_v57, 2  ;;  %v2840_v53 = vsel %vm609_vm1, %v2810_v48, -inf  ;;  %v2978_v20 = vsel %vm1497_vm6, %v2930_v36, %v2954_v39 }
 0x18d   : > { %v3271_v33 = vmax.f32 %v3079_v43, %v3223_v35  ;;  %6407 = vmatprep.mubr.f32.mxu1 %v3270_v9  ;;  %v2696_v37 = vmax.f32 %v8126_v30, %v2648_v46  ;;  %v2594_v58 = vsel %vm1039_vm4, %v2546_v18, %v2570_v47  ;;  %v3002_v30 = vsel %vm1497_vm6, %v2954_v39, %v2930_v36 }
 0x18e   : > { %v8254_v16 = vpop.f32.mrf.mxu0  ;;  %v3170_v2 = vsel %vm1726_vm7, %v3122_v41, %v3146_v0  ;;  %v2697_v8 = vmax.f32 %v8101_v57, %v2594_v58  ;;  %v3194_v15 = vsel %vm1726_vm7, %v3146_v0, %v3122_v41  ;;  %v2547_v57 = vrot.slane %v8159_v51, 6  ;;  %v4524_v0 = vld [vmem:[#allocation8 + $0x168] sm:$0xff] }
 0x18f   : > { %10959 = vst [vmem:[#allocation20_spill] sm:$0xff] %v8254_v16  ;;  %v2371_v12 = vmax.f32 %v8254_v16, %v8128_v27  ;;  %v2465_v22 = vmax.f32 %v8215_v54, %v8254_v16  ;;  %v8273_v50 = vmax.f32 %v2463_v38, %v8254_v16  ;;  %6408 = vmatmul.mubr.f32.gmra.mxu1 %v3271_v33  ;;  %v3225_v34 = vsel %vm628_vm3, %v3194_v15, -inf }
 0x190   : > { %v8275_v3 = vpop.f32.mrf.mxu0  ;;  %v2786_v38 = vsel %vm1268_vm5, %v2738_v23, %v2762_v52  ;;  %v2888_v62 = vmax.f32 %v2696_v37, %v2840_v53  ;;  %v2571_v43 = vrot.slane %v8145_v61, 6  ;;  %v2739_v44 = vrot.slane %v8159_v51, 7 }
 0x191   : > { %10960 = vst [vmem:[#allocation21_spill] sm:$0xff] %v8275_v3  ;;  %v2370_v21 = vmax.f32 %v8275_v3, %v8139_v26  ;;  %v8283_v54 = vmax.f32 %v2371_v12, %v8172_v63  ;;  %v2464_v18 = vmax.f32 %v8226_v32, %v8275_v3  ;;  %v8300_v7 = vmax.f32 %v2462_v31, %v8275_v3  ;;  %v4525_v31 = vld [vmem:[#allocation8 + $0x170] sm:$0xff] }
 0x192   : > { %v8302_v47 = vpop.f32.mrf.mxu0  ;;  %v3080_v60 = vmax.f32 %v2888_v62, %v2978_v20  ;;  %v3033_v32 = vsel %vm620_vm2, %v3002_v30, -inf  ;;  %v2889_v39 = vmax.f32 %v2697_v8, %v2786_v38  ;;  %v2763_v48 = vrot.slane %v8145_v61, 7  ;;  %6466 = vmatprep.subr.mxu1 %v4525_v31  ;;  %v4523_v30 = vld [vmem:[#allocation8 + $0x160] sm:$0xff] }
 0x193   : > { %10961 = vst [vmem:[#allocation22_spill] sm:$0xff] %v8302_v47  ;;  %v8305_v23 = vmax.f32 %v2370_v21, %v8187_v19  ;;  %v2373_v52 = vmax.f32 %v8302_v47, %v8172_v63  ;;  %v2467_v41 = vmax.f32 %v8283_v54, %v8302_v47  ;;  %v8322_v9 = vmax.f32 %v2465_v22, %v8302_v47 }
 0x194   : > { %v8314_v36 = vpop.f32.mrf.mxu0  ;;  %v3272_v35 = vmax.f32 %v3080_v60, %v3170_v2  ;;  %v3081_v33 = vmax.f32 %v2889_v39, %v3033_v32  ;;  %v2619_v53 = vsel %vm1039_vm4, %v2571_v43, %v2547_v57  ;;  %v2811_v20 = vsel %vm1268_vm5, %v2763_v48, %v2739_v44  ;;  %6467 = vmatpush3.msra.mxu1 %v4525_v31  ;;  %v4522_v31 = vld [vmem:[#allocation8 + $0x158] sm:$0xff] }
 0x195   : > { %10962 = vst [vmem:[#allocation23_spill] sm:$0xff] %v8314_v36  ;;  %v2372_v46 = vmax.f32 %v8314_v36, %v8187_v19  ;;  %v2466_v12 = vmax.f32 %v8305_v23, %v8314_v36  ;;  %v8333_v22 = vmax.f32 %v2464_v18, %v8314_v36  ;;  %v2650_v37 = vsel %vm601_vm0, %v2619_v53, -inf  ;;  %6468 = vmatprep.subr.mxu1 %v4524_v0  ;;  %v4521_v53 = vld [vmem:[#allocation8 + $0x150] sm:$0xff]  ;;  %v4519_v23 = vld [vmem:[#allocation8 + $0x140] sm:$0xff] }
 0x196   : > { %6410 = vmatprep.mubr.f32.mxu1 %v3272_v35  ;;  %v2931_v58 = vrot.slane %v8159_v51, 1  ;;  %v2955_v21 = vrot.slane %v8145_v61, 1  ;;  %v3273_v2 = vmax.f32 %v3081_v33, %v3225_v34  ;;  %v8340_v38 = vmax.f32 %v2373_v52, %v8254_v16  ;;  %6469 = vmatpush3.msra.mxu1 %v4524_v0 }
 0x197   : > { %v2698_v62 = vmax.f32 %v8159_v51, %v2650_v37  ;;  %v3123_v8 = vrot.slane %v8159_v51, 2  ;;  %v2842_v15 = vsel %vm609_vm1, %v2811_v20, -inf  ;;  %v3147_v60 = vrot.slane %v8145_v61, 2  ;;  %6470 = vmatprep.subr.mxu1 %v4523_v30 }
 0x198   : > { %v2979_v18 = vsel %vm1497_vm6, %v2931_v58, %v2955_v21  ;;  %v2595_v32 = vsel %vm1039_vm4, %v2547_v57, %v2571_v43  ;;  %6411 = vmatmul.mubr.f32.gmra.mxu1 %v3273_v2  ;;  %v8352_v34 = vmax.f32 %v2372_v46, %v8275_v3  ;;  %v3003_v4 = vsel %vm1497_vm6, %v2955_v21, %v2931_v58 }
 0x199   : > { %v2890_v52 = vmax.f32 %v2698_v62, %v2842_v15  ;;  %v2699_v51 = vmax.f32 %v8145_v61, %v2595_v32  ;;  %v2787_v39 = vsel %vm1268_vm5, %v2739_v44, %v2763_v48  ;;  %v3195_v35 = vsel %vm1726_vm7, %v3147_v60, %v3123_v8  ;;  %6471 = vmatpush3.msra.mxu1 %v4523_v30 }
 0x19a   : > { %v2548_v57 = vrot.slane %v8202_v25, 6  ;;  %v2572_v43 = vrot.slane %v8193_v13, 6  ;;  %v3171_v46 = vsel %vm1726_vm7, %v3123_v8, %v3147_v60  ;;  %v2740_v33 = vrot.slane %v8202_v25, 7  ;;  %6472 = vmatprep.subr.mxu1 %v4522_v31 }
 0x19b   : > { %v3082_v0 = vmax.f32 %v2890_v52, %v2979_v18  ;;  %v2891_v61 = vmax.f32 %v2699_v51, %v2787_v39  ;;  %v3035_v44 = vsel %vm620_vm2, %v3003_v4, -inf  ;;  %v2764_v37 = vrot.slane %v8193_v13, 7  ;;  %6473 = vmatpush3.msra.mxu1 %v4522_v31  ;;  %v4520_v52 = vld [vmem:[#allocation8 + $0x148] sm:$0xff] }
 0x19c   : > { %v2620_v48 = vsel %vm1039_vm4, %v2572_v43, %v2548_v57  ;;  %v2932_v58 = vrot.slane %v8202_v25, 1  ;;  %v3227_v62 = vsel %vm628_vm3, %v3195_v35, -inf  ;;  %v2956_v8 = vrot.slane %v8193_v13, 1  ;;  %6474 = vmatprep.subr.mxu1 %v4521_v53 }
 0x19d   : > { %v8366_v20 = vpop.f32.mrf.mxu0  ;;  %v3274_v2 = vmax.f32 %v3082_v0, %v3171_v46  ;;  %v3083_v18 = vmax.f32 %v2891_v61, %v3035_v44  ;;  %v2652_v60 = vsel %vm601_vm0, %v2620_v48, -inf  ;;  %v2812_v32 = vsel %vm1268_vm5, %v2764_v37, %v2740_v33  ;;  %6475 = vmatpush3.msra.mxu1 %v4521_v53 }
 0x19e   : > { %10963 = vst [vmem:[#allocation24_spill] sm:$0xff] %v8366_v20  ;;  %v2375_v21 = vmax.f32 %v8366_v20, %v8254_v16  ;;  %v2469_v30 = vmax.f32 %v8340_v38, %v8366_v20  ;;  %v8391_v51 = vmax.f32 %v2467_v41, %v8366_v20  ;;  %v2980_v31 = vsel %vm1497_vm6, %v2932_v58, %v2956_v8 }
 0x19f   : > { %v8381_v15 = vpop.f32.mrf.mxu0  ;;  %6413 = vmatprep.mubr.f32.mxu1 %v3274_v2  ;;  %v3275_v35 = vmax.f32 %v3083_v18, %v3227_v62  ;;  %v2700_v54 = vmax.f32 %v8202_v25, %v2652_v60  ;;  %v3124_v41 = vrot.slane %v8202_v25, 2  ;;  %v3148_v46 = vrot.slane %v8193_v13, 2  ;;  %6476 = vmatprep.subr.mxu1 %v4520_v52 }
 0x1a0   : > { %10964 = vst [vmem:[#allocation25_spill] sm:$0xff] %v8381_v15  ;;  %v2374_v38 = vmax.f32 %v8381_v15, %v8275_v3  ;;  %v2468_v4 = vmax.f32 %v8352_v34, %v8381_v15  ;;  %v8403_v39 = vmax.f32 %v2466_v12, %v8381_v15  ;;  %v8408_v0 = vmax.f32 %v2375_v21, %v8302_v47 }
 0x1a1   : > { %v2844_v34 = vsel %vm609_vm1, %v2812_v32, -inf  ;;  %v2596_v61 = vsel %vm1039_vm4, %v2548_v57, %v2572_v43  ;;  %6414 = vmatmul.mubr.f32.gmra.mxu1 %v3275_v35  ;;  %v3004_v25 = vsel %vm1497_vm6, %v2956_v8, %v2932_v58  ;;  %v2549_v53 = vrot.slane %v8300_v7, 6 }
 0x1a2   : > { %v2892_v12 = vmax.f32 %v2700_v54, %v2844_v34  ;;  %v2701_v44 = vmax.f32 %v8193_v13, %v2596_v61  ;;  %v8422_v21 = vmax.f32 %v2374_v38, %v8314_v36  ;;  %v2788_v2 = vsel %vm1268_vm5, %v2740_v33, %v2764_v37  ;;  %6477 = vmatpush3.msra.mxu1 %v4520_v52  ;;  %v4518_v13 = vld [vmem:[#allocation8 + $0x138] sm:$0xff]  ;;  %v4517_v38 = vld [vmem:[#allocation8 + $0x130] sm:$0xff] }
 0x1a3   : > { %v3196_v57 = vsel %vm1726_vm7, %v3148_v46, %v3124_v41  ;;  %v2573_v43 = vrot.slane %v8273_v50, 6  ;;  %v3172_v8 = vsel %vm1726_vm7, %v3124_v41, %v3148_v46  ;;  %v3037_v18 = vsel %vm620_vm2, %v3004_v25, -inf  ;;  %6478 = vmatprep.subr.mxu1 %v4519_v23 }
 0x1a4   : > { %v3084_v62 = vmax.f32 %v2892_v12, %v2980_v31  ;;  %v2893_v60 = vmax.f32 %v2701_v44, %v2788_v2  ;;  %v2741_v52 = vrot.slane %v8300_v7, 7  ;;  %6479 = vmatpush3.msra.mxu1 %v4519_v23  ;;  %v3229_v41 = vsel %vm628_vm3, %v3196_v57, -inf }
 0x1a5   : > { %v8419_v48 = vpop.f32.mrf.mxu0  ;;  %v2621_v32 = vsel %vm1039_vm4, %v2573_v43, %v2549_v53  ;;  %6480 = vmatprep.subr.mxu1 %v4518_v13  ;;  %v2765_v23 = vrot.slane %v8273_v50, 7  ;;  %v2933_v25 = vrot.slane %v8300_v7, 1  ;;  %v3125_v2 = vrot.slane %v8300_v7, 2 }
 0x1a6   : > { %10965 = vst [vmem:[#allocation26_spill] sm:$0xff] %v8419_v48  ;;  %v2377_v58 = vmax.f32 %v8419_v48, %v8302_v47  ;;  %v2471_v33 = vmax.f32 %v8408_v0, %v8419_v48  ;;  %v8443_v31 = vmax.f32 %v2469_v30, %v8419_v48  ;;  %v3276_v35 = vmax.f32 %v3084_v62, %v3172_v8  ;;  %v4516_v30 = vld [vmem:[#allocation8 + $0x128] sm:$0xff]  ;;  %v5511_v47 = vld [vmem:[#allocation8 + $0x1b0] sm:$0xff] }
 0x1a7   : > { %v8437_v37 = vpop.f32.mrf.mxu0  ;;  %v3085_v46 = vmax.f32 %v2893_v60, %v3037_v18  ;;  %v2654_v61 = vsel %vm601_vm0, %v2621_v32, -inf  ;;  %6481 = vmatpush3.msra.mxu1 %v4518_v13  ;;  %v2813_v62 = vsel %vm1268_vm5, %v2765_v23, %v2741_v52  ;;  %v2957_v13 = vrot.slane %v8273_v50, 1 }
 0x1a8   : > { %10966 = vst [vmem:[#allocation27_spill] sm:$0xff] %v8437_v37  ;;  %v2376_v54 = vmax.f32 %v8437_v37, %v8314_v36  ;;  %v2470_v34 = vmax.f32 %v8422_v21, %v8437_v37  ;;  %6416 = vmatprep.mubr.f32.mxu1 %v3276_v35  ;;  %v8455_v12 = vmax.f32 %v2468_v4, %v8437_v37  ;;  %v2846_v4 = vsel %vm609_vm1, %v2813_v62, -inf }
 0x1a9   : > { %v2702_v44 = vmax.f32 %v8300_v7, %v2654_v61  ;;  %6482 = vmatprep.subr.mxu1 %v4517_v38  ;;  %v3277_v21 = vmax.f32 %v3085_v46, %v3229_v41  ;;  %v8461_v57 = vmax.f32 %v2377_v58, %v8366_v20  ;;  %v3149_v8 = vrot.slane %v8273_v50, 2  ;;  %v4515_v58 = vld [vmem:[#allocation8 + $0x120] sm:$0xff] }
 0x1aa   : > { %6483 = vmatpush3.msra.mxu1 %v4517_v38  ;;  %v8470_v18 = vmax.f32 %v2376_v54, %v8381_v15  ;;  %v2597_v7 = vsel %vm1039_vm4, %v2549_v53, %v2573_v43  ;;  %v2981_v32 = vsel %vm1497_vm6, %v2933_v25, %v2957_v13  ;;  %v3005_v35 = vsel %vm1497_vm6, %v2957_v13, %v2933_v25 }
 0x1ab   : > { %6484 = vmatprep.subr.mxu1 %v4516_v30  ;;  %6417 = vmatmul.mubr.f32.gmra.mxu1 %v3277_v21  ;;  %v2894_v60 = vmax.f32 %v2702_v44, %v2846_v4  ;;  %v2703_v38 = vmax.f32 %v8273_v50, %v2597_v7  ;;  %v2789_v41 = vsel %vm1268_vm5, %v2741_v52, %v2765_v23  ;;  %v2550_v53 = vrot.slane %v8333_v22, 6 }
 0x1ac   : > { %v3197_v54 = vsel %vm1726_vm7, %v3149_v8, %v3125_v2  ;;  %v2574_v43 = vrot.slane %v8322_v9, 6  ;;  %6485 = vmatpush3.msra.mxu1 %v4516_v30  ;;  %v3173_v50 = vsel %vm1726_vm7, %v3125_v2, %v3149_v8  ;;  %v2742_v25 = vrot.slane %v8333_v22, 7 }
 0x1ad   : > { %v3086_v61 = vmax.f32 %v2894_v60, %v2981_v32  ;;  %v2895_v44 = vmax.f32 %v2703_v38, %v2789_v41  ;;  %6486 = vmatprep.subr.mxu1 %v4515_v58  ;;  %v3039_v23 = vsel %vm620_vm2, %v3005_v35, -inf  ;;  %v3231_v21 = vsel %vm628_vm3, %v3197_v54, -inf  ;;  %v6394_v7 = vpop.f32.mrf.mxu1 }
 0x1ae   : > { %v8485_v46 = vpop.f32.mrf.mxu0  ;;  %v2622_v30 = vsel %vm1039_vm4, %v2574_v43, %v2550_v53  ;;  %6487 = vmatpush3.msra.mxu1 %v4515_v58  ;;  %v2766_v8 = vrot.slane %v8322_v9, 7 }
 0x1af   : > { %10967 = vst [vmem:[#allocation28_spill] sm:$0xff] %v8485_v46  ;;  %v2379_v52 = vmax.f32 %v8485_v46, %v8366_v20  ;;  %v3278_v62 = vmax.f32 %v3086_v61, %v3173_v50  ;;  %v3087_v2 = vmax.f32 %v2895_v44, %v3039_v23  ;;  %v2656_v4 = vsel %vm601_vm0, %v2622_v30, -inf  ;;  %v3391_v61 = vpop.f32.mrf.mxu1  ;;  %v5519_v20 = vld [vmem:[#allocation8 + $0x1f0] sm:$0xff] }
 0x1b0   : > { %v8498_v13 = vpop.f32.mrf.mxu0  ;;  %v2473_v60 = vmax.f32 %v8461_v57, %v8485_v46  ;;  %v8509_v32 = vmax.f32 %v2471_v33, %v8485_v46  ;;  %v2704_v41 = vmax.f32 %v8333_v22, %v2656_v4  ;;  %v2814_v54 = vsel %vm1268_vm5, %v2766_v8, %v2742_v25 }
 0x1b1   : > { %10968 = vst [vmem:[#allocation29_spill] sm:$0xff] %v8498_v13  ;;  %v2378_v58 = vmax.f32 %v8498_v13, %v8381_v15  ;;  %v2472_v38 = vmax.f32 %v8470_v18, %v8498_v13  ;;  %6419 = vmatprep.mubr.f32.mxu1 %v3278_v62  ;;  %v3279_v35 = vmax.f32 %v3087_v2, %v3231_v21  ;;  %v2934_v57 = vrot.slane %v8333_v22, 1  ;;  %v6397_v62 = vpop.f32.mrf.mxu1 }
 0x1b2   : > { %v8520_v0 = vmax.f32 %v2470_v34, %v8498_v13  ;;  %v2848_v33 = vsel %vm609_vm1, %v2814_v54, -inf  ;;  %v2958_v50 = vrot.slane %v8322_v9, 1  ;;  %v3126_v18 = vrot.slane %v8333_v22, 2  ;;  %v4514_v34 = vld [vmem:[#allocation8 + $0x118] sm:$0xff] }
 0x1b3   : > { %6420 = vmatmul.mubr.f32.gmra.mxu1 %v3279_v35  ;;  %v8527_v44 = vmax.f32 %v2379_v52, %v8419_v48  ;;  %v2896_v23 = vmax.f32 %v2704_v41, %v2848_v33  ;;  %v3150_v21 = vrot.slane %v8322_v9, 2  ;;  %v2598_v30 = vsel %vm1039_vm4, %v2550_v53, %v2574_v43  ;;  %6488 = vmatprep.subr.mxu1 %v4514_v34  ;;  %v3401_v41 = vpop.f32.mrf.mxu1 }
 0x1b4   : > { %v2982_v2 = vsel %vm1497_vm6, %v2934_v57, %v2958_v50  ;;  %v8535_v4 = vmax.f32 %v2378_v58, %v8437_v37  ;;  %v2705_v22 = vmax.f32 %v8322_v9, %v2598_v30  ;;  %v3006_v52 = vsel %vm1497_vm6, %v2958_v50, %v2934_v57  ;;  %6489 = vmatpush3.msra.mxu1 %v4514_v34 }
 0x1b5   : > { %v3088_v7 = vmax.f32 %v2896_v23, %v2982_v2  ;;  %v2790_v35 = vsel %vm1268_vm5, %v2742_v25, %v2766_v8  ;;  %v3198_v53 = vsel %vm1726_vm7, %v3150_v21, %v3126_v18  ;;  %v2551_v43 = vrot.slane %v8403_v39, 6 }
 0x1b6   : > { %v3174_v58 = vsel %vm1726_vm7, %v3126_v18, %v3150_v21  ;;  %v2897_v54 = vmax.f32 %v2705_v22, %v2790_v35  ;;  %v2575_v9 = vrot.slane %v8391_v51, 6  ;;  %v2743_v57 = vrot.slane %v8403_v39, 7 }
 0x1b7   : > { %v3280_v61 = vmax.f32 %v3088_v7, %v3174_v58  ;;  %v3041_v33 = vsel %vm620_vm2, %v3006_v52, -inf  ;;  %v3233_v25 = vsel %vm628_vm3, %v3198_v53, -inf  ;;  %v2935_v8 = vrot.slane %v8403_v39, 1 }
 0x1b8   : > { %v3089_v23 = vmax.f32 %v2897_v54, %v3041_v33  ;;  %v2623_v18 = vsel %vm1039_vm4, %v2575_v9, %v2551_v43  ;;  %v2767_v21 = vrot.slane %v8391_v51, 7  ;;  %v2959_v30 = vrot.slane %v8391_v51, 1 }
 0x1b9   : > { %6422 = vmatprep.mubr.f32.mxu1 %v3280_v61  ;;  %v2658_v34 = vsel %vm601_vm0, %v2623_v18, -inf  ;;  %v3127_v2 = vrot.slane %v8403_v39, 2  ;;  %v3151_v22 = vrot.slane %v8391_v51, 2 }
 0x1ba   : > { %v8554_v50 = vpop.f32.mrf.mxu0  ;;  %v3281_v35 = vmax.f32 %v3089_v23, %v3233_v25  ;;  %v2706_v53 = vmax.f32 %v8403_v39, %v2658_v34  ;;  %v2815_v41 = vsel %vm1268_vm5, %v2767_v21, %v2743_v57  ;;  %v3007_v34 = vsel %vm1497_vm6, %v2959_v30, %v2935_v8 }
 0x1bb   : > { %10969 = vst [vmem:[#allocation30_spill] sm:$0xff] %v8554_v50  ;;  %v2381_v62 = vmax.f32 %v8554_v50, %v8419_v48  ;;  %v2475_v52 = vmax.f32 %v8527_v44, %v8554_v50  ;;  %v8574_v58 = vmax.f32 %v2473_v60, %v8554_v50  ;;  %v2983_v44 = vsel %vm1497_vm6, %v2935_v8, %v2959_v30  ;;  %v4513_v30 = vld [vmem:[#allocation8 + $0x110] sm:$0xff] }
 0x1bc   : > { %v8568_v7 = vpop.f32.mrf.mxu0  ;;  %6423 = vmatmul.mubr.f32.gmra.mxu1 %v3281_v35  ;;  %v2850_v25 = vsel %vm609_vm1, %v2815_v41, -inf  ;;  %v2599_v60 = vsel %vm1039_vm4, %v2551_v43, %v2575_v9  ;;  %v3175_v18 = vsel %vm1726_vm7, %v3127_v2, %v3151_v22  ;;  %v2552_v41 = vrot.slane %v8455_v12, 6  ;;  %6490 = vmatprep.subr.mxu1 %v4513_v30 }
 0x1bd   : > { %10970 = vst [vmem:[#allocation31_spill] sm:$0xff] %v8568_v7  ;;  %v2380_v54 = vmax.f32 %v8568_v7, %v8437_v37  ;;  %v2474_v61 = vmax.f32 %v8535_v4, %v8568_v7  ;;  %v8583_v33 = vmax.f32 %v2472_v38, %v8568_v7  ;;  %v2429_v39 = vmax.f32 %v2381_v62, %v8485_v46 }
 0x1be   : > { %v2898_v23 = vmax.f32 %v2706_v53, %v2850_v25  ;;  %v2707_v4 = vmax.f32 %v8391_v51, %v2599_v60  ;;  %v3199_v62 = vsel %vm1726_vm7, %v3151_v22, %v3127_v2  ;;  %v2576_v43 = vrot.slane %v8443_v31, 6  ;;  %6491 = vmatpush3.msra.mxu1 %v4513_v30 }
 0x1bf   : > { %v8598_v35 = vmax.f32 %v2380_v54, %v8498_v13  ;;  %v2791_v51 = vsel %vm1268_vm5, %v2743_v57, %v2767_v21  ;;  %v3043_v8 = vsel %vm620_vm2, %v3007_v34, -inf  ;;  %v2744_v60 = vrot.slane %v8455_v12, 7 }
 0x1c0   : > { %v8595_v38 = vpop.f32.mrf.mxu0  ;;  %v3090_v53 = vmax.f32 %v2898_v23, %v2983_v44  ;;  %v2899_v2 = vmax.f32 %v2707_v4, %v2791_v51  ;;  %v2624_v22 = vsel %vm1039_vm4, %v2576_v43, %v2552_v41  ;;  %v3235_v21 = vsel %vm628_vm3, %v3199_v62, -inf }
 0x1c1   : > { %10971 = vst [vmem:[#allocation32_spill] sm:$0xff] %v8595_v38  ;;  %v2383_v9 = vmax.f32 %v8595_v38, %v8485_v46  ;;  %v2477_v54 = vmax.f32 %v2429_v39, %v8595_v38  ;;  %v8617_v44 = vmax.f32 %v2475_v52, %v8595_v38  ;;  %v2660_v34 = vsel %vm601_vm0, %v2624_v22, -inf }
 0x1c2   : > { %v8611_v25 = vpop.f32.mrf.mxu0  ;;  %v3282_v23 = vmax.f32 %v3090_v53, %v3175_v18  ;;  %v3091_v4 = vmax.f32 %v2899_v2, %v3043_v8  ;;  %v2768_v51 = vrot.slane %v8443_v31, 7  ;;  %v2708_v18 = vmax.f32 %v8455_v12, %v2660_v34 }
 0x1c3   : > { %10972 = vst [vmem:[#allocation33_spill] sm:$0xff] %v8611_v25  ;;  %v2382_v57 = vmax.f32 %v8611_v25, %v8498_v13  ;;  %v2476_v39 = vmax.f32 %v8598_v35, %v8611_v25  ;;  %v8629_v52 = vmax.f32 %v2383_v9, %v8554_v50  ;;  %v2936_v53 = vrot.slane %v8455_v12, 1 }
 0x1c4   : > { %6425 = vmatprep.mubr.f32.mxu1 %v3282_v23  ;;  %v3128_v62 = vrot.slane %v8455_v12, 2  ;;  %v8635_v30 = vmax.f32 %v2474_v61, %v8611_v25  ;;  %v3283_v35 = vmax.f32 %v3091_v4, %v3235_v21  ;;  %v2816_v8 = vsel %vm1268_vm5, %v2768_v51, %v2744_v60 }
 0x1c5   : > { %v2960_v2 = vrot.slane %v8443_v31, 1  ;;  %v2852_v22 = vsel %vm609_vm1, %v2816_v8, -inf  ;;  %v3152_v9 = vrot.slane %v8443_v31, 2  ;;  %v8644_v23 = vmax.f32 %v2382_v57, %v8568_v7 }
 0x1c6   : > { %v2600_v12 = vsel %vm1039_vm4, %v2552_v41, %v2576_v43  ;;  %6426 = vmatmul.mubr.f32.gmra.mxu1 %v3283_v35  ;;  %v2900_v21 = vmax.f32 %v2708_v18, %v2852_v22  ;;  %v2792_v43 = vsel %vm1268_vm5, %v2744_v60, %v2768_v51 }
 0x1c7   : > { %v8648_v61 = vpop.f32.mrf.mxu0  ;;  %v2984_v4 = vsel %vm1497_vm6, %v2936_v53, %v2960_v2  ;;  %v2709_v34 = vmax.f32 %v8443_v31, %v2600_v12  ;;  %v3008_v8 = vsel %vm1497_vm6, %v2960_v2, %v2936_v53  ;;  %v3176_v41 = vsel %vm1726_vm7, %v3128_v62, %v3152_v9 }
 0x1c8   : > { %10973 = vst [vmem:[#allocation34_spill] sm:$0xff] %v8648_v61  ;;  %v2385_v13 = vmax.f32 %v8648_v61, %v8554_v50  ;;  %v3092_v18 = vmax.f32 %v2900_v21, %v2984_v4  ;;  %v3200_v31 = vsel %vm1726_vm7, %v3152_v9, %v3128_v62  ;;  %v2553_v53 = vrot.slane %v8520_v0, 6 }
 0x1c9   : > { %v8663_v35 = vpop.f32.mrf.mxu0  ;;  %v2901_v22 = vmax.f32 %v2709_v34, %v2792_v43  ;;  %v8672_v12 = vmax.f32 %v2477_v54, %v8648_v61  ;;  %v3045_v60 = vsel %vm620_vm2, %v3008_v8, -inf  ;;  %v2577_v62 = vrot.slane %v8509_v32, 6 }
 0x1ca   : > { %10974 = vst [vmem:[#allocation35_spill] sm:$0xff] %v8663_v35  ;;  %v8669_v2 = vmax.f32 %v2385_v13, %v8595_v38  ;;  %v2384_v57 = vmax.f32 %v8663_v35, %v8568_v7  ;;  %v3284_v51 = vmax.f32 %v3092_v18, %v3176_v41  ;;  %v3237_v13 = vsel %vm628_vm3, %v3200_v31, -inf }
 0x1cb   : > { %v3093_v4 = vmax.f32 %v2901_v22, %v3045_v60  ;;  %v2745_v9 = vrot.slane %v8520_v0, 7  ;;  %v2769_v54 = vrot.slane %v8509_v32, 7  ;;  %v2937_v34 = vrot.slane %v8520_v0, 1 }
 0x1cc   : > { %6428 = vmatprep.mubr.f32.mxu1 %v3284_v51  ;;  %v8687_v43 = vmax.f32 %v2476_v39, %v8663_v35  ;;  %v2625_v41 = vsel %vm1039_vm4, %v2577_v62, %v2553_v53  ;;  %v3129_v18 = vrot.slane %v8520_v0, 2  ;;  %v2961_v60 = vrot.slane %v8509_v32, 1 }
 0x1cd   : > { %v3285_v8 = vmax.f32 %v3093_v4, %v3237_v13  ;;  %v2662_v22 = vsel %vm601_vm0, %v2625_v41, -inf  ;;  %v2817_v31 = vsel %vm1268_vm5, %v2769_v54, %v2745_v9  ;;  %v2601_v51 = vsel %vm1039_vm4, %v2553_v53, %v2577_v62 }
 0x1ce   : > { %v8700_v39 = vmax.f32 %v2384_v57, %v8611_v25  ;;  %v2710_v4 = vmax.f32 %v8520_v0, %v2662_v22  ;;  %v3153_v13 = vrot.slane %v8509_v32, 2  ;;  %v2711_v21 = vmax.f32 %v8509_v32, %v2601_v51 }
 0x1cf   : > { %6429 = vmatmul.mubr.f32.gmra.mxu1 %v3285_v8  ;;  %v2854_v41 = vsel %vm609_vm1, %v2817_v31, -inf  ;;  %v2985_v7 = vsel %vm1497_vm6, %v2937_v34, %v2961_v60  ;;  %v2793_v50 = vsel %vm1268_vm5, %v2745_v9, %v2769_v54  ;;  %v3009_v57 = vsel %vm1497_vm6, %v2961_v60, %v2937_v34  ;;  %v4512_v8 = vld [vmem:[#allocation8 + $0x108] sm:$0xff] }
 0x1d0   : > { %v2902_v53 = vmax.f32 %v2710_v4, %v2854_v41  ;;  %v2903_v62 = vmax.f32 %v2711_v21, %v2793_v50  ;;  %v3047_v0 = vsel %vm620_vm2, %v3009_v57, -inf  ;;  %v3201_v32 = vsel %vm1726_vm7, %v3153_v13, %v3129_v18  ;;  %6492 = vmatprep.subr.mxu1 %v4512_v8 }
 0x1d1   : > { %v2554_v22 = vrot.slane %v8583_v33, 6  ;;  %v2578_v31 = vrot.slane %v8574_v58, 6  ;;  %v2746_v51 = vrot.slane %v8583_v33, 7  ;;  %v2770_v9 = vrot.slane %v8574_v58, 7  ;;  %6493 = vmatpush3.msra.mxu1 %v4512_v8 }
 0x1d2   : > { %v3094_v54 = vmax.f32 %v2902_v53, %v2985_v7  ;;  %v3177_v50 = vsel %vm1726_vm7, %v3129_v18, %v3153_v13  ;;  %v3095_v21 = vmax.f32 %v2903_v62, %v3047_v0  ;;  %v2938_v34 = vrot.slane %v8583_v33, 1 }
 0x1d3   : > { %v3239_v60 = vsel %vm628_vm3, %v3201_v32, -inf  ;;  %v2626_v4 = vsel %vm1039_vm4, %v2578_v31, %v2554_v22  ;;  %v2818_v41 = vsel %vm1268_vm5, %v2770_v9, %v2746_v51  ;;  %v3130_v57 = vrot.slane %v8583_v33, 2 }
 0x1d4   : > { %v3286_v46 = vmax.f32 %v3094_v54, %v3177_v50  ;;  %v2664_v7 = vsel %vm601_vm0, %v2626_v4, -inf  ;;  %v2962_v18 = vrot.slane %v8574_v58, 1  ;;  %v3154_v13 = vrot.slane %v8574_v58, 2 }
 0x1d5   : > { %v3287_v53 = vmax.f32 %v3095_v21, %v3239_v60  ;;  %v2712_v62 = vmax.f32 %v8583_v33, %v2664_v7  ;;  %v2856_v0 = vsel %vm609_vm1, %v2818_v41, -inf  ;;  %v2602_v32 = vsel %vm1039_vm4, %v2554_v22, %v2578_v31 }
 0x1d6   : > { %6431 = vmatprep.mubr.f32.mxu1 %v3286_v46  ;;  %v2986_v8 = vsel %vm1497_vm6, %v2938_v34, %v2962_v18  ;;  %v3178_v54 = vsel %vm1726_vm7, %v3130_v57, %v3154_v13  ;;  %v2713_v50 = vmax.f32 %v8574_v58, %v2602_v32  ;;  %v3010_v21 = vsel %vm1497_vm6, %v2962_v18, %v2938_v34 }
 0x1d7   : > { %6432 = vmatmul.mubr.f32.gmra.mxu1 %v3287_v53  ;;  %v2904_v33 = vmax.f32 %v2712_v62, %v2856_v0  ;;  %v2794_v60 = vsel %vm1268_vm5, %v2746_v51, %v2770_v9  ;;  %v3202_v22 = vsel %vm1726_vm7, %v3154_v13, %v3130_v57  ;;  %v2555_v46 = vrot.slane %v8635_v30, 6 }
 0x1d8   : > { %v2905_v31 = vmax.f32 %v2713_v50, %v2794_v60  ;;  %v2579_v4 = vrot.slane %v8617_v44, 6  ;;  %v2747_v41 = vrot.slane %v8635_v30, 7  ;;  %v2771_v58 = vrot.slane %v8617_v44, 7 }
 0x1d9   : > { %v3096_v7 = vmax.f32 %v2904_v33, %v2986_v8  ;;  %v3049_v34 = vsel %vm620_vm2, %v3010_v21, -inf  ;;  %v2939_v18 = vrot.slane %v8635_v30, 1  ;;  %v3131_v51 = vrot.slane %v8635_v30, 2 }
 0x1da   : > { %v3097_v9 = vmax.f32 %v2905_v31, %v3049_v34  ;;  %v3241_v57 = vsel %vm628_vm3, %v3202_v22, -inf  ;;  %v2627_v13 = vsel %vm1039_vm4, %v2579_v4, %v2555_v46  ;;  %v2819_v53 = vsel %vm1268_vm5, %v2771_v58, %v2747_v41  ;;  %v4511_v22 = vld [vmem:[#allocation8 + $0x100] sm:$0xff] }
 0x1db   : > { %v3288_v62 = vmax.f32 %v3096_v7, %v3178_v54  ;;  %v2666_v0 = vsel %vm601_vm0, %v2627_v13, -inf  ;;  %v2963_v32 = vrot.slane %v8617_v44, 1  ;;  %v3155_v8 = vrot.slane %v8617_v44, 2  ;;  %6494 = vmatprep.subr.mxu1 %v4511_v22 }
 0x1dc   : > { %v3289_v50 = vmax.f32 %v3097_v9, %v3241_v57  ;;  %v2714_v21 = vmax.f32 %v8635_v30, %v2666_v0  ;;  %v2858_v33 = vsel %vm609_vm1, %v2819_v53, -inf  ;;  %v2603_v60 = vsel %vm1039_vm4, %v2555_v46, %v2579_v4  ;;  %v8781_v30 = vpop.f32.mrf.mxu0  ;;  %6495 = vmatpush3.msra.mxu1 %v4511_v22 }
 0x1dd   : > { %6434 = vmatprep.mubr.f32.mxu1 %v3288_v62  ;;  %v2987_v54 = vsel %vm1497_vm6, %v2939_v18, %v2963_v32  ;;  %v3179_v31 = vsel %vm1726_vm7, %v3131_v51, %v3155_v8  ;;  %v2715_v7 = vmax.f32 %v8617_v44, %v2603_v60  ;;  %v3011_v34 = vsel %vm1497_vm6, %v2963_v32, %v2939_v18 }
 0x1de   : > { %10975 = vst [vmem:[#allocation36_spill] sm:$0xff] %v8781_v30  ;;  %6435 = vmatmul.mubr.f32.gmra.mxu1 %v3289_v50  ;;  %v2906_v9 = vmax.f32 %v2714_v21, %v2858_v33  ;;  %v2795_v46 = vsel %vm1268_vm5, %v2747_v41, %v2771_v58  ;;  %v3203_v4 = vsel %vm1726_vm7, %v3155_v8, %v3131_v51  ;;  %v2556_v57 = vrot.slane %v8687_v43, 6  ;;  %v8801_v21 = vpop.f32.mrf.mxu0 }
 0x1df   : > { %v2907_v13 = vmax.f32 %v2715_v7, %v2795_v46  ;;  %v2580_v53 = vrot.slane %v8672_v12, 6  ;;  %v2748_v44 = vrot.slane %v8687_v43, 7  ;;  %v2772_v18 = vrot.slane %v8672_v12, 7  ;;  %10976 = vst [vmem:[#allocation37_spill] sm:$0xff] %v8801_v21 }
 0x1e0   : > { %v3098_v62 = vmax.f32 %v2906_v9, %v2987_v54  ;;  %v3051_v0 = vsel %vm620_vm2, %v3011_v34, -inf  ;;  %v2940_v41 = vrot.slane %v8687_v43, 1  ;;  %v3132_v58 = vrot.slane %v8687_v43, 2 }
 0x1e1   : > { %v3099_v51 = vmax.f32 %v2907_v13, %v3051_v0  ;;  %v3243_v32 = vsel %vm628_vm3, %v3203_v4, -inf  ;;  %v2628_v8 = vsel %vm1039_vm4, %v2580_v53, %v2556_v57  ;;  %v2820_v50 = vsel %vm1268_vm5, %v2772_v18, %v2748_v44 }
 0x1e2   : > { %v3290_v33 = vmax.f32 %v3098_v62, %v3179_v31  ;;  %v2668_v60 = vsel %vm601_vm0, %v2628_v8, -inf  ;;  %v2964_v22 = vrot.slane %v8672_v12, 1  ;;  %v3156_v54 = vrot.slane %v8672_v12, 2 }
 0x1e3   : > { %v3291_v7 = vmax.f32 %v3099_v51, %v3243_v32  ;;  %v2716_v34 = vmax.f32 %v8687_v43, %v2668_v60  ;;  %v2860_v9 = vsel %vm609_vm1, %v2820_v50, -inf  ;;  %v2604_v46 = vsel %vm1039_vm4, %v2556_v57, %v2580_v53 }
 0x1e4   : > { %6437 = vmatprep.mubr.f32.mxu1 %v3290_v33  ;;  %v2988_v31 = vsel %vm1497_vm6, %v2940_v41, %v2964_v22  ;;  %v3180_v4 = vsel %vm1726_vm7, %v3132_v58, %v3156_v54  ;;  %v2717_v13 = vmax.f32 %v8672_v12, %v2604_v46  ;;  %v3012_v62 = vsel %vm1497_vm6, %v2964_v22, %v2940_v41 }
 0x1e5   : > { %6438 = vmatmul.mubr.f32.gmra.mxu1 %v3291_v7  ;;  %v2908_v43 = vmax.f32 %v2716_v34, %v2860_v9  ;;  %v2796_v0 = vsel %vm1268_vm5, %v2748_v44, %v2772_v18  ;;  %v3204_v57 = vsel %vm1726_vm7, %v3156_v54, %v3132_v58  ;;  %v10977_v53 = vmax.f32 %v8644_v23, %v8663_v35 }
 0x1e6   : > { %v2909_v32 = vmax.f32 %v2717_v13, %v2796_v0  ;;  %v3053_v12 = vsel %vm620_vm2, %v3012_v62, -inf  ;;  %v10978_v41 = vmax.f32 %v8629_v52, %v8648_v61  ;;  %v8835_v44 = vmax.f32 %v8700_v39, %v8801_v21 }
 0x1e7   : > { %v2526_v51 = vmax.f32 %v10977_v53, %v8801_v21  ;;  %v3100_v18 = vmax.f32 %v2908_v43, %v2988_v31  ;;  %v3245_v23 = vsel %vm628_vm3, %v3204_v57, -inf  ;;  %v2481_v52 = vmax.f32 %v8669_v2, %v8781_v30 }
 0x1e8   : > { %v2527_v8 = vmax.f32 %v10978_v41, %v8781_v30  ;;  %v3101_v60 = vmax.f32 %v2909_v32, %v3053_v12  ;;  %v2558_v2 = vrot.slane %v8835_v44, 6 }
 0x1e9   : > { %v2557_v58 = vrot.slane %v2526_v51, 6  ;;  %v2749_v50 = vrot.slane %v2526_v51, 7  ;;  %v2941_v33 = vrot.slane %v2526_v51, 1  ;;  %v3292_v7 = vmax.f32 %v3100_v18, %v3180_v4 }
 0x1ea   : > { %v2581_v22 = vrot.slane %v2527_v8, 6  ;;  %v2773_v54 = vrot.slane %v2527_v8, 7  ;;  %v2965_v34 = vrot.slane %v2527_v8, 1  ;;  %v3133_v9 = vrot.slane %v2526_v51, 2 }
 0x1eb   : > { %v3293_v46 = vmax.f32 %v3101_v60, %v3245_v23  ;;  %v3157_v13 = vrot.slane %v2527_v8, 2  ;;  %6440 = vmatprep.mubr.f32.mxu1 %v3292_v7  ;;  %v2582_v18 = vrot.slane %v2481_v52, 6  ;;  %v2966_v7 = vrot.slane %v2481_v52, 1 }
 0x1ec   : > { %v2629_v39 = vsel %vm1039_vm4, %v2581_v22, %v2557_v58  ;;  %v2821_v31 = vsel %vm1268_vm5, %v2773_v54, %v2749_v50  ;;  %v2989_v4 = vsel %vm1497_vm6, %v2941_v33, %v2965_v34  ;;  %v2605_v43 = vsel %vm1039_vm4, %v2557_v58, %v2581_v22 }
 0x1ed   : > { %v2670_v62 = vsel %vm601_vm0, %v2629_v39, -inf  ;;  %6441 = vmatmul.mubr.f32.gmra.mxu1 %v3293_v46  ;;  %v2862_v57 = vsel %vm609_vm1, %v2821_v31, -inf  ;;  %v2719_v53 = vmax.f32 %v2527_v8, %v2605_v43  ;;  %v3013_v32 = vsel %vm1497_vm6, %v2965_v34, %v2941_v33 }
 0x1ee   : > { %v2718_v0 = vmax.f32 %v2526_v51, %v2670_v62  ;;  %v2797_v12 = vsel %vm1268_vm5, %v2749_v50, %v2773_v54  ;;  %v3055_v41 = vsel %vm620_vm2, %v3013_v32, -inf  ;;  %v2750_v58 = vrot.slane %v8835_v44, 7 }
 0x1ef   : > { %v2911_v23 = vmax.f32 %v2719_v53, %v2797_v12  ;;  %v3205_v51 = vsel %vm1726_vm7, %v3157_v13, %v3133_v9  ;;  %v2774_v22 = vrot.slane %v2481_v52, 7  ;;  %v2630_v8 = vsel %vm1039_vm4, %v2582_v18, %v2558_v2 }
 0x1f0   : > { %v2910_v60 = vmax.f32 %v2718_v0, %v2862_v57  ;;  %v2942_v33 = vrot.slane %v8835_v44, 1  ;;  %v3134_v50 = vrot.slane %v8835_v44, 2  ;;  %v2672_v46 = vsel %vm601_vm0, %v2630_v8, -inf }
 0x1f1   : > { %v3103_v34 = vmax.f32 %v2911_v23, %v3055_v41  ;;  %v2822_v39 = vsel %vm1268_vm5, %v2774_v22, %v2750_v58  ;;  %v3181_v31 = vsel %vm1726_vm7, %v3133_v9, %v3157_v13  ;;  %v3247_v62 = vsel %vm628_vm3, %v3205_v51, -inf }
 0x1f2   : > { %v3102_v54 = vmax.f32 %v2910_v60, %v2989_v4  ;;  %v2720_v43 = vmax.f32 %v8835_v44, %v2672_v46  ;;  %v2864_v0 = vsel %vm609_vm1, %v2822_v39, -inf  ;;  %v2990_v4 = vsel %vm1497_vm6, %v2942_v33, %v2966_v7 }
 0x1f3   : > { %v3158_v53 = vrot.slane %v2481_v52, 2  ;;  %v2606_v32 = vsel %vm1039_vm4, %v2558_v2, %v2582_v18  ;;  %v3295_v12 = vmax.f32 %v3103_v34, %v3247_v62  ;;  %v3014_v9 = vsel %vm1497_vm6, %v2966_v7, %v2942_v33 }
 0x1f4   : > { %v3294_v57 = vmax.f32 %v3102_v54, %v3181_v31  ;;  %v2912_v41 = vmax.f32 %v2720_v43, %v2864_v0  ;;  %v2721_v60 = vmax.f32 %v2481_v52, %v2606_v32  ;;  %v2798_v44 = vsel %vm1268_vm5, %v2750_v58, %v2774_v22 }
 0x1f5   : > { %v3206_v13 = vsel %vm1726_vm7, %v3158_v53, %v3134_v50  ;;  %v2386_v23 = vmax.f32 %v8801_v21, %v8611_v25  ;;  %v2387_v51 = vmax.f32 %v8781_v30, %v8595_v38  ;;  %v3182_v52 = vsel %vm1726_vm7, %v3134_v50, %v3158_v53 }
 0x1f6   : > { %6443 = vmatprep.mubr.f32.mxu1 %v3294_v57  ;;  %v3104_v2 = vmax.f32 %v2912_v41, %v2990_v4  ;;  %v2913_v18 = vmax.f32 %v2721_v60, %v2798_v44  ;;  %v3057_v8 = vsel %vm620_vm2, %v3014_v9, -inf  ;;  %v3249_v54 = vsel %vm628_vm3, %v3206_v13, -inf }
 0x1f7   : > { %6444 = vmatmul.mubr.f32.gmra.mxu1 %v3295_v12  ;;  %v2434_v58 = vmax.f32 %v2386_v23, %v8663_v35  ;;  %v2435_v22 = vmax.f32 %v2387_v51, %v8648_v61  ;;  %v8902_v34 = vmax.f32 %v8663_v35, %v8801_v21  ;;  %v2437_v57 = vmax.f32 %v8648_v61, %v8781_v30 }
 0x1f8   : > { %v3296_v33 = vmax.f32 %v3104_v2, %v3182_v52  ;;  %v3105_v7 = vmax.f32 %v2913_v18, %v3057_v8 }
 0x1f9   : > { %v2559_v46 = vrot.slane %v2434_v58, 6  ;;  %v2583_v39 = vrot.slane %v2435_v22, 6  ;;  %v2751_v31 = vrot.slane %v2434_v58, 7  ;;  %v2775_v50 = vrot.slane %v2435_v22, 7 }
 0x1fa   : > { %6446 = vmatprep.mubr.f32.mxu1 %v3296_v33  ;;  %v3297_v62 = vmax.f32 %v3105_v7, %v3249_v54  ;;  %v2943_v43 = vrot.slane %v2434_v58, 1  ;;  %v2967_v0 = vrot.slane %v2435_v22, 1  ;;  %v3135_v32 = vrot.slane %v2434_v58, 2 }
 0x1fb   : > { %v2631_v4 = vsel %vm1039_vm4, %v2583_v39, %v2559_v46  ;;  %v2823_v53 = vsel %vm1268_vm5, %v2775_v50, %v2751_v31  ;;  %v2607_v12 = vsel %vm1039_vm4, %v2559_v46, %v2583_v39  ;;  %v2560_v9 = vrot.slane %v8902_v34, 6 }
 0x1fc   : > { %6447 = vmatmul.mubr.f32.gmra.mxu1 %v3297_v62  ;;  %v2674_v41 = vsel %vm601_vm0, %v2631_v4, -inf  ;;  %v2723_v60 = vmax.f32 %v2435_v22, %v2607_v12  ;;  %v2752_v44 = vrot.slane %v8902_v34, 7  ;;  %v3159_v23 = vrot.slane %v2435_v22, 2 }
 0x1fd   : > { %v2722_v13 = vmax.f32 %v2434_v58, %v2674_v41  ;;  %v2799_v51 = vsel %vm1268_vm5, %v2751_v31, %v2775_v50  ;;  %v3015_v2 = vsel %vm1497_vm6, %v2967_v0, %v2943_v43  ;;  %v2866_v18 = vsel %vm609_vm1, %v2823_v53, -inf }
 0x1fe   : > { %v2915_v52 = vmax.f32 %v2723_v60, %v2799_v51  ;;  %v2584_v8 = vrot.slane %v2437_v57, 6  ;;  %v2561_v33 = vrot.slane %v8801_v21, 6  ;;  %v3059_v54 = vsel %vm620_vm2, %v3015_v2, -inf }
 0x1ff   : > { %v2914_v7 = vmax.f32 %v2722_v13, %v2866_v18  ;;  %v3207_v58 = vsel %vm1726_vm7, %v3159_v23, %v3135_v32  ;;  %v2776_v22 = vrot.slane %v2437_v57, 7  ;;  %v2991_v46 = vsel %vm1497_vm6, %v2943_v43, %v2967_v0 }
 0x200   : > { %v3107_v39 = vmax.f32 %v2915_v52, %v3059_v54  ;;  %v2632_v31 = vsel %vm1039_vm4, %v2584_v8, %v2560_v9  ;;  %v2944_v50 = vrot.slane %v8902_v34, 1  ;;  %v3183_v4 = vsel %vm1726_vm7, %v3135_v32, %v3159_v23 }
 0x201   : > { %v3106_v62 = vmax.f32 %v2914_v7, %v2991_v46  ;;  %v2676_v53 = vsel %vm601_vm0, %v2632_v31, -inf  ;;  %v2824_v12 = vsel %vm1268_vm5, %v2776_v22, %v2752_v44  ;;  %v3251_v41 = vsel %vm628_vm3, %v3207_v58, -inf }
 0x202   : > { %v2724_v43 = vmax.f32 %v8902_v34, %v2676_v53  ;;  %v2968_v0 = vrot.slane %v2437_v57, 1  ;;  %v3136_v60 = vrot.slane %v8902_v34, 2  ;;  %v2868_v51 = vsel %vm609_vm1, %v2824_v12, -inf }
 0x203   : > { %v3298_v13 = vmax.f32 %v3106_v62, %v3183_v4  ;;  %v3160_v2 = vrot.slane %v2437_v57, 2  ;;  %v2608_v32 = vsel %vm1039_vm4, %v2560_v9, %v2584_v8  ;;  %v3299_v23 = vmax.f32 %v3107_v39, %v3251_v41 }
 0x204   : > { %v2916_v18 = vmax.f32 %v2724_v43, %v2868_v51  ;;  %v2725_v52 = vmax.f32 %v2437_v57, %v2608_v32  ;;  %v3016_v7 = vsel %vm1497_vm6, %v2968_v0, %v2944_v50  ;;  %v2992_v54 = vsel %vm1497_vm6, %v2944_v50, %v2968_v0 }
 0x205   : > { %6449 = vmatprep.mubr.f32.mxu1 %v3298_v13  ;;  %v2800_v34 = vsel %vm1268_vm5, %v2752_v44, %v2776_v22  ;;  %v2585_v58 = vrot.slane %v8781_v30, 6  ;;  %v2753_v46 = vrot.slane %v8801_v21, 7  ;;  %v3208_v57 = vsel %vm1726_vm7, %v3160_v2, %v3136_v60 }
 0x206   : > { %6450 = vmatmul.mubr.f32.gmra.mxu1 %v3299_v23  ;;  %v3108_v31 = vmax.f32 %v2916_v18, %v2992_v54  ;;  %v2917_v9 = vmax.f32 %v2725_v52, %v2800_v34  ;;  %v2777_v8 = vrot.slane %v8781_v30, 7  ;;  %v3184_v39 = vsel %vm1726_vm7, %v3136_v60, %v3160_v2 }
 0x207   : > { %v3061_v50 = vsel %vm620_vm2, %v3016_v7, -inf  ;;  %v2633_v44 = vsel %vm1039_vm4, %v2585_v58, %v2561_v33  ;;  %v2945_v22 = vrot.slane %v8801_v21, 1  ;;  %v3253_v41 = vsel %vm628_vm3, %v3208_v57, -inf }
 0x208   : > { %v3300_v62 = vmax.f32 %v3108_v31, %v3184_v39  ;;  %v3109_v4 = vmax.f32 %v2917_v9, %v3061_v50  ;;  %v2678_v53 = vsel %vm601_vm0, %v2633_v44, -inf  ;;  %v2825_v12 = vsel %vm1268_vm5, %v2777_v8, %v2753_v46 }
 0x209   : > { %v2726_v43 = vmax.f32 %v8801_v21, %v2678_v53  ;;  %v2969_v0 = vrot.slane %v8781_v30, 1  ;;  %v3137_v60 = vrot.slane %v8801_v21, 2  ;;  %v2870_v51 = vsel %vm609_vm1, %v2825_v12, -inf  ;;  %v6724_v53 = vld [vmem:[%s7177_s9 + $0x8] sm:$0xff] }
 0x20a   : > { %6452 = vmatprep.mubr.f32.mxu1 %v3300_v62  ;;  %v3301_v13 = vmax.f32 %v3109_v4, %v3253_v41  ;;  %v2609_v2 = vsel %vm1039_vm4, %v2561_v33, %v2585_v58  ;;  %v3161_v23 = vrot.slane %v8781_v30, 2  ;;  %v2801_v54 = vsel %vm1268_vm5, %v2753_v46, %v2777_v8 }
 0x20b   : > { %v2918_v32 = vmax.f32 %v2726_v43, %v2870_v51  ;;  %v2727_v18 = vmax.f32 %v8781_v30, %v2609_v2  ;;  %v3017_v52 = vsel %vm1497_vm6, %v2969_v0, %v2945_v22  ;;  %v2993_v7 = vsel %vm1497_vm6, %v2945_v22, %v2969_v0 }
 0x20c   : > { %6453 = vmatmul.mubr.f32.gmra.mxu1 %v3301_v13  ;;  %v3209_v33 = vsel %vm1726_vm7, %v3161_v23, %v3137_v60  ;;  %v3185_v58 = vsel %vm1726_vm7, %v3137_v60, %v3161_v23  ;;  %v3063_v9 = vsel %vm620_vm2, %v3017_v52, -inf  ;;  %v2261_v12 = vadd.f32 %v6724_v53, %v7987_v42  ;;  %v6725_v60 = vld [vmem:[%s7177_s9] sm:$0xff] }
 0x20d   : > { %v3110_v34 = vmax.f32 %v2918_v32, %v2993_v7  ;;  %v2919_v31 = vmax.f32 %v2727_v18, %v2801_v54  ;;  %v3255_v50 = vsel %vm628_vm3, %v3209_v33, -inf  ;;  %v2260_v13 = vadd.f32 %v6725_v60, %v7989_v55 }
 0x20f   : > { %v3302_v57 = vmax.f32 %v3110_v34, %v3185_v58  ;;  %v3111_v39 = vmax.f32 %v2919_v31, %v3063_v9 }
 0x211   : > { %6455 = vmatprep.mubr.f32.mxu1 %v3302_v57  ;;  %v3303_v44 = vmax.f32 %v3111_v39, %v3255_v50 }
 0x213   : > { %6456 = vmatmul.mubr.f32.gmra.mxu1 %v3303_v44 }
 0x214   : > { %6458 = vmatprep.mubr.f32.mxu1 %v7216_v24 }
 0x217   : > { %6459 = vmatmul.mubr.f32.gmra.mxu1 %v7224_v28 }
 0x218   : > { %6461 = vmatprep.mubr.f32.mxu1 %v7216_v24 }
 0x21b   : > { %6462 = vmatmul.mubr.f32.gmra.mxu1 %v7224_v28 }
 0x230   : > { %v6400_v46 = vpop.f32.mrf.mxu1 }
 0x232   : > { %v3411_v8 = vpop.f32.mrf.mxu1 }
 0x23c   : > { %v6403_v22 = vpop.f32.mrf.mxu1 }
 0x23e   : > { %v3421_v62 = vpop.f32.mrf.mxu1 }
 0x246   : > { %v8997_v4 = vpop.f32.mrf.mxu1 }
 0x247   : > { %v3890_v43 = vrot.slane %v8997_v4, 6  ;;  %v9005_v0 = vadd.f32 %v8997_v4, %v2261_v12  ;;  %v4050_v32 = vrot.slane %v8997_v4, 7  ;;  %v4210_v7 = vrot.slane %v8997_v4, 1 }
 0x248   : > { %v9001_v41 = vpop.f32.mrf.mxu1  ;;  %v4370_v57 = vrot.slane %v8997_v4, 2 }
 0x249   : > { %v3870_v51 = vrot.slane %v9001_v41, 6  ;;  %v4030_v2 = vrot.slane %v9001_v41, 7  ;;  %v4190_v23 = vrot.slane %v9001_v41, 1  ;;  %v9014_v42 = vadd.f32 %v9001_v41, %v2260_v13 }
 0x24a   : > { %v4350_v54 = vrot.slane %v9001_v41, 2 }
 0x24b   : > { %v3930_v18 = vsel %vm1039_vm4, %v3890_v43, %v3870_v51  ;;  %v4090_v52 = vsel %vm1268_vm5, %v4050_v32, %v4030_v2  ;;  %v3910_v34 = vsel %vm1039_vm4, %v3870_v51, %v3890_v43  ;;  %v4250_v58 = vsel %vm1497_vm6, %v4210_v7, %v4190_v23 }
 0x24c   : > { %v3950_v55 = vsel %vm601_vm0, %v3930_v18, -inf  ;;  %v3991_v33 = vmax.f32 %v8997_v4, %v3910_v34  ;;  %v4110_v9 = vsel %vm609_vm1, %v4090_v52, -inf  ;;  %v4070_v39 = vsel %vm1268_vm5, %v4030_v2, %v4050_v32 }
 0x24d   : > { %v3990_v31 = vmax.f32 %v9001_v41, %v3950_v55  ;;  %v4230_v22 = vsel %vm1497_vm6, %v4190_v23, %v4210_v7  ;;  %v4271_v62 = vsel %vm620_vm2, %v4250_v58, -inf  ;;  %v4410_v53 = vsel %vm1726_vm7, %v4370_v57, %v4350_v54 }
 0x24e   : > { %v4151_v46 = vmax.f32 %v3991_v33, %v4070_v39  ;;  %v4390_v51 = vsel %vm1726_vm7, %v4350_v54, %v4370_v57  ;;  %v4431_v32 = vsel %vm628_vm3, %v4410_v53, -inf }
 0x24f   : > { %v9035_v50 = vpop.f32.mrf.mxu1  ;;  %v4150_v44 = vmax.f32 %v3990_v31, %v4110_v9 }
 0x250   : > { %v3795_v8 = vmax.f32 %v8997_v4, %v9035_v50  ;;  %v4311_v60 = vmax.f32 %v4151_v46, %v4271_v62  ;;  %v3757_v62 = vmax.f32 %v9035_v50, %v8997_v4 }
 0x251   : > { %v9045_v12 = vpop.f32.mrf.mxu1  ;;  %v4310_v43 = vmax.f32 %v4150_v44, %v4230_v22 }
 0x252   : > { %v3794_v13 = vmax.f32 %v9001_v41, %v9045_v12  ;;  %v3891_v23 = vrot.slane %v3795_v8, 6  ;;  %v4051_v18 = vrot.slane %v3795_v8, 7  ;;  %v4471_v52 = vmax.f32 %v4311_v60, %v4431_v32 }
 0x253   : > { %v4470_v2 = vmax.f32 %v4310_v43, %v4390_v51  ;;  %v4211_v54 = vrot.slane %v3795_v8, 1  ;;  %v4371_v57 = vrot.slane %v3795_v8, 2  ;;  %v3756_v53 = vmax.f32 %v9045_v12, %v9001_v41 }
 0x254   : > { %v3871_v7 = vrot.slane %v3794_v13, 6  ;;  %v4031_v55 = vrot.slane %v3794_v13, 7  ;;  %v4191_v34 = vrot.slane %v3794_v13, 1  ;;  %v4351_v31 = vrot.slane %v3794_v13, 2 }
 0x255   : > { %6496 = vmatprep.mubr.f32.mxu1 %v4470_v2 }
 0x256   : > { %6497 = vmatmul.mubr.f32.vlgmr.msra.gmra.mxu1 %v4471_v52  ;;  %v3931_v33 = vsel %vm1039_vm4, %v3891_v23, %v3871_v7  ;;  %v4091_v58 = vsel %vm1268_vm5, %v4051_v18, %v4031_v55  ;;  %v3911_v39 = vsel %vm1039_vm4, %v3871_v7, %v3891_v23  ;;  %v4251_v22 = vsel %vm1497_vm6, %v4211_v54, %v4191_v34 }
 0x257   : > { %v3952_v9 = vsel %vm601_vm0, %v3931_v33, -inf  ;;  %v3993_v46 = vmax.f32 %v3795_v8, %v3911_v39  ;;  %v4112_v60 = vsel %vm609_vm1, %v4091_v58, -inf  ;;  %v4411_v51 = vsel %vm1726_vm7, %v4371_v57, %v4351_v31 }
 0x258   : > { %v3992_v44 = vmax.f32 %v3794_v13, %v3952_v9  ;;  %v9067_v43 = vpop.f32.mrf.mxu1  ;;  %v4231_v23 = vsel %vm1497_vm6, %v4191_v34, %v4211_v54  ;;  %v4071_v52 = vsel %vm1268_vm5, %v4031_v55, %v4051_v18  ;;  %v4391_v58 = vsel %vm1726_vm7, %v4351_v31, %v4371_v57 }
 0x259   : > { %v3835_v2 = vmax.f32 %v3795_v8, %v9067_v43  ;;  %v3719_v7 = vmax.f32 %v9067_v43, %v8997_v4  ;;  %v4153_v9 = vmax.f32 %v3993_v46, %v4071_v52  ;;  %v4273_v39 = vsel %vm620_vm2, %v4251_v22, -inf }
 0x25a   : > { %v4152_v32 = vmax.f32 %v3992_v44, %v4112_v60  ;;  %v9080_v33 = vpop.f32.mrf.mxu1  ;;  %v3797_v8 = vmax.f32 %v3757_v62, %v9067_v43  ;;  %v4433_v18 = vsel %vm628_vm3, %v4411_v51, -inf }
 0x25b   : > { %v3718_v34 = vmax.f32 %v9080_v33, %v9001_v41  ;;  %v3834_v54 = vmax.f32 %v3794_v13, %v9080_v33  ;;  %v3796_v4 = vmax.f32 %v3756_v53, %v9080_v33  ;;  %v4313_v44 = vmax.f32 %v4153_v9, %v4273_v39 }
 0x25c   : > { %v4312_v55 = vmax.f32 %v4152_v32, %v4231_v23  ;;  %v3892_v60 = vrot.slane %v3835_v2, 6  ;;  %v4052_v46 = vrot.slane %v3835_v2, 7  ;;  %v3759_v22 = vmax.f32 %v3719_v7, %v9035_v50 }
 0x25d   : > { %v3872_v31 = vrot.slane %v3834_v54, 6  ;;  %v4032_v57 = vrot.slane %v3834_v54, 7  ;;  %v4192_v52 = vrot.slane %v3834_v54, 1  ;;  %v4473_v21 = vmax.f32 %v4313_v44, %v4433_v18 }
 0x25e   : > { %v4472_v62 = vmax.f32 %v4312_v55, %v4391_v58  ;;  %v4212_v30 = vrot.slane %v3835_v2, 1  ;;  %v4352_v51 = vrot.slane %v3834_v54, 2  ;;  %v9101_v32 = vmax.f32 %v3718_v34, %v9045_v12 }
 0x25f   : > { %v3932_v41 = vsel %vm1039_vm4, %v3892_v60, %v3872_v31  ;;  %v4092_v13 = vsel %vm1268_vm5, %v4052_v46, %v4032_v57  ;;  %v3912_v53 = vsel %vm1039_vm4, %v3872_v31, %v3892_v60  ;;  %v4372_v7 = vrot.slane %v3835_v2, 2 }
 0x260   : > { %6499 = vmatprep.mubr.f32.mxu1 %v4472_v62  ;;  %v3954_v23 = vsel %vm601_vm0, %v3932_v41, -inf  ;;  %v3995_v58 = vmax.f32 %v3835_v2, %v3912_v53  ;;  %v4114_v18 = vsel %vm609_vm1, %v4092_v13, -inf  ;;  %v4072_v55 = vsel %vm1268_vm5, %v4032_v57, %v4052_v46 }
 0x261   : > { %v9105_v9 = vpop.f32.mrf.mxu1  ;;  %6500 = vmatmul.mubr.f32.gmra.mxu1 %v4473_v21  ;;  %v3994_v39 = vmax.f32 %v3834_v54, %v3954_v23  ;;  %v4252_v34 = vsel %vm1497_vm6, %v4212_v30, %v4192_v52  ;;  %v4232_v2 = vsel %vm1497_vm6, %v4192_v52, %v4212_v30  ;;  %v4392_v57 = vsel %vm1726_vm7, %v4352_v51, %v4372_v7 }
 0x262   : > { %v3721_v44 = vmax.f32 %v9105_v9, %v9035_v50  ;;  %v3837_v60 = vmax.f32 %v3797_v8, %v9105_v9  ;;  %v4155_v31 = vmax.f32 %v3995_v58, %v4072_v55  ;;  %v3799_v21 = vmax.f32 %v3759_v22, %v9105_v9 }
 0x263   : > { %v9119_v54 = vpop.f32.mrf.mxu1  ;;  %v4154_v62 = vmax.f32 %v3994_v39, %v4114_v18  ;;  %v4412_v46 = vsel %vm1726_vm7, %v4372_v7, %v4352_v51  ;;  %v4275_v52 = vsel %vm620_vm2, %v4252_v34, -inf }
 0x264   : > { %v3720_v41 = vmax.f32 %v9119_v54, %v9045_v12  ;;  %v3798_v8 = vmax.f32 %v9101_v32, %v9119_v54  ;;  %v3836_v30 = vmax.f32 %v3796_v4, %v9119_v54  ;;  %v9133_v22 = vmax.f32 %v3721_v44, %v9067_v43 }
 0x265   : > { %v4314_v13 = vmax.f32 %v4154_v62, %v4232_v2  ;;  %v4315_v53 = vmax.f32 %v4155_v31, %v4275_v52  ;;  %v4435_v23 = vsel %vm628_vm3, %v4412_v46, -inf  ;;  %v3893_v7 = vrot.slane %v3837_v60, 6 }
 0x266   : > { %v3873_v51 = vrot.slane %v3836_v30, 6  ;;  %v4033_v58 = vrot.slane %v3836_v30, 7  ;;  %v4053_v39 = vrot.slane %v3837_v60, 7  ;;  %v4193_v32 = vrot.slane %v3836_v30, 1 }
 0x267   : > { %v4474_v18 = vmax.f32 %v4314_v13, %v4392_v57  ;;  %v4475_v55 = vmax.f32 %v4315_v53, %v4435_v23  ;;  %v4213_v35 = vrot.slane %v3837_v60, 1  ;;  %v4353_v44 = vrot.slane %v3836_v30, 2 }
 0x268   : > { %v3933_v4 = vsel %vm1039_vm4, %v3893_v7, %v3873_v51  ;;  %v4093_v34 = vsel %vm1268_vm5, %v4053_v39, %v4033_v58  ;;  %v4373_v2 = vrot.slane %v3837_v60, 2  ;;  %v3760_v31 = vmax.f32 %v3720_v41, %v9080_v33 }
 0x269   : > { %6502 = vmatprep.mubr.f32.mxu1 %v4474_v18  ;;  %v3956_v62 = vsel %vm601_vm0, %v3933_v4, -inf  ;;  %v4116_v57 = vsel %vm609_vm1, %v4093_v34, -inf  ;;  %v3913_v46 = vsel %vm1039_vm4, %v3873_v51, %v3893_v7  ;;  %v4233_v53 = vsel %vm1497_vm6, %v4193_v32, %v4213_v35 }
 0x26a   : > { %6503 = vmatmul.mubr.f32.gmra.mxu1 %v4475_v55  ;;  %v3996_v13 = vmax.f32 %v3836_v30, %v3956_v62  ;;  %v4393_v41 = vsel %vm1726_vm7, %v4353_v44, %v4373_v2  ;;  %v3997_v23 = vmax.f32 %v3837_v60, %v3913_v46  ;;  %v4073_v34 = vsel %vm1268_vm5, %v4033_v58, %v4053_v39 }
 0x26b   : > { %v9148_v52 = vpop.f32.mrf.mxu1  ;;  %v4253_v51 = vsel %vm1497_vm6, %v4213_v35, %v4193_v32  ;;  %v4413_v60 = vsel %vm1726_vm7, %v4373_v2, %v4353_v44 }
 0x26c   : > { %v3723_v18 = vmax.f32 %v9148_v52, %v9067_v43  ;;  %v3839_v4 = vmax.f32 %v3799_v21, %v9148_v52  ;;  %v3801_v30 = vmax.f32 %v9133_v22, %v9148_v52  ;;  %v4156_v55 = vmax.f32 %v3996_v13, %v4116_v57 }
 0x26d   : > { %v9163_v7 = vpop.f32.mrf.mxu1  ;;  %v4157_v62 = vmax.f32 %v3997_v23, %v4073_v34  ;;  %v4277_v35 = vsel %vm620_vm2, %v4253_v51, -inf  ;;  %v4437_v57 = vsel %vm628_vm3, %v4413_v60, -inf }
 0x26e   : > { %v3722_v46 = vmax.f32 %v9163_v7, %v9080_v33  ;;  %v3800_v21 = vmax.f32 %v3760_v31, %v9163_v7  ;;  %v3838_v58 = vmax.f32 %v3798_v8, %v9163_v7  ;;  %v9174_v39 = vmax.f32 %v3723_v18, %v9105_v9 }
 0x26f   : > { %v4316_v22 = vmax.f32 %v4156_v55, %v4233_v53  ;;  %v4317_v32 = vmax.f32 %v4157_v62, %v4277_v35  ;;  %v3894_v44 = vrot.slane %v3839_v4, 6  ;;  %v4054_v23 = vrot.slane %v3839_v4, 7 }
 0x270   : > { %v3874_v13 = vrot.slane %v3838_v58, 6  ;;  %v4034_v2 = vrot.slane %v3838_v58, 7  ;;  %v9179_v34 = vmax.f32 %v3722_v46, %v9119_v54  ;;  %v4194_v61 = vrot.slane %v3838_v58, 1 }
 0x271   : > { %v4476_v31 = vmax.f32 %v4316_v22, %v4393_v41  ;;  %v4477_v8 = vmax.f32 %v4317_v32, %v4437_v57  ;;  %v4214_v18 = vrot.slane %v3839_v4, 1  ;;  %v4354_v55 = vrot.slane %v3838_v58, 2 }
 0x272   : > { %v3934_v51 = vsel %vm1039_vm4, %v3894_v44, %v3874_v13  ;;  %v4094_v53 = vsel %vm1268_vm5, %v4054_v23, %v4034_v2  ;;  %v4374_v41 = vrot.slane %v3839_v4, 2  ;;  %v3914_v35 = vsel %vm1039_vm4, %v3874_v13, %v3894_v44 }
 0x273   : > { %v9185_v62 = vpop.f32.mrf.mxu1  ;;  %6505 = vmatprep.mubr.f32.mxu1 %v4476_v31  ;;  %v3958_v60 = vsel %vm601_vm0, %v3934_v51, -inf  ;;  %v4118_v46 = vsel %vm609_vm1, %v4094_v53, -inf  ;;  %v4234_v31 = vsel %vm1497_vm6, %v4194_v61, %v4214_v18  ;;  %v3999_v38 = vmax.f32 %v3839_v4, %v3914_v35 }
 0x274   : > { %10979 = vst [vmem:[#allocation38_spill] sm:$0xff] %v9185_v62  ;;  %v3725_v22 = vmax.f32 %v9185_v62, %v9105_v9  ;;  %v3841_v32 = vmax.f32 %v3801_v30, %v9185_v62  ;;  %6506 = vmatmul.mubr.f32.gmra.mxu1 %v4477_v8  ;;  %v3998_v57 = vmax.f32 %v3838_v58, %v3958_v60 }
 0x275   : > { %v3803_v51 = vmax.f32 %v9174_v39, %v9185_v62  ;;  %v9200_v25 = vpop.f32.mrf.mxu1  ;;  %v4394_v53 = vsel %vm1726_vm7, %v4354_v55, %v4374_v41  ;;  %v4254_v13 = vsel %vm1497_vm6, %v4214_v18, %v4194_v61  ;;  %v4074_v39 = vsel %vm1268_vm5, %v4034_v2, %v4054_v23 }
 0x276   : > { %10980 = vst [vmem:[#allocation39_spill] sm:$0xff] %v9200_v25  ;;  %v3724_v30 = vmax.f32 %v9200_v25, %v9119_v54  ;;  %v3802_v58 = vmax.f32 %v9179_v34, %v9200_v25  ;;  %v3840_v44 = vmax.f32 %v3800_v21, %v9200_v25  ;;  %v9214_v8 = vmax.f32 %v3725_v22, %v9148_v52 }
 0x277   : > { %v4158_v60 = vmax.f32 %v3998_v57, %v4118_v46  ;;  %v4159_v37 = vmax.f32 %v3999_v38, %v4074_v39  ;;  %v4414_v4 = vsel %vm1726_vm7, %v4374_v41, %v4354_v55  ;;  %v4279_v18 = vsel %vm620_vm2, %v4254_v13, -inf }
 0x278   : > { %v9219_v61 = vmax.f32 %v3724_v30, %v9163_v7  ;;  %v3875_v34 = vrot.slane %v3840_v44, 6  ;;  %v3895_v35 = vrot.slane %v3841_v32, 6  ;;  %v4035_v15 = vrot.slane %v3840_v44, 7 }
 0x279   : > { %v4318_v21 = vmax.f32 %v4158_v60, %v4234_v31  ;;  %v4319_v48 = vmax.f32 %v4159_v37, %v4279_v18  ;;  %v4055_v2 = vrot.slane %v3841_v32, 7  ;;  %v4439_v23 = vsel %vm628_vm3, %v4414_v4, -inf  ;;  %v5520_v4 = vld [vmem:[#allocation8 + $0x1f8] sm:$0xff] }
 0x27a   : > { %v3935_v38 = vsel %vm1039_vm4, %v3895_v35, %v3875_v34  ;;  %v4195_v46 = vrot.slane %v3840_v44, 1  ;;  %v4355_v55 = vrot.slane %v3840_v44, 2  ;;  %v4215_v13 = vrot.slane %v3841_v32, 1  ;;  %6556 = vmatprep.subr.mxu0 %v5520_v4 }
 0x27b   : > { %v4478_v41 = vmax.f32 %v4318_v21, %v4394_v53  ;;  %v3960_v22 = vsel %vm601_vm0, %v3935_v38, -inf  ;;  %v4095_v57 = vsel %vm1268_vm5, %v4055_v2, %v4035_v15  ;;  %v4479_v37 = vmax.f32 %v4319_v48, %v4439_v23  ;;  %6557 = vmatpush3.msra.mxu0 %v5520_v4 }
 0x27c   : > { %v9231_v31 = vpop.f32.mrf.mxu1  ;;  %v4000_v30 = vmax.f32 %v3840_v44, %v3960_v22  ;;  %v4120_v39 = vsel %vm609_vm1, %v4095_v57, -inf  ;;  %v4375_v60 = vrot.slane %v3841_v32, 2  ;;  %v4235_v21 = vsel %vm1497_vm6, %v4195_v46, %v4215_v13  ;;  %6558 = vmatprep.subr.mxu0 %v5519_v20 }
 0x27d   : > { %10981 = vst [vmem:[#allocation40_spill] sm:$0xff] %v9231_v31  ;;  %v3727_v18 = vmax.f32 %v9231_v31, %v9148_v52  ;;  %v3805_v53 = vmax.f32 %v9214_v8, %v9231_v31  ;;  %6508 = vmatprep.mubr.f32.mxu1 %v4478_v41  ;;  %v3915_v38 = vsel %vm1039_vm4, %v3875_v34, %v3895_v35 }
 0x27e   : > { %v9244_v48 = vmax.f32 %v3803_v51, %v9231_v31  ;;  %v9246_v44 = vpop.f32.mrf.mxu1  ;;  %6509 = vmatmul.mubr.f32.gmra.mxu1 %v4479_v37  ;;  %v4160_v23 = vmax.f32 %v4000_v30, %v4120_v39  ;;  %v4395_v22 = vsel %vm1726_vm7, %v4355_v55, %v4375_v60  ;;  %v4001_v57 = vmax.f32 %v3841_v32, %v3915_v38  ;;  %v5518_v39 = vld [vmem:[#allocation8 + $0x1e8] sm:$0xff] }
 0x27f   : > { %10982 = vst [vmem:[#allocation41_spill] sm:$0xff] %v9246_v44  ;;  %v3726_v8 = vmax.f32 %v9246_v44, %v9163_v7  ;;  %v3804_v41 = vmax.f32 %v9219_v61, %v9246_v44  ;;  %v3842_v34 = vmax.f32 %v3802_v58, %v9246_v44  ;;  %v4075_v51 = vsel %vm1268_vm5, %v4035_v15, %v4055_v2 }
 0x280   : > { %v4320_v35 = vmax.f32 %v4160_v23, %v4235_v21  ;;  %v4161_v37 = vmax.f32 %v4001_v57, %v4075_v51  ;;  %v4255_v30 = vsel %vm1497_vm6, %v4215_v13, %v4195_v46  ;;  %v4415_v32 = vsel %vm1726_vm7, %v4375_v60, %v4355_v55  ;;  %6559 = vmatpush3.msra.mxu0 %v5519_v20  ;;  %v5517_v55 = vld [vmem:[#allocation8 + $0x1e0] sm:$0xff]  ;;  %v5516_v20 = vld [vmem:[#allocation8 + $0x1d8] sm:$0xff] }
 0x281   : > { %v9262_v38 = vmax.f32 %v3727_v18, %v9185_v62  ;;  %v9265_v61 = vmax.f32 %v3726_v8, %v9200_v25  ;;  %v4281_v15 = vsel %vm620_vm2, %v4255_v30, -inf  ;;  %v3876_v58 = vrot.slane %v3842_v34, 6  ;;  %6560 = vmatprep.subr.mxu0 %v5518_v39 }
 0x282   : > { %v4480_v2 = vmax.f32 %v4320_v35, %v4395_v22  ;;  %v4321_v21 = vmax.f32 %v4161_v37, %v4281_v15  ;;  %v3896_v46 = vrot.slane %v9244_v48, 6  ;;  %v4036_v13 = vrot.slane %v3842_v34, 7  ;;  %6561 = vmatpush3.msra.mxu0 %v5518_v39 }
 0x283   : > { %v4441_v60 = vsel %vm628_vm3, %v4415_v32, -inf  ;;  %v4056_v4 = vrot.slane %v9244_v48, 7  ;;  %v4196_v18 = vrot.slane %v3842_v34, 1  ;;  %v4356_v23 = vrot.slane %v3842_v34, 2  ;;  %6562 = vmatprep.subr.mxu0 %v5517_v55 }
 0x284   : > { %6511 = vmatprep.mubr.f32.mxu1 %v4480_v2  ;;  %v4481_v57 = vmax.f32 %v4321_v21, %v4441_v60  ;;  %v3936_v8 = vsel %vm1039_vm4, %v3896_v46, %v3876_v58  ;;  %v4216_v22 = vrot.slane %v9244_v48, 1  ;;  %v3916_v51 = vsel %vm1039_vm4, %v3876_v58, %v3896_v46  ;;  %6563 = vmatpush3.msra.mxu0 %v5517_v55  ;;  %v5515_v46 = vld [vmem:[#allocation8 + $0x1d0] sm:$0xff] }
 0x285   : > { %v3962_v35 = vsel %vm601_vm0, %v3936_v8, -inf  ;;  %v4096_v37 = vsel %vm1268_vm5, %v4056_v4, %v4036_v13  ;;  %v4376_v30 = vrot.slane %v9244_v48, 2  ;;  %v4003_v32 = vmax.f32 %v9244_v48, %v3916_v51  ;;  %6564 = vmatprep.subr.mxu0 %v5516_v20 }
 0x286   : > { %v9284_v15 = vpop.f32.mrf.mxu1  ;;  %6512 = vmatmul.mubr.f32.gmra.mxu1 %v4481_v57  ;;  %v4002_v2 = vmax.f32 %v3842_v34, %v3962_v35  ;;  %v4122_v58 = vsel %vm609_vm1, %v4096_v37, -inf  ;;  %v4236_v39 = vsel %vm1497_vm6, %v4196_v18, %v4216_v22  ;;  %v4076_v21 = vsel %vm1268_vm5, %v4036_v13, %v4056_v4  ;;  %6565 = vmatpush3.msra.mxu0 %v5516_v20  ;;  %v5513_v20 = vld [vmem:[#allocation8 + $0x1c0] sm:$0xff] }
 0x287   : > { %10983 = vst [vmem:[#allocation42_spill] sm:$0xff] %v9284_v15  ;;  %v3729_v60 = vmax.f32 %v9284_v15, %v9185_v62  ;;  %v9295_v48 = vmax.f32 %v3805_v53, %v9284_v15  ;;  %v4396_v34 = vsel %vm1726_vm7, %v4356_v23, %v4376_v30  ;;  %v4163_v57 = vmax.f32 %v4003_v32, %v4076_v21  ;;  %v5514_v53 = vld [vmem:[#allocation8 + $0x1c8] sm:$0xff] }
 0x288   : > { %v3807_v8 = vmax.f32 %v9262_v38, %v9284_v15  ;;  %v9301_v51 = vpop.f32.mrf.mxu1  ;;  %v4162_v35 = vmax.f32 %v4002_v2, %v4122_v58  ;;  %v4256_v13 = vsel %vm1497_vm6, %v4216_v22, %v4196_v18  ;;  %v4416_v55 = vsel %vm1726_vm7, %v4376_v30, %v4356_v23  ;;  %6566 = vmatprep.subr.mxu0 %v5515_v46 }
 0x289   : > { %10984 = vst [vmem:[#allocation43_spill] sm:$0xff] %v9301_v51  ;;  %v3728_v4 = vmax.f32 %v9301_v51, %v9200_v25  ;;  %v3806_v37 = vmax.f32 %v9265_v61, %v9301_v51  ;;  %v3844_v32 = vmax.f32 %v3804_v41, %v9301_v51  ;;  %v9313_v38 = vmax.f32 %v3729_v60, %v9231_v31 }
 0x28a   : > { %v4322_v2 = vmax.f32 %v4162_v35, %v4236_v39  ;;  %v4283_v18 = vsel %vm620_vm2, %v4256_v13, -inf  ;;  %v4443_v23 = vsel %vm628_vm3, %v4416_v55, -inf  ;;  %v3897_v22 = vrot.slane %v9295_v48, 6  ;;  %6567 = vmatpush3.msra.mxu0 %v5515_v46 }
 0x28b   : > { %v9321_v30 = vmax.f32 %v3728_v4, %v9246_v44  ;;  %v4323_v61 = vmax.f32 %v4163_v57, %v4283_v18  ;;  %v3877_v41 = vrot.slane %v3844_v32, 6  ;;  %v4037_v58 = vrot.slane %v3844_v32, 7  ;;  %6568 = vmatprep.subr.mxu0 %v5514_v53  ;;  %v5512_v4 = vld [vmem:[#allocation8 + $0x1b8] sm:$0xff] }
 0x28c   : > { %v4482_v21 = vmax.f32 %v4322_v2, %v4396_v34  ;;  %v4057_v39 = vrot.slane %v9295_v48, 7  ;;  %v4197_v60 = vrot.slane %v3844_v32, 1  ;;  %v4217_v35 = vrot.slane %v9295_v48, 1  ;;  %6569 = vmatpush3.msra.mxu0 %v5514_v53 }
 0x28d   : > { %v4483_v13 = vmax.f32 %v4323_v61, %v4443_v23  ;;  %v3937_v55 = vsel %vm1039_vm4, %v3897_v22, %v3877_v41  ;;  %v4357_v46 = vrot.slane %v3844_v32, 2  ;;  %v4377_v36 = vrot.slane %v9295_v48, 2  ;;  %6570 = vmatprep.subr.mxu0 %v5513_v20 }
 0x28e   : > { %6514 = vmatprep.mubr.f32.mxu1 %v4482_v21  ;;  %v3964_v34 = vsel %vm601_vm0, %v3937_v55, -inf  ;;  %v4097_v2 = vsel %vm1268_vm5, %v4057_v39, %v4037_v58  ;;  %v4237_v53 = vsel %vm1497_vm6, %v4197_v60, %v4217_v35  ;;  %v3917_v18 = vsel %vm1039_vm4, %v3877_v41, %v3897_v22  ;;  %6571 = vmatpush3.msra.mxu0 %v5513_v20 }
 0x28f   : > { %v9328_v57 = vpop.f32.mrf.mxu1  ;;  %6515 = vmatmul.mubr.f32.gmra.mxu1 %v4483_v13  ;;  %v4004_v55 = vmax.f32 %v3844_v32, %v3964_v34  ;;  %v4124_v16 = vsel %vm609_vm1, %v4097_v2, -inf  ;;  %v4397_v22 = vsel %vm1726_vm7, %v4357_v46, %v4377_v36  ;;  %v4005_v20 = vmax.f32 %v9295_v48, %v3917_v18  ;;  %6572 = vmatprep.subr.mxu0 %v5512_v4  ;;  %v5510_v34 = vld [vmem:[#allocation8 + $0x1a8] sm:$0xff] }
 0x290   : > { %10985 = vst [vmem:[#allocation44_spill] sm:$0xff] %v9328_v57  ;;  %v3731_v23 = vmax.f32 %v9328_v57, %v9231_v31  ;;  %v3809_v61 = vmax.f32 %v9313_v38, %v9328_v57  ;;  %v9343_v21 = vmax.f32 %v3807_v8, %v9328_v57  ;;  %v4077_v41 = vsel %vm1268_vm5, %v4037_v58, %v4057_v39 }
 0x291   : > { %v9345_v3 = vpop.f32.mrf.mxu1  ;;  %6573 = vmatpush3.msra.mxu0 %v5512_v4  ;;  %v4164_v2 = vmax.f32 %v4004_v55, %v4124_v16  ;;  %v4165_v19 = vmax.f32 %v4005_v20, %v4077_v41  ;;  %v4257_v48 = vsel %vm1497_vm6, %v4217_v35, %v4197_v60  ;;  %v4417_v58 = vsel %vm1726_vm7, %v4377_v36, %v4357_v46 }
 0x292   : > { %10986 = vst [vmem:[#allocation45_spill] sm:$0xff] %v9345_v3  ;;  %v3730_v8 = vmax.f32 %v9345_v3, %v9246_v44  ;;  %v3808_v32 = vmax.f32 %v9321_v30, %v9345_v3  ;;  %v3846_v38 = vmax.f32 %v3806_v37, %v9345_v3  ;;  %v9360_v13 = vmax.f32 %v3731_v23, %v9284_v15 }
 0x293   : > { %6574 = vmatprep.subr.mxu0 %v5511_v47  ;;  %v4285_v37 = vsel %vm620_vm2, %v4257_v48, -inf  ;;  %v4445_v30 = vsel %vm628_vm3, %v4417_v58, -inf  ;;  %v4324_v16 = vmax.f32 %v4164_v2, %v4237_v53  ;;  %v3898_v23 = vrot.slane %v9343_v21, 6  ;;  %v5509_v53 = vld [vmem:[#allocation8 + $0x1a0] sm:$0xff] }
 0x294   : > { %v9367_v39 = vmax.f32 %v3730_v8, %v9301_v51  ;;  %v3878_v4 = vrot.slane %v3846_v38, 6  ;;  %6575 = vmatpush3.msra.mxu0 %v5511_v47  ;;  %v4325_v18 = vmax.f32 %v4165_v19, %v4285_v37  ;;  %v4038_v60 = vrot.slane %v3846_v38, 7 }
 0x295   : > { %6576 = vmatprep.subr.mxu0 %v5510_v34  ;;  %v4058_v36 = vrot.slane %v9343_v21, 7  ;;  %v4198_v35 = vrot.slane %v3846_v38, 1  ;;  %v4218_v46 = vrot.slane %v9343_v21, 1  ;;  %v4358_v55 = vrot.slane %v3846_v38, 2 }
 0x296   : > { %6577 = vmatpush3.msra.mxu0 %v5510_v34  ;;  %v4484_v20 = vmax.f32 %v4324_v16, %v4397_v22  ;;  %v4485_v41 = vmax.f32 %v4325_v18, %v4445_v30  ;;  %v3938_v8 = vsel %vm1039_vm4, %v3898_v23, %v3878_v4  ;;  %v4378_v47 = vrot.slane %v9343_v21, 2 }
 0x297   : > { %v9379_v19 = vpop.f32.mrf.mxu1  ;;  %v3966_v2 = vsel %vm601_vm0, %v3938_v8, -inf  ;;  %v4098_v48 = vsel %vm1268_vm5, %v4058_v36, %v4038_v60  ;;  %v4238_v58 = vsel %vm1497_vm6, %v4198_v35, %v4218_v46  ;;  %v3918_v22 = vsel %vm1039_vm4, %v3878_v4, %v3898_v23  ;;  %6578 = vmatprep.subr.mxu0 %v5509_v53 }
 0x298   : > { %10987 = vst [vmem:[#allocation46_spill] sm:$0xff] %v9379_v19  ;;  %v3733_v34 = vmax.f32 %v9379_v19, %v9284_v15  ;;  %v3811_v37 = vmax.f32 %v9360_v13, %v9379_v19  ;;  %v9394_v30 = vmax.f32 %v3809_v61, %v9379_v19  ;;  %6517 = vmatprep.mubr.f32.mxu1 %v4484_v20  ;;  %v4126_v8 = vsel %vm609_vm1, %v4098_v48, -inf }
 0x299   : > { %v4006_v16 = vmax.f32 %v3846_v38, %v3966_v2  ;;  %v9396_v18 = vpop.f32.mrf.mxu1  ;;  %6518 = vmatmul.mubr.f32.gmra.mxu1 %v4485_v41  ;;  %v4398_v4 = vsel %vm1726_vm7, %v4358_v55, %v4378_v47  ;;  %v4007_v23 = vmax.f32 %v9343_v21, %v3918_v22  ;;  %v4078_v15 = vsel %vm1268_vm5, %v4038_v60, %v4058_v36 }
 0x29a   : > { %10988 = vst [vmem:[#allocation47_spill] sm:$0xff] %v9396_v18  ;;  %6579 = vmatpush3.msra.mxu0 %v5509_v53  ;;  %v3732_v61 = vmax.f32 %v9396_v18, %v9301_v51  ;;  %v3810_v38 = vmax.f32 %v9367_v39, %v9396_v18  ;;  %v3848_v13 = vmax.f32 %v3808_v32, %v9396_v18  ;;  %v5508_v51 = vld [vmem:[#allocation8 + $0x198] sm:$0xff] }
 0x29b   : > { %v3773_v20 = vmax.f32 %v3733_v34, %v9328_v57  ;;  %v4166_v41 = vmax.f32 %v4006_v16, %v4126_v8  ;;  %v4167_v2 = vmax.f32 %v4007_v23, %v4078_v15  ;;  %v4258_v48 = vsel %vm1497_vm6, %v4218_v46, %v4198_v35  ;;  %6580 = vmatprep.subr.mxu0 %v5508_v51 }
 0x29c   : > { %v4418_v21 = vsel %vm1726_vm7, %v4378_v47, %v4358_v55  ;;  %v3772_v60 = vmax.f32 %v3732_v61, %v9345_v3  ;;  %v4287_v36 = vsel %vm620_vm2, %v4258_v48, -inf  ;;  %v3879_v53 = vrot.slane %v3848_v13, 6  ;;  %6581 = vmatpush3.msra.mxu0 %v5508_v51 }
 0x29d   : > { %v4447_v39 = vsel %vm628_vm3, %v4418_v21, -inf  ;;  %v4326_v32 = vmax.f32 %v4166_v41, %v4238_v58  ;;  %v4327_v22 = vmax.f32 %v4167_v2, %v4287_v36  ;;  %v3899_v34 = vrot.slane %v9394_v30, 6 }
 0x29e   : > { %v4039_v15 = vrot.slane %v3848_v13, 7  ;;  %v9421_v16 = vpop.f32.mrf.mxu1  ;;  %v4059_v35 = vrot.slane %v9394_v30, 7  ;;  %v4199_v46 = vrot.slane %v3848_v13, 1  ;;  %v4219_v55 = vrot.slane %v9394_v30, 1 }
 0x29f   : > { %10989 = vst [vmem:[#allocation48_spill] sm:$0xff] %v9421_v16  ;;  %v4359_v47 = vrot.slane %v3848_v13, 2  ;;  %v3735_v8 = vmax.f32 %v9421_v16, %v9328_v57  ;;  %v3813_v23 = vmax.f32 %v3773_v20, %v9421_v16  ;;  %v9429_v61 = vmax.f32 %v3811_v37, %v9421_v16 }
 0x2a0   : > { %v4486_v58 = vmax.f32 %v4326_v32, %v4398_v4  ;;  %v9431_v41 = vpop.f32.mrf.mxu1  ;;  %v4487_v2 = vmax.f32 %v4327_v22, %v4447_v39  ;;  %v3939_v48 = vsel %vm1039_vm4, %v3899_v34, %v3879_v53  ;;  %v4099_v21 = vsel %vm1268_vm5, %v4059_v35, %v4039_v15 }
 0x2a1   : > { %10990 = vst [vmem:[#allocation49_spill] sm:$0xff] %v9431_v41  ;;  %v4239_v36 = vsel %vm1497_vm6, %v4199_v46, %v4219_v55  ;;  %v3734_v57 = vmax.f32 %v9431_v41, %v9345_v3  ;;  %v3812_v20 = vmax.f32 %v3772_v60, %v9431_v41  ;;  %v9443_v37 = vmax.f32 %v3810_v38, %v9431_v41 }
 0x2a2   : > { %v3775_v4 = vmax.f32 %v3735_v8, %v9379_v19  ;;  %6520 = vmatprep.mubr.f32.mxu1 %v4486_v58  ;;  %v3968_v39 = vsel %vm601_vm0, %v3939_v48, -inf  ;;  %v4128_v32 = vsel %vm609_vm1, %v4099_v21, -inf  ;;  %v4379_v22 = vrot.slane %v9394_v30, 2 }
 0x2a3   : > { %6521 = vmatmul.mubr.f32.gmra.mxu1 %v4487_v2  ;;  %v3919_v3 = vsel %vm1039_vm4, %v3879_v53, %v3899_v34  ;;  %v3774_v60 = vmax.f32 %v3734_v57, %v9396_v18  ;;  %v4008_v38 = vmax.f32 %v3848_v13, %v3968_v39  ;;  %v4079_v8 = vsel %vm1268_vm5, %v4039_v15, %v4059_v35 }
 0x2a4   : > { %v4009_v44 = vmax.f32 %v9394_v30, %v3919_v3  ;;  %v4399_v58 = vsel %vm1726_vm7, %v4359_v47, %v4379_v22  ;;  %v4259_v2 = vsel %vm1497_vm6, %v4219_v55, %v4199_v46  ;;  %v4419_v48 = vsel %vm1726_vm7, %v4379_v22, %v4359_v47 }
 0x2a5   : > { %v3880_v53 = vrot.slane %v9443_v37, 6  ;;  %v9464_v57 = vpop.f32.mrf.mxu1  ;;  %v4168_v13 = vmax.f32 %v4008_v38, %v4128_v32  ;;  %v4289_v30 = vsel %vm620_vm2, %v4259_v2, -inf  ;;  %v4449_v34 = vsel %vm628_vm3, %v4419_v48, -inf }
 0x2a6   : > { %10991 = vst [vmem:[#allocation50_spill] sm:$0xff] %v9464_v57  ;;  %v4169_v3 = vmax.f32 %v4009_v44, %v4079_v8  ;;  %v3737_v15 = vmax.f32 %v9464_v57, %v9379_v19  ;;  %v3815_v35 = vmax.f32 %v3775_v4, %v9464_v57  ;;  %v9474_v46 = vmax.f32 %v3813_v23, %v9464_v57 }
 0x2a7   : > { %v3900_v51 = vrot.slane %v9429_v61, 6  ;;  %v9477_v55 = vpop.f32.mrf.mxu1  ;;  %v4328_v47 = vmax.f32 %v4168_v13, %v4239_v36  ;;  %v4040_v21 = vrot.slane %v9443_v37, 7  ;;  %v4060_v39 = vrot.slane %v9429_v61, 7 }
 0x2a8   : > { %10992 = vst [vmem:[#allocation51_spill] sm:$0xff] %v9477_v55  ;;  %v4329_v44 = vmax.f32 %v4169_v3, %v4289_v30  ;;  %v3736_v32 = vmax.f32 %v9477_v55, %v9396_v18  ;;  %v3814_v22 = vmax.f32 %v3774_v60, %v9477_v55  ;;  %v9485_v4 = vmax.f32 %v3812_v20, %v9477_v55 }
 0x2a9   : > { %v9488_v23 = vmax.f32 %v3737_v15, %v9421_v16  ;;  %v4488_v38 = vmax.f32 %v4328_v47, %v4399_v58  ;;  %v3940_v36 = vsel %vm1039_vm4, %v3900_v51, %v3880_v53  ;;  %v4100_v2 = vsel %vm1268_vm5, %v4060_v39, %v4040_v21 }
 0x2aa   : > { %v4489_v8 = vmax.f32 %v4329_v44, %v4449_v34  ;;  %v9495_v48 = vmax.f32 %v3736_v32, %v9431_v41  ;;  %v3970_v60 = vsel %vm601_vm0, %v3940_v36, -inf  ;;  %v4130_v20 = vsel %vm609_vm1, %v4100_v2, -inf }
 0x2ab   : > { %v4200_v13 = vrot.slane %v9443_v37, 1  ;;  %6523 = vmatprep.mubr.f32.mxu1 %v4488_v38  ;;  %v4010_v58 = vmax.f32 %v9443_v37, %v3970_v60  ;;  %v4220_v3 = vrot.slane %v9429_v61, 1  ;;  %v4360_v30 = vrot.slane %v9443_v37, 2 }
 0x2ac   : > { %v4380_v34 = vrot.slane %v9429_v61, 2  ;;  %6524 = vmatmul.mubr.f32.gmra.mxu1 %v4489_v8  ;;  %v3920_v47 = vsel %vm1039_vm4, %v3880_v53, %v3900_v51  ;;  %v4080_v44 = vsel %vm1268_vm5, %v4040_v21, %v4060_v39  ;;  %v3881_v32 = vrot.slane %v9485_v4, 6 }
 0x2ad   : > { %v9506_v15 = vpop.f32.mrf.mxu1  ;;  %v3901_v38 = vrot.slane %v9474_v46, 6  ;;  %v4170_v8 = vmax.f32 %v4010_v58, %v4130_v20  ;;  %v4240_v53 = vsel %vm1497_vm6, %v4200_v13, %v4220_v3  ;;  %v4011_v21 = vmax.f32 %v9429_v61, %v3920_v47 }
 0x2ae   : > { %10993 = vst [vmem:[#allocation52_spill] sm:$0xff] %v9506_v15  ;;  %v3739_v36 = vmax.f32 %v9506_v15, %v9421_v16  ;;  %v3817_v37 = vmax.f32 %v9488_v23, %v9506_v15  ;;  %v9519_v2 = vmax.f32 %v3815_v35, %v9506_v15  ;;  %v4400_v51 = vsel %vm1726_vm7, %v4360_v30, %v4380_v34 }
 0x2af   : > { %v9521_v60 = vpop.f32.mrf.mxu1  ;;  %v4260_v39 = vsel %vm1497_vm6, %v4220_v3, %v4200_v13  ;;  %v4330_v16 = vmax.f32 %v4170_v8, %v4240_v53  ;;  %v4171_v18 = vmax.f32 %v4011_v21, %v4080_v44  ;;  %v4420_v61 = vsel %vm1726_vm7, %v4380_v34, %v4360_v30 }
 0x2b0   : > { %10994 = vst [vmem:[#allocation53_spill] sm:$0xff] %v9521_v60  ;;  %v3738_v23 = vmax.f32 %v9521_v60, %v9431_v41  ;;  %v3816_v35 = vmax.f32 %v9495_v48, %v9521_v60  ;;  %v9535_v20 = vmax.f32 %v3814_v22, %v9521_v60  ;;  %v3779_v58 = vmax.f32 %v3739_v36, %v9464_v57 }
 0x2b1   : > { %v4291_v19 = vsel %vm620_vm2, %v4260_v39, -inf  ;;  %v4451_v3 = vsel %vm628_vm3, %v4420_v61, -inf  ;;  %v3941_v22 = vsel %vm1039_vm4, %v3901_v38, %v3881_v32  ;;  %v4041_v48 = vrot.slane %v9485_v4, 7 }
 0x2b2   : > { %v9543_v13 = vmax.f32 %v3738_v23, %v9477_v55  ;;  %v4490_v47 = vmax.f32 %v4330_v16, %v4400_v51  ;;  %v4331_v36 = vmax.f32 %v4171_v18, %v4291_v19  ;;  %v3972_v44 = vsel %vm601_vm0, %v3941_v22, -inf  ;;  %v5507_v22 = vld [vmem:[#allocation8 + $0x190] sm:$0xff] }
 0x2b3   : > { %v4061_v8 = vrot.slane %v9474_v46, 7  ;;  %v4012_v30 = vmax.f32 %v9485_v4, %v3972_v44  ;;  %v4201_v34 = vrot.slane %v9485_v4, 1  ;;  %v4221_v53 = vrot.slane %v9474_v46, 1  ;;  %6582 = vmatprep.subr.mxu0 %v5507_v22 }
 0x2b4   : > { %v4361_v21 = vrot.slane %v9485_v4, 2  ;;  %6526 = vmatprep.mubr.f32.mxu1 %v4490_v47  ;;  %v4491_v39 = vmax.f32 %v4331_v36, %v4451_v3  ;;  %v4381_v19 = vrot.slane %v9474_v46, 2  ;;  %v3921_v18 = vsel %vm1039_vm4, %v3881_v32, %v3901_v38  ;;  %6583 = vmatpush3.msra.mxu0 %v5507_v22 }
 0x2b5   : > { %v4101_v23 = vsel %vm1268_vm5, %v4061_v8, %v4041_v48  ;;  %v4241_v61 = vsel %vm1497_vm6, %v4201_v34, %v4221_v53  ;;  %v4013_v4 = vmax.f32 %v9474_v46, %v3921_v18  ;;  %v4081_v3 = vsel %vm1268_vm5, %v4041_v48, %v4061_v8 }
 0x2b6   : > { %v4132_v51 = vsel %vm609_vm1, %v4101_v23, -inf  ;;  %6527 = vmatmul.mubr.f32.gmra.mxu1 %v4491_v39  ;;  %v4401_v23 = vsel %vm1726_vm7, %v4361_v21, %v4381_v19  ;;  %v4261_v48 = vsel %vm1497_vm6, %v4221_v53, %v4201_v34  ;;  %v4421_v8 = vsel %vm1726_vm7, %v4381_v19, %v4361_v21 }
 0x2b7   : > { %v9562_v16 = vpop.f32.mrf.mxu1  ;;  %v4172_v38 = vmax.f32 %v4012_v30, %v4132_v51  ;;  %v4173_v46 = vmax.f32 %v4013_v4, %v4081_v3  ;;  %v4293_v34 = vsel %vm620_vm2, %v4261_v48, -inf  ;;  %v4453_v53 = vsel %vm628_vm3, %v4421_v8, -inf }
 0x2b8   : > { %10995 = vst [vmem:[#allocation54_spill] sm:$0xff] %v9562_v16  ;;  %v3741_v47 = vmax.f32 %v9562_v16, %v9464_v57  ;;  %v3819_v36 = vmax.f32 %v3779_v58, %v9562_v16  ;;  %v9575_v32 = vmax.f32 %v3817_v37, %v9562_v16  ;;  %v3882_v21 = vrot.slane %v9535_v20, 6 }
 0x2b9   : > { %v9577_v44 = vpop.f32.mrf.mxu1  ;;  %v4332_v18 = vmax.f32 %v4172_v38, %v4241_v61  ;;  %v4042_v51 = vrot.slane %v9535_v20, 7  ;;  %v4062_v61 = vrot.slane %v9519_v2, 7  ;;  %v4202_v22 = vrot.slane %v9535_v20, 1 }
 0x2ba   : > { %10996 = vst [vmem:[#allocation55_spill] sm:$0xff] %v9577_v44  ;;  %v3740_v58 = vmax.f32 %v9577_v44, %v9477_v55  ;;  %v3818_v37 = vmax.f32 %v9543_v13, %v9577_v44  ;;  %v9590_v30 = vmax.f32 %v3816_v35, %v9577_v44  ;;  %v9593_v39 = vmax.f32 %v3741_v47, %v9506_v15 }
 0x2bb   : > { %v4333_v13 = vmax.f32 %v4173_v46, %v4293_v34  ;;  %v3902_v35 = vrot.slane %v9519_v2, 6  ;;  %v4492_v3 = vmax.f32 %v4332_v18, %v4401_v23  ;;  %v4222_v47 = vrot.slane %v9519_v2, 1 }
 0x2bc   : > { %v9601_v19 = vmax.f32 %v3740_v58, %v9521_v60  ;;  %v9605_v4 = vpop.f32.mrf.mxu1  ;;  %v4102_v18 = vsel %vm1268_vm5, %v4062_v61, %v4042_v51  ;;  %v4382_v57 = vrot.slane %v9519_v2, 2 }
 0x2bd   : > { %10997 = vst [vmem:[#allocation56_spill] sm:$0xff] %v9605_v4  ;;  %v3743_v38 = vmax.f32 %v9605_v4, %v9506_v15  ;;  %v9615_v46 = vmax.f32 %v3819_v36, %v9605_v4  ;;  %v4493_v8 = vmax.f32 %v4333_v13, %v4453_v53  ;;  %6529 = vmatprep.mubr.f32.mxu1 %v4492_v3  ;;  %v4362_v15 = vrot.slane %v9535_v20, 2 }
 0x2be   : > { %v9617_v58 = vpop.f32.mrf.mxu1  ;;  %v3942_v23 = vsel %vm1039_vm4, %v3902_v35, %v3882_v21  ;;  %v4242_v34 = vsel %vm1497_vm6, %v4202_v22, %v4222_v47  ;;  %v4134_v55 = vsel %vm609_vm1, %v4102_v18, -inf  ;;  %v4262_v18 = vsel %vm1497_vm6, %v4222_v47, %v4202_v22 }
 0x2bf   : > { %10998 = vst [vmem:[#allocation57_spill] sm:$0xff] %v9617_v58  ;;  %v9627_v48 = vmax.f32 %v3743_v38, %v9562_v16  ;;  %v3742_v36 = vmax.f32 %v9617_v58, %v9521_v60  ;;  %v9634_v13 = vmax.f32 %v3818_v37, %v9617_v58  ;;  %6530 = vmatmul.mubr.f32.gmra.mxu1 %v4493_v8  ;;  %v3974_v3 = vsel %vm601_vm0, %v3942_v23, -inf }
 0x2c0   : > { %v3922_v38 = vsel %vm1039_vm4, %v3882_v21, %v3902_v35  ;;  %v4014_v53 = vmax.f32 %v9535_v20, %v3974_v3  ;;  %v4082_v8 = vsel %vm1268_vm5, %v4042_v51, %v4062_v61  ;;  %v4402_v23 = vsel %vm1726_vm7, %v4362_v15, %v4382_v57  ;;  %v5506_v35 = vld [vmem:[#allocation8 + $0x188] sm:$0xff] }
 0x2c1   : > { %v9644_v60 = vmax.f32 %v3742_v36, %v9577_v44  ;;  %v4015_v37 = vmax.f32 %v9519_v2, %v3922_v38  ;;  %v4422_v41 = vsel %vm1726_vm7, %v4382_v57, %v4362_v15  ;;  %v3883_v21 = vrot.slane %v9590_v30, 6  ;;  %6584 = vmatprep.subr.mxu0 %v5506_v35 }
 0x2c2   : > { %v4174_v36 = vmax.f32 %v4014_v53, %v4134_v55  ;;  %v4295_v2 = vsel %vm620_vm2, %v4262_v18, -inf  ;;  %v4455_v20 = vsel %vm628_vm3, %v4422_v41, -inf  ;;  %v3903_v51 = vrot.slane %v9575_v32, 6  ;;  %6585 = vmatpush3.msra.mxu0 %v5506_v35 }
 0x2c3   : > { %v4175_v31 = vmax.f32 %v4015_v37, %v4082_v8  ;;  %v4043_v61 = vrot.slane %v9590_v30, 7  ;;  %v4063_v22 = vrot.slane %v9575_v32, 7  ;;  %v4203_v57 = vrot.slane %v9590_v30, 1 }
 0x2c4   : > { %v4334_v15 = vmax.f32 %v4174_v36, %v4242_v34  ;;  %v4223_v55 = vrot.slane %v9575_v32, 1  ;;  %v4363_v53 = vrot.slane %v9590_v30, 2  ;;  %v3943_v41 = vsel %vm1039_vm4, %v3903_v51, %v3883_v21 }
 0x2c5   : > { %v4335_v47 = vmax.f32 %v4175_v31, %v4295_v2  ;;  %v4103_v38 = vsel %vm1268_vm5, %v4063_v22, %v4043_v61  ;;  %v4383_v37 = vrot.slane %v9575_v32, 2  ;;  %v3923_v8 = vsel %vm1039_vm4, %v3883_v21, %v3903_v51 }
 0x2c6   : > { %v9667_v3 = vpop.f32.mrf.mxu1  ;;  %v4494_v18 = vmax.f32 %v4334_v15, %v4402_v23  ;;  %v3976_v31 = vsel %vm601_vm0, %v3943_v41, -inf  ;;  %v4136_v35 = vsel %vm609_vm1, %v4103_v38, -inf  ;;  %v4243_v63 = vsel %vm1497_vm6, %v4203_v57, %v4223_v55 }
 0x2c7   : > { %10999 = vst [vmem:[#allocation58_spill] sm:$0xff] %v9667_v3  ;;  %v4495_v34 = vmax.f32 %v4335_v47, %v4455_v20  ;;  %v4016_v2 = vmax.f32 %v9590_v30, %v3976_v31  ;;  %v4403_v25 = vsel %vm1726_vm7, %v4363_v53, %v4383_v37  ;;  %v4017_v21 = vmax.f32 %v9575_v32, %v3923_v8 }
 0x2c8   : > { %v9680_v36 = vpop.f32.mrf.mxu1  ;;  %6532 = vmatprep.mubr.f32.mxu1 %v4494_v18  ;;  %v4083_v23 = vsel %vm1268_vm5, %v4043_v61, %v4063_v22  ;;  %v4263_v20 = vsel %vm1497_vm6, %v4223_v55, %v4203_v57  ;;  %v4423_v51 = vsel %vm1726_vm7, %v4383_v37, %v4363_v53  ;;  %v3884_v30 = vrot.slane %v9634_v13, 6 }
 0x2c9   : > { %11000 = vst [vmem:[#allocation59_spill] sm:$0xff] %v9680_v36  ;;  %6533 = vmatmul.mubr.f32.gmra.mxu1 %v4495_v34  ;;  %v4176_v15 = vmax.f32 %v4016_v2, %v4136_v35  ;;  %v4177_v47 = vmax.f32 %v4017_v21, %v4083_v23  ;;  %v4297_v41 = vsel %vm620_vm2, %v4263_v20, -inf  ;;  %v4457_v32 = vsel %vm628_vm3, %v4423_v51, -inf }
 0x2ca   : > { %v3904_v38 = vrot.slane %v9615_v46, 6  ;;  %v4044_v61 = vrot.slane %v9634_v13, 7  ;;  %v4064_v22 = vrot.slane %v9615_v46, 7  ;;  %v4204_v57 = vrot.slane %v9634_v13, 1 }
 0x2cb   : > { %v4336_v53 = vmax.f32 %v4176_v15, %v4243_v63  ;;  %v4337_v37 = vmax.f32 %v4177_v47, %v4297_v41  ;;  %v4224_v8 = vrot.slane %v9615_v46, 1  ;;  %v4364_v18 = vrot.slane %v9634_v13, 2 }
 0x2cc   : > { %v6454_v55 = vpop.f32.mrf.mxu1  ;;  %v3944_v34 = vsel %vm1039_vm4, %v3904_v38, %v3884_v30  ;;  %v4104_v31 = vsel %vm1268_vm5, %v4064_v22, %v4044_v61  ;;  %v4384_v35 = vrot.slane %v9615_v46, 2  ;;  %v3924_v2 = vsel %vm1039_vm4, %v3884_v30, %v3904_v38 }
 0x2cd   : > { %v4496_v23 = vmax.f32 %v4336_v53, %v4403_v25  ;;  %v4497_v20 = vmax.f32 %v4337_v37, %v4457_v32  ;;  %v3978_v63 = vsel %vm601_vm0, %v3944_v34, -inf  ;;  %v4138_v51 = vsel %vm609_vm1, %v4104_v31, -inf }
 0x2ce   : > { %v3591_v21 = vpop.f32.mrf.mxu1  ;;  %v4018_v15 = vmax.f32 %v9634_v13, %v3978_v63  ;;  %v4244_v47 = vsel %vm1497_vm6, %v4204_v57, %v4224_v8  ;;  %v4404_v41 = vsel %vm1726_vm7, %v4364_v18, %v4384_v35  ;;  %v4019_v55 = vmax.f32 %v9615_v46, %v3924_v2 }
 0x2cf   : > { %6535 = vmatprep.mubr.f32.mxu1 %v4496_v23  ;;  %v4084_v25 = vsel %vm1268_vm5, %v4044_v61, %v4064_v22  ;;  %v4264_v30 = vsel %vm1497_vm6, %v4224_v8, %v4204_v57  ;;  %v4424_v32 = vsel %vm1726_vm7, %v4384_v35, %v4364_v18  ;;  %v11001_v13 = vmax.f32 %v9601_v19, %v9617_v58  ;;  %v5505_v23 = vld [vmem:[#allocation8 + $0x180] sm:$0xff] }
 0x2d0   : > { %6536 = vmatmul.mubr.f32.gmra.mxu1 %v4497_v20  ;;  %v4178_v53 = vmax.f32 %v4018_v15, %v4138_v51  ;;  %v4179_v37 = vmax.f32 %v4019_v55, %v4084_v25  ;;  %v4299_v46 = vsel %vm620_vm2, %v4264_v30, -inf  ;;  %v4459_v61 = vsel %vm628_vm3, %v4424_v32, -inf  ;;  %6586 = vmatprep.subr.mxu0 %v5505_v23 }
 0x2d1   : > { %v3860_v38 = vmax.f32 %v11001_v13, %v9680_v36  ;;  %v11002_v22 = vmax.f32 %v9593_v39, %v9605_v4  ;;  %v3822_v21 = vmax.f32 %v9644_v60, %v9680_v36  ;;  %v3823_v30 = vmax.f32 %v9627_v48, %v9667_v3  ;;  %6587 = vmatpush3.msra.mxu0 %v5505_v23 }
 0x2d2   : > { %v4338_v19 = vmax.f32 %v4178_v53, %v4244_v47  ;;  %v4339_v35 = vmax.f32 %v4179_v37, %v4299_v46 }
 0x2d3   : > { %v3861_v57 = vmax.f32 %v11002_v22, %v9667_v3  ;;  %v3885_v8 = vrot.slane %v3860_v38, 6  ;;  %v4045_v18 = vrot.slane %v3860_v38, 7  ;;  %v4205_v34 = vrot.slane %v3860_v38, 1  ;;  %v6457_v31 = vpop.f32.mrf.mxu1 }
 0x2d4   : > { %v4365_v2 = vrot.slane %v3860_v38, 2  ;;  %v4498_v25 = vmax.f32 %v4338_v19, %v4404_v41  ;;  %v4499_v39 = vmax.f32 %v4339_v35, %v4459_v61  ;;  %v3886_v32 = vrot.slane %v3822_v21, 6 }
 0x2d5   : > { %v3905_v20 = vrot.slane %v3861_v57, 6  ;;  %v4065_v63 = vrot.slane %v3861_v57, 7  ;;  %v4225_v51 = vrot.slane %v3861_v57, 1  ;;  %v4385_v15 = vrot.slane %v3861_v57, 2  ;;  %v3601_v55 = vpop.f32.mrf.mxu1 }
 0x2d6   : > { %6538 = vmatprep.mubr.f32.mxu1 %v4498_v25 }
 0x2d7   : > { %v3945_v47 = vsel %vm1039_vm4, %v3905_v20, %v3885_v8  ;;  %v4105_v60 = vsel %vm1268_vm5, %v4065_v63, %v4045_v18  ;;  %v4245_v13 = vsel %vm1497_vm6, %v4205_v34, %v4225_v51  ;;  %v4405_v53 = vsel %vm1726_vm7, %v4365_v2, %v4385_v15  ;;  %v6460_v61 = vpop.f32.mrf.mxu1  ;;  %6539 = vmatmul.mubr.f32.gmra.mxu1 %v4499_v39 }
 0x2d8   : > { %v3980_v41 = vsel %vm601_vm0, %v3945_v47, -inf  ;;  %v4140_v48 = vsel %vm609_vm1, %v4105_v60, -inf  ;;  %v3925_v37 = vsel %vm1039_vm4, %v3885_v8, %v3905_v20  ;;  %v4085_v46 = vsel %vm1268_vm5, %v4045_v18, %v4065_v63 }
 0x2d9   : > { %v4020_v22 = vmax.f32 %v3860_v38, %v3980_v41  ;;  %v4021_v31 = vmax.f32 %v3861_v57, %v3925_v37  ;;  %v4265_v19 = vsel %vm1497_vm6, %v4225_v51, %v4205_v34  ;;  %v4425_v35 = vsel %vm1726_vm7, %v4385_v15, %v4365_v2  ;;  %v3611_v25 = vpop.f32.mrf.mxu1 }
 0x2da   : > { %v4301_v23 = vsel %vm620_vm2, %v4265_v19, -inf  ;;  %v4461_v55 = vsel %vm628_vm3, %v4425_v35, -inf  ;;  %v3906_v8 = vrot.slane %v3823_v30, 6  ;;  %v4046_v20 = vrot.slane %v3822_v21, 7 }
 0x2db   : > { %v4180_v18 = vmax.f32 %v4020_v22, %v4140_v48  ;;  %v4181_v63 = vmax.f32 %v4021_v31, %v4085_v46  ;;  %v4066_v39 = vrot.slane %v3823_v30, 7  ;;  %v4206_v38 = vrot.slane %v3822_v21, 1  ;;  %v6463_v2 = vpop.f32.mrf.mxu1 }
 0x2dc   : > { %v3946_v57 = vsel %vm1039_vm4, %v3906_v8, %v3886_v32  ;;  %v4226_v34 = vrot.slane %v3823_v30, 1  ;;  %v4366_v51 = vrot.slane %v3822_v21, 2  ;;  %v4386_v47 = vrot.slane %v3823_v30, 2 }
 0x2dd   : > { %v4340_v15 = vmax.f32 %v4180_v18, %v4245_v13  ;;  %v4341_v60 = vmax.f32 %v4181_v63, %v4301_v23  ;;  %v3982_v41 = vsel %vm601_vm0, %v3946_v57, -inf  ;;  %v4106_v37 = vsel %vm1268_vm5, %v4066_v39, %v4046_v20  ;;  %v3621_v31 = vpop.f32.mrf.mxu1 }
 0x2de   : > { %v4022_v61 = vmax.f32 %v3822_v21, %v3982_v41  ;;  %v4142_v48 = vsel %vm609_vm1, %v4106_v37, -inf  ;;  %v4246_v46 = vsel %vm1497_vm6, %v4206_v38, %v4226_v34  ;;  %v4406_v22 = vsel %vm1726_vm7, %v4366_v51, %v4386_v47 }
 0x2df   : > { %v4500_v19 = vmax.f32 %v4340_v15, %v4405_v53  ;;  %v4501_v13 = vmax.f32 %v4341_v60, %v4461_v55  ;;  %v3926_v35 = vsel %vm1039_vm4, %v3886_v32, %v3906_v8  ;;  %v4086_v23 = vsel %vm1268_vm5, %v4046_v20, %v4066_v39 }
 0x2e0   : > { %v4182_v25 = vmax.f32 %v4022_v61, %v4142_v48  ;;  %v4023_v21 = vmax.f32 %v3823_v30, %v3926_v35  ;;  %v4266_v18 = vsel %vm1497_vm6, %v4226_v34, %v4206_v38  ;;  %v4426_v63 = vsel %vm1726_vm7, %v4386_v47, %v4366_v51 }
 0x2e1   : > { %6541 = vmatprep.mubr.f32.mxu1 %v4500_v19  ;;  %v4303_v57 = vsel %vm620_vm2, %v4266_v18, -inf  ;;  %v4463_v53 = vsel %vm628_vm3, %v4426_v63, -inf  ;;  %v3744_v32 = vmax.f32 %v9680_v36, %v9577_v44  ;;  %v3745_v55 = vmax.f32 %v9667_v3, %v9562_v16 }
 0x2e2   : > { %6542 = vmatmul.mubr.f32.gmra.mxu1 %v4501_v13  ;;  %v4342_v30 = vmax.f32 %v4182_v25, %v4246_v46  ;;  %v4183_v8 = vmax.f32 %v4023_v21, %v4086_v23  ;;  %v3786_v20 = vmax.f32 %v9617_v58, %v9680_v36  ;;  %v9800_v39 = vmax.f32 %v9605_v4, %v9667_v3 }
 0x2e3   : > { %v3784_v38 = vmax.f32 %v3744_v32, %v9617_v58  ;;  %v3785_v34 = vmax.f32 %v3745_v55, %v9605_v4  ;;  %v3889_v51 = vrot.slane %v9680_v36, 6  ;;  %v3909_v47 = vrot.slane %v9667_v3, 6 }
 0x2e4   : > { %v4502_v2 = vmax.f32 %v4342_v30, %v4406_v22  ;;  %v4343_v15 = vmax.f32 %v4183_v8, %v4303_v57  ;;  %v3888_v60 = vrot.slane %v3786_v20, 6  ;;  %v3908_v41 = vrot.slane %v9800_v39, 6 }
 0x2e5   : > { %v3887_v37 = vrot.slane %v3784_v38, 6  ;;  %v3907_v61 = vrot.slane %v3785_v34, 6  ;;  %v4047_v48 = vrot.slane %v3784_v38, 7  ;;  %v4067_v46 = vrot.slane %v3785_v34, 7 }
 0x2e6   : > { %6544 = vmatprep.mubr.f32.mxu1 %v4502_v2  ;;  %v4503_v31 = vmax.f32 %v4343_v15, %v4463_v53  ;;  %v4207_v19 = vrot.slane %v3784_v38, 1  ;;  %v4227_v13 = vrot.slane %v3785_v34, 1  ;;  %v4367_v35 = vrot.slane %v3784_v38, 2 }
 0x2e7   : > { %v3947_v23 = vsel %vm1039_vm4, %v3907_v61, %v3887_v37  ;;  %v4107_v25 = vsel %vm1268_vm5, %v4067_v46, %v4047_v48  ;;  %v4387_v22 = vrot.slane %v3785_v34, 2  ;;  %v3927_v21 = vsel %vm1039_vm4, %v3887_v37, %v3907_v61 }
 0x2e8   : > { %6545 = vmatmul.mubr.f32.gmra.mxu1 %v4503_v31  ;;  %v3984_v18 = vsel %vm601_vm0, %v3947_v23, -inf  ;;  %v4144_v63 = vsel %vm609_vm1, %v4107_v25, -inf  ;;  %v4247_v57 = vsel %vm1497_vm6, %v4207_v19, %v4227_v13  ;;  %v4025_v53 = vmax.f32 %v3785_v34, %v3927_v21 }
 0x2e9   : > { %v4024_v32 = vmax.f32 %v3784_v38, %v3984_v18  ;;  %v4407_v55 = vsel %vm1726_vm7, %v4367_v35, %v4387_v22  ;;  %v4087_v30 = vsel %vm1268_vm5, %v4047_v48, %v4067_v46  ;;  %v4267_v8 = vsel %vm1497_vm6, %v4227_v13, %v4207_v19 }
 0x2ea   : > { %v4185_v2 = vmax.f32 %v4025_v53, %v4087_v30  ;;  %v4305_v15 = vsel %vm620_vm2, %v4267_v8, -inf  ;;  %v4427_v37 = vsel %vm1726_vm7, %v4387_v22, %v4367_v35  ;;  %v3948_v34 = vsel %vm1039_vm4, %v3908_v41, %v3888_v60 }
 0x2eb   : > { %v4184_v38 = vmax.f32 %v4024_v32, %v4144_v63  ;;  %v4465_v61 = vsel %vm628_vm3, %v4427_v37, -inf  ;;  %v3986_v48 = vsel %vm601_vm0, %v3948_v34, -inf  ;;  %v4048_v46 = vrot.slane %v3786_v20, 7 }
 0x2ec   : > { %v4345_v31 = vmax.f32 %v4185_v2, %v4305_v15  ;;  %v4026_v19 = vmax.f32 %v3786_v20, %v3986_v48  ;;  %v4068_v13 = vrot.slane %v9800_v39, 7  ;;  %v4208_v23 = vrot.slane %v3786_v20, 1 }
 0x2ed   : > { %v4344_v25 = vmax.f32 %v4184_v38, %v4247_v57  ;;  %v4228_v21 = vrot.slane %v9800_v39, 1  ;;  %v4368_v35 = vrot.slane %v3786_v20, 2  ;;  %v4388_v22 = vrot.slane %v9800_v39, 2 }
 0x2ee   : > { %v4505_v18 = vmax.f32 %v4345_v31, %v4465_v61  ;;  %v4108_v63 = vsel %vm1268_vm5, %v4068_v13, %v4048_v46  ;;  %v3928_v53 = vsel %vm1039_vm4, %v3888_v60, %v3908_v41  ;;  %v4088_v32 = vsel %vm1268_vm5, %v4048_v46, %v4068_v13 }
 0x2ef   : > { %v4504_v30 = vmax.f32 %v4344_v25, %v4407_v55  ;;  %v4146_v8 = vsel %vm609_vm1, %v4108_v63, -inf  ;;  %v4248_v57 = vsel %vm1497_vm6, %v4208_v23, %v4228_v21  ;;  %v4408_v20 = vsel %vm1726_vm7, %v4368_v35, %v4388_v22 }
 0x2f0   : > { %v4186_v2 = vmax.f32 %v4026_v19, %v4146_v8  ;;  %v4027_v15 = vmax.f32 %v9800_v39, %v3928_v53  ;;  %v4268_v37 = vsel %vm1497_vm6, %v4228_v21, %v4208_v23  ;;  %v4428_v60 = vsel %vm1726_vm7, %v4388_v22, %v4368_v35 }
 0x2f1   : > { %6547 = vmatprep.mubr.f32.mxu1 %v4504_v30  ;;  %v4307_v41 = vsel %vm620_vm2, %v4268_v37, -inf  ;;  %v4467_v55 = vsel %vm628_vm3, %v4428_v60, -inf  ;;  %v3949_v39 = vsel %vm1039_vm4, %v3909_v47, %v3889_v51  ;;  %v4049_v34 = vrot.slane %v9680_v36, 7  ;;  %v6726_v37 = vld [vmem:[%s7177_s9 + $0xe0] sm:$0xff]  ;;  %v9897_v60 = vld [vmem:[%s7177_s9 + $0xf0] sm:$0xff] }
 0x2f2   : > { %6548 = vmatmul.mubr.f32.gmra.mxu1 %v4505_v18  ;;  %v4346_v38 = vmax.f32 %v4186_v2, %v4248_v57  ;;  %v4187_v61 = vmax.f32 %v4027_v15, %v4088_v32  ;;  %v3988_v48 = vsel %vm601_vm0, %v3949_v39, -inf  ;;  %v4069_v46 = vrot.slane %v9667_v3, 7 }
 0x2f3   : > { %v4028_v31 = vmax.f32 %v9680_v36, %v3988_v48  ;;  %v4209_v19 = vrot.slane %v9680_v36, 1  ;;  %v4229_v13 = vrot.slane %v9667_v3, 1  ;;  %v4369_v23 = vrot.slane %v9680_v36, 2 }
 0x2f4   : > { %v4506_v25 = vmax.f32 %v4346_v38, %v4408_v20  ;;  %v4347_v21 = vmax.f32 %v4187_v61, %v4307_v41  ;;  %v4109_v35 = vsel %vm1268_vm5, %v4069_v46, %v4049_v34  ;;  %v4389_v22 = vrot.slane %v9667_v3, 2  ;;  %v9902_v41 = vld [vmem:[%s7177_s9 + $0xf8] sm:$0xff] }
 0x2f5   : > { %v4148_v18 = vsel %vm609_vm1, %v4109_v35, -inf  ;;  %v4249_v63 = vsel %vm1497_vm6, %v4209_v19, %v4229_v13  ;;  %v3929_v53 = vsel %vm1039_vm4, %v3889_v51, %v3909_v47  ;;  %v4089_v32 = vsel %vm1268_vm5, %v4049_v34, %v4069_v46  ;;  %v6728_v47 = vld [vmem:[%s7177_s9 + $0xe8] sm:$0xff] }
 0x2f6   : > { %6550 = vmatprep.mubr.f32.mxu1 %v4506_v25  ;;  %v4507_v30 = vmax.f32 %v4347_v21, %v4467_v55  ;;  %v4188_v8 = vmax.f32 %v4028_v31, %v4148_v18  ;;  %v4409_v57 = vsel %vm1726_vm7, %v4369_v23, %v4389_v22  ;;  %v4029_v20 = vmax.f32 %v9667_v3, %v3929_v53 }
 0x2f7   : > { %v4269_v2 = vsel %vm1497_vm6, %v4229_v13, %v4209_v19  ;;  %v4429_v15 = vsel %vm1726_vm7, %v4389_v22, %v4369_v23  ;;  %v859_v51 = vmax.f32 %v6726_v37, %v9897_v60  ;;  %v860_v55 = vmax.f32 %v6728_v47, %v9902_v41 }
 0x2f8   : > { %6551 = vmatmul.mubr.f32.gmra.mxu1 %v4507_v30  ;;  %v4348_v39 = vmax.f32 %v4188_v8, %v4249_v63  ;;  %v4189_v34 = vmax.f32 %v4029_v20, %v4089_v32  ;;  %v4309_v38 = vsel %vm620_vm2, %v4269_v2, -inf  ;;  %v4469_v61 = vsel %vm628_vm3, %v4429_v15, -inf }
 0x2f9   : > { %v1005_v48 = vrot.slane %v859_v51, 6  ;;  %v1033_v46 = vrot.slane %v860_v55, 6  ;;  %v1234_v31 = vrot.slane %v859_v51, 7  ;;  %v1262_v19 = vrot.slane %v860_v55, 7 }
 0x2fa   : > { %v4508_v13 = vmax.f32 %v4348_v39, %v4409_v57  ;;  %v4349_v23 = vmax.f32 %v4189_v34, %v4309_v38  ;;  %v1463_v25 = vrot.slane %v859_v51, 1  ;;  %v1491_v21 = vrot.slane %v860_v55, 1 }
 0x2fb   : > { %v1090_v35 = vsel %vm1039_vm4, %v1033_v46, %v1005_v48  ;;  %v1319_v22 = vsel %vm1268_vm5, %v1262_v19, %v1234_v31  ;;  %v1692_v18 = vrot.slane %v859_v51, 2  ;;  %v1720_v63 = vrot.slane %v860_v55, 2 }
 0x2fc   : > { %6553 = vmatprep.mubr.f32.mxu1 %v4508_v13  ;;  %v4509_v53 = vmax.f32 %v4349_v23, %v4469_v61  ;;  %v1144_v32 = vsel %vm601_vm0, %v1090_v35, -inf  ;;  %v1373_v30 = vsel %vm609_vm1, %v1319_v22, -inf  ;;  %v1520_v8 = vsel %vm1497_vm6, %v1463_v25, %v1491_v21 }
 0x2fd   : > { %v1200_v57 = vmax.f32 %v859_v51, %v1144_v32  ;;  %v1749_v20 = vsel %vm1726_vm7, %v1692_v18, %v1720_v63  ;;  %v1062_v2 = vsel %vm1039_vm4, %v1005_v48, %v1033_v46  ;;  %v1291_v15 = vsel %vm1268_vm5, %v1234_v31, %v1262_v19 }
 0x2fe   : > { %6554 = vmatmul.mubr.f32.gmra.mxu1 %v4509_v53  ;;  %v1201_v37 = vmax.f32 %v860_v55, %v1062_v2  ;;  %v1548_v47 = vsel %vm1497_vm6, %v1491_v21, %v1463_v25  ;;  %v1777_v39 = vsel %vm1726_vm7, %v1720_v63, %v1692_v18  ;;  %v1006_v34 = vrot.slane %v9897_v60, 6 }
 0x2ff   : > { %v1429_v51 = vmax.f32 %v1200_v57, %v1373_v30  ;;  %v1603_v38 = vsel %vm620_vm2, %v1548_v47, -inf  ;;  %v1832_v61 = vsel %vm628_vm3, %v1777_v39, -inf  ;;  %v1034_v48 = vrot.slane %v9902_v41, 6 }
 0x300   : > { %v1430_v46 = vmax.f32 %v1201_v37, %v1291_v15  ;;  %v1235_v55 = vrot.slane %v9897_v60, 7  ;;  %v1263_v31 = vrot.slane %v9902_v41, 7  ;;  %v1464_v19 = vrot.slane %v9897_v60, 1 }
 0x301   : > { %v1658_v13 = vmax.f32 %v1429_v51, %v1520_v8  ;;  %v1091_v23 = vsel %vm1039_vm4, %v1034_v48, %v1006_v34  ;;  %v1492_v25 = vrot.slane %v9902_v41, 1  ;;  %v1693_v21 = vrot.slane %v9897_v60, 2 }
 0x302   : > { %v1659_v35 = vmax.f32 %v1430_v46, %v1603_v38  ;;  %v1146_v22 = vsel %vm601_vm0, %v1091_v23, -inf  ;;  %v1320_v18 = vsel %vm1268_vm5, %v1263_v31, %v1235_v55  ;;  %v1721_v63 = vrot.slane %v9902_v41, 2 }
 0x303   : > { %v1887_v53 = vmax.f32 %v1658_v13, %v1749_v20  ;;  %v1202_v32 = vmax.f32 %v9897_v60, %v1146_v22  ;;  %v1375_v30 = vsel %vm609_vm1, %v1320_v18, -inf  ;;  %v1521_v57 = vsel %vm1497_vm6, %v1464_v19, %v1492_v25 }
 0x304   : > { %v1888_v8 = vmax.f32 %v1659_v35, %v1832_v61  ;;  %v1063_v2 = vsel %vm1039_vm4, %v1006_v34, %v1034_v48  ;;  %v1292_v15 = vsel %vm1268_vm5, %v1235_v55, %v1263_v31  ;;  %v1549_v60 = vsel %vm1497_vm6, %v1492_v25, %v1464_v19 }
 0x305   : > { %6342 = vmatprep.mubr.f32.mxu0 %v1887_v53  ;;  %v1431_v37 = vmax.f32 %v1202_v32, %v1375_v30  ;;  %v1203_v47 = vmax.f32 %v9902_v41, %v1063_v2  ;;  %v1778_v20 = vsel %vm1726_vm7, %v1721_v63, %v1693_v21  ;;  %v1750_v39 = vsel %vm1726_vm7, %v1693_v21, %v1721_v63  ;;  %v6730_v63 = vld [vmem:[%s7177_s9 + $0x18] sm:$0xff] }
 0x306   : > { %6343 = vmatmul.mubr.f32.gmra.mxu0 %v1888_v8  ;;  %v1605_v34 = vsel %vm620_vm2, %v1549_v60, -inf  ;;  %v1834_v61 = vsel %vm628_vm3, %v1778_v20, -inf  ;;  %v2263_v53 = vadd.f32 %v6730_v63, %v7996_v49 }
 0x307   : > { %v1660_v51 = vmax.f32 %v1431_v37, %v1521_v57  ;;  %v1432_v38 = vmax.f32 %v1203_v47, %v1292_v15 }
 0x309   : > { %v1889_v48 = vmax.f32 %v1660_v51, %v1750_v39  ;;  %v1661_v41 = vmax.f32 %v1432_v38, %v1605_v34 }
 0x30b   : > { %6345 = vmatprep.mubr.f32.mxu0 %v1889_v48  ;;  %v1890_v46 = vmax.f32 %v1661_v41, %v1834_v61 }
 0x30d   : > { %6346 = vmatmul.mubr.f32.gmra.mxu0 %v1890_v46 }
 0x30e   : > { %6348 = vmatprep.mubr.f32.mxu0 %v7216_v24 }
 0x311   : > { %6349 = vmatmul.mubr.f32.gmra.mxu0 %v7224_v28 }
 0x312   : > { %6351 = vmatprep.mubr.f32.mxu0 %v7216_v24 }
 0x315   : > { %6352 = vmatmul.mubr.f32.gmra.mxu0 %v7224_v28 }
 0x316   : > { %6354 = vmatprep.mubr.f32.mxu0 %v7216_v24  ;;  %v6498_v55 = vpop.f32.mrf.mxu1 }
 0x318   : > { %v4593_v31 = vpop.f32.mrf.mxu1 }
 0x319   : > { %6355 = vmatmul.mubr.f32.gmra.mxu0 %v7224_v28 }
 0x31a   : > { %6357 = vmatprep.mubr.f32.mxu0 %v7216_v24 }
 0x31d   : > { %6358 = vmatmul.mubr.f32.gmra.mxu0 %v7224_v28  ;;  %v3633_v28 = vadd.f32 %v9035_v50, %v2263_v53 }
 0x321   : > { %v6501_v19 = vpop.f32.mrf.mxu1 }
 0x323   : > { %v4603_v13 = vpop.f32.mrf.mxu1 }
 0x32a   : > { %v6504_v23 = vpop.f32.mrf.mxu1 }
 0x32b   : > { %v9976_v25 = vadd.f32 %v6504_v23, %v9005_v0 }
 0x32c   : > { %v4613_v21 = vpop.f32.mrf.mxu1 }
 0x32d   : > { %v9979_v35 = vadd.f32 %v4613_v21, %v9014_v42 }
 0x334   : > { %v9981_v22 = vpop.f32.mrf.mxu1 }
 0x335   : > { %v4929_v24 = vmax.f32 %v6504_v23, %v9981_v22  ;;  %v9994_v42 = vadd.f32 %v9981_v22, %v3633_v28  ;;  %v4899_v2 = vmax.f32 %v9981_v22, %v6504_v23 }
 0x336   : > { %v9983_v18 = vpop.f32.mrf.mxu1 }
 0x337   : > { %v4928_v0 = vmax.f32 %v4613_v21, %v9983_v18  ;;  %v4898_v49 = vmax.f32 %v9983_v18, %v4613_v21 }
 0x33e   : > { %v9989_v32 = vpop.f32.mrf.mxu1 }
 0x33f   : > { %v4961_v30 = vmax.f32 %v4929_v24, %v9989_v32  ;;  %v4869_v47 = vmax.f32 %v9989_v32, %v6504_v23  ;;  %v4931_v34 = vmax.f32 %v4899_v2, %v9989_v32 }
 0x340   : > { %v9996_v8 = vpop.f32.mrf.mxu1 }
 0x341   : > { %v4960_v57 = vmax.f32 %v4928_v0, %v9996_v8  ;;  %v5008_v37 = vrot.slane %v4961_v30, 6  ;;  %v4868_v60 = vmax.f32 %v9996_v8, %v4613_v21  ;;  %v5136_v20 = vrot.slane %v4961_v30, 7 }
 0x342   : > { %v5264_v55 = vrot.slane %v4961_v30, 1  ;;  %v4930_v19 = vmax.f32 %v4898_v49, %v9996_v8  ;;  %v5392_v21 = vrot.slane %v4961_v30, 2  ;;  %v4901_v63 = vmax.f32 %v4869_v47, %v9981_v22 }
 0x343   : > { %v4992_v15 = vrot.slane %v4960_v57, 6  ;;  %v5120_v50 = vrot.slane %v4960_v57, 7  ;;  %v5248_v39 = vrot.slane %v4960_v57, 1  ;;  %v5376_v38 = vrot.slane %v4960_v57, 2 }
 0x344   : > { %v4900_v24 = vmax.f32 %v4868_v60, %v9983_v18 }
 0x345   : > { %v5040_v51 = vsel %vm1039_vm4, %v5008_v37, %v4992_v15  ;;  %v5024_v61 = vsel %vm1039_vm4, %v4992_v15, %v5008_v37  ;;  %v5168_v46 = vsel %vm1268_vm5, %v5136_v20, %v5120_v50  ;;  %v5280_v28 = vsel %vm1497_vm6, %v5248_v39, %v5264_v55 }
 0x346   : > { %v10008_v48 = vpop.f32.mrf.mxu1  ;;  %v5056_v41 = vsel %vm601_vm0, %v5040_v51, -inf  ;;  %v5089_v31 = vmax.f32 %v4961_v30, %v5024_v61  ;;  %v5296_v0 = vsel %vm1497_vm6, %v5264_v55, %v5248_v39  ;;  %v5184_v49 = vsel %vm609_vm1, %v5168_v46, -inf }
 0x347   : > { %v4963_v13 = vmax.f32 %v4931_v34, %v10008_v48  ;;  %v5088_v23 = vmax.f32 %v4960_v57, %v5056_v41  ;;  %v5408_v30 = vsel %vm1726_vm7, %v5376_v38, %v5392_v21  ;;  %v5152_v57 = vsel %vm1268_vm5, %v5120_v50, %v5136_v20 }
 0x348   : > { %v10017_v53 = vpop.f32.mrf.mxu1  ;;  %v4871_v15 = vmax.f32 %v10008_v48, %v9981_v22  ;;  %v5217_v47 = vmax.f32 %v5089_v31, %v5152_v57  ;;  %v5424_v60 = vsel %vm1726_vm7, %v5392_v21, %v5376_v38  ;;  %v5313_v39 = vsel %vm620_vm2, %v5296_v0, -inf }
 0x349   : > { %v4962_v2 = vmax.f32 %v4930_v19, %v10017_v53  ;;  %v5216_v37 = vmax.f32 %v5088_v23, %v5184_v49  ;;  %v5009_v51 = vrot.slane %v4963_v13, 6  ;;  %v4933_v41 = vmax.f32 %v4901_v63, %v10008_v48 }
 0x34a   : > { %v5345_v55 = vmax.f32 %v5217_v47, %v5313_v39  ;;  %v5137_v19 = vrot.slane %v4963_v13, 7  ;;  %v4870_v50 = vmax.f32 %v10017_v53, %v9983_v18  ;;  %v4932_v22 = vmax.f32 %v4900_v24, %v10017_v53 }
 0x34b   : > { %v4993_v34 = vrot.slane %v4962_v2, 6  ;;  %v5121_v61 = vrot.slane %v4962_v2, 7  ;;  %v5344_v46 = vmax.f32 %v5216_v37, %v5280_v28  ;;  %v5249_v38 = vrot.slane %v4962_v2, 1 }
 0x34c   : > { %v5441_v23 = vsel %vm628_vm3, %v5424_v60, -inf  ;;  %v5265_v57 = vrot.slane %v4963_v13, 1  ;;  %v5377_v24 = vrot.slane %v4962_v2, 2  ;;  %v4903_v37 = vmax.f32 %v4871_v15, %v9989_v32 }
 0x34d   : > { %v5041_v20 = vsel %vm1039_vm4, %v5009_v51, %v4993_v34  ;;  %v5472_v31 = vmax.f32 %v5344_v46, %v5408_v30  ;;  %v5169_v63 = vsel %vm1268_vm5, %v5137_v19, %v5121_v61  ;;  %v5473_v0 = vmax.f32 %v5345_v55, %v5441_v23 }
 0x34e   : > { %v5058_v21 = vsel %vm601_vm0, %v5041_v20, -inf  ;;  %v5186_v30 = vsel %vm609_vm1, %v5169_v63, -inf  ;;  %v5025_v60 = vsel %vm1039_vm4, %v4993_v34, %v5009_v51  ;;  %v5393_v20 = vrot.slane %v4963_v13, 2 }
 0x34f   : > { %v10049_v28 = vpop.f32.mrf.mxu1  ;;  %v5090_v49 = vmax.f32 %v4962_v2, %v5058_v21  ;;  %6588 = vmatprep.mubr.f32.mxu0 %v5472_v31  ;;  %v5091_v55 = vmax.f32 %v4963_v13, %v5025_v60  ;;  %v5297_v2 = vsel %vm1497_vm6, %v5265_v57, %v5249_v38  ;;  %v4902_v15 = vmax.f32 %v4870_v50, %v9996_v8 }
 0x350   : > { %v4965_v47 = vmax.f32 %v4933_v41, %v10049_v28  ;;  %6589 = vmatmul.mubr.f32.vlgmr.msra.gmra.mxu0 %v5473_v0  ;;  %v5281_v31 = vsel %vm1497_vm6, %v5249_v38, %v5265_v57  ;;  %v5153_v23 = vsel %vm1268_vm5, %v5121_v61, %v5137_v19  ;;  %v5409_v51 = vsel %vm1726_vm7, %v5377_v24, %v5393_v20 }
 0x351   : > { %v10057_v39 = vpop.f32.mrf.mxu1  ;;  %v5218_v46 = vmax.f32 %v5090_v49, %v5186_v30  ;;  %v5219_v21 = vmax.f32 %v5091_v55, %v5153_v23  ;;  %v5425_v13 = vsel %vm1726_vm7, %v5393_v20, %v5377_v24  ;;  %v4873_v63 = vmax.f32 %v10049_v28, %v9989_v32 }
 0x352   : > { %v4964_v41 = vmax.f32 %v4932_v22, %v10057_v39  ;;  %v5315_v50 = vsel %vm620_vm2, %v5297_v2, -inf  ;;  %v5010_v0 = vrot.slane %v4965_v47, 6  ;;  %v5138_v61 = vrot.slane %v4965_v47, 7 }
 0x353   : > { %v5346_v34 = vmax.f32 %v5218_v46, %v5281_v31  ;;  %v5347_v49 = vmax.f32 %v5219_v21, %v5315_v50  ;;  %v4872_v19 = vmax.f32 %v10057_v39, %v9996_v8  ;;  %v5443_v30 = vsel %vm628_vm3, %v5425_v13, -inf }
 0x354   : > { %v4994_v22 = vrot.slane %v4964_v41, 6  ;;  %v5122_v57 = vrot.slane %v4964_v41, 7  ;;  %v5250_v60 = vrot.slane %v4964_v41, 1  ;;  %v5266_v2 = vrot.slane %v4965_v47, 1 }
 0x355   : > { %v5474_v38 = vmax.f32 %v5346_v34, %v5409_v51  ;;  %v5475_v46 = vmax.f32 %v5347_v49, %v5443_v30  ;;  %v4935_v31 = vmax.f32 %v4903_v37, %v10049_v28  ;;  %v5378_v34 = vrot.slane %v4964_v41, 2 }
 0x356   : > { %v5042_v24 = vsel %vm1039_vm4, %v5010_v0, %v4994_v22  ;;  %v5170_v55 = vsel %vm1268_vm5, %v5138_v61, %v5122_v57  ;;  %v5026_v51 = vsel %vm1039_vm4, %v4994_v22, %v5010_v0  ;;  %v4934_v21 = vmax.f32 %v4902_v15, %v10057_v39 }
 0x357   : > { %6591 = vmatprep.mubr.f32.mxu0 %v5474_v38  ;;  %v5060_v20 = vsel %vm601_vm0, %v5042_v24, -inf  ;;  %v5188_v50 = vsel %vm609_vm1, %v5170_v55, -inf  ;;  %v5093_v38 = vmax.f32 %v4965_v47, %v5026_v51  ;;  %v5298_v49 = vsel %vm1497_vm6, %v5266_v2, %v5250_v60 }
 0x358   : > { %v5092_v23 = vmax.f32 %v4964_v41, %v5060_v20  ;;  %6592 = vmatmul.mubr.f32.gmra.mxu0 %v5475_v46  ;;  %v5394_v24 = vrot.slane %v4965_v47, 2  ;;  %v5154_v41 = vsel %vm1268_vm5, %v5122_v57, %v5138_v61  ;;  %v4905_v22 = vmax.f32 %v4873_v63, %v10008_v48 }
 0x359   : > { %v10089_v13 = vpop.f32.mrf.mxu1  ;;  %v4904_v0 = vmax.f32 %v4872_v19, %v10017_v53  ;;  %v5221_v46 = vmax.f32 %v5093_v38, %v5154_v41  ;;  %v5282_v55 = vsel %vm1497_vm6, %v5250_v60, %v5266_v2 }
 0x35a   : > { %11003 = vst [vmem:[#allocation60_spill] sm:$0xff] %v10089_v13  ;;  %v4967_v30 = vmax.f32 %v4935_v31, %v10089_v13  ;;  %v5220_v37 = vmax.f32 %v5092_v23, %v5188_v50  ;;  %v5317_v31 = vsel %vm620_vm2, %v5298_v49, -inf  ;;  %v5426_v47 = vsel %vm1726_vm7, %v5394_v24, %v5378_v34 }
 0x35b   : > { %v10099_v15 = vpop.f32.mrf.mxu1  ;;  %v4875_v57 = vmax.f32 %v10089_v13, %v10008_v48  ;;  %v5410_v61 = vsel %vm1726_vm7, %v5378_v34, %v5394_v24  ;;  %v5349_v19 = vmax.f32 %v5221_v46, %v5317_v31  ;;  %v4937_v60 = vmax.f32 %v4905_v22, %v10089_v13 }
 0x35c   : > { %11004 = vst [vmem:[#allocation61_spill] sm:$0xff] %v10099_v15  ;;  %v4966_v20 = vmax.f32 %v4934_v21, %v10099_v15  ;;  %v5348_v63 = vmax.f32 %v5220_v37, %v5282_v55  ;;  %v5011_v51 = vrot.slane %v4967_v30, 6  ;;  %v5139_v50 = vrot.slane %v4967_v30, 7 }
 0x35d   : > { %v5445_v38 = vsel %vm628_vm3, %v5426_v47, -inf  ;;  %v4874_v41 = vmax.f32 %v10099_v15, %v10017_v53  ;;  %v5267_v22 = vrot.slane %v4967_v30, 1  ;;  %v4936_v31 = vmax.f32 %v4904_v0, %v10099_v15 }
 0x35e   : > { %v4995_v23 = vrot.slane %v4966_v20, 6  ;;  %v5123_v21 = vrot.slane %v4966_v20, 7  ;;  %v5476_v2 = vmax.f32 %v5348_v63, %v5410_v61  ;;  %v5251_v49 = vrot.slane %v4966_v20, 1 }
 0x35f   : > { %v5477_v36 = vmax.f32 %v5349_v19, %v5445_v38  ;;  %v5379_v46 = vrot.slane %v4966_v20, 2  ;;  %v5395_v61 = vrot.slane %v4967_v30, 2 }
 0x360   : > { %v5043_v37 = vsel %vm1039_vm4, %v5011_v51, %v4995_v23  ;;  %v5171_v34 = vsel %vm1268_vm5, %v5139_v50, %v5123_v21  ;;  %6594 = vmatprep.mubr.f32.mxu0 %v5476_v2  ;;  %v5027_v55 = vsel %vm1039_vm4, %v4995_v23, %v5011_v51  ;;  %v5299_v3 = vsel %vm1497_vm6, %v5267_v22, %v5251_v49 }
 0x361   : > { %v5062_v24 = vsel %vm601_vm0, %v5043_v37, -inf  ;;  %6595 = vmatmul.mubr.f32.gmra.mxu0 %v5477_v36  ;;  %v5095_v19 = vmax.f32 %v4967_v30, %v5027_v55  ;;  %v5190_v2 = vsel %vm609_vm1, %v5171_v34, -inf  ;;  %v5155_v37 = vsel %vm1268_vm5, %v5123_v21, %v5139_v50 }
 0x362   : > { %v5094_v63 = vmax.f32 %v4966_v20, %v5062_v24  ;;  %v4907_v23 = vmax.f32 %v4875_v57, %v10049_v28  ;;  %v5283_v30 = vsel %vm1497_vm6, %v5251_v49, %v5267_v22  ;;  %v5427_v21 = vsel %vm1726_vm7, %v5395_v61, %v5379_v46 }
 0x363   : > { %v10127_v47 = vpop.f32.mrf.mxu1  ;;  %v5223_v36 = vmax.f32 %v5095_v19, %v5155_v37  ;;  %v4906_v50 = vmax.f32 %v4874_v41, %v10057_v39  ;;  %v5411_v57 = vsel %vm1726_vm7, %v5379_v46, %v5395_v61 }
 0x364   : > { %11005 = vst [vmem:[#allocation62_spill] sm:$0xff] %v10127_v47  ;;  %v4969_v38 = vmax.f32 %v4937_v60, %v10127_v47  ;;  %v5222_v51 = vmax.f32 %v5094_v63, %v5190_v2  ;;  %v5319_v60 = vsel %vm620_vm2, %v5299_v3, -inf  ;;  %v4877_v49 = vmax.f32 %v10127_v47, %v10049_v28 }
 0x365   : > { %v10137_v0 = vpop.f32.mrf.mxu1  ;;  %v5351_v24 = vmax.f32 %v5223_v36, %v5319_v60  ;;  %v5447_v3 = vsel %vm628_vm3, %v5427_v21, -inf  ;;  %v4939_v21 = vmax.f32 %v4907_v23, %v10127_v47 }
 0x366   : > { %11006 = vst [vmem:[#allocation63_spill] sm:$0xff] %v10137_v0  ;;  %v4968_v20 = vmax.f32 %v4936_v31, %v10137_v0  ;;  %v5350_v34 = vmax.f32 %v5222_v51, %v5283_v30  ;;  %v5012_v63 = vrot.slane %v4969_v38, 6  ;;  %v5140_v31 = vrot.slane %v4969_v38, 7 }
 0x367   : > { %v5479_v37 = vmax.f32 %v5351_v24, %v5447_v3  ;;  %v4876_v51 = vmax.f32 %v10137_v0, %v10057_v39  ;;  %v5268_v30 = vrot.slane %v4969_v38, 1  ;;  %v4938_v3 = vmax.f32 %v4906_v50, %v10137_v0 }
 0x368   : > { %v4996_v55 = vrot.slane %v4968_v20, 6  ;;  %v5124_v19 = vrot.slane %v4968_v20, 7  ;;  %v5478_v22 = vmax.f32 %v5350_v34, %v5411_v57  ;;  %v5252_v2 = vrot.slane %v4968_v20, 1 }
 0x369   : > { %v5380_v61 = vrot.slane %v4968_v20, 2  ;;  %v5396_v57 = vrot.slane %v4969_v38, 2 }
 0x36a   : > { %v5044_v41 = vsel %vm1039_vm4, %v5012_v63, %v4996_v55  ;;  %v5172_v46 = vsel %vm1268_vm5, %v5140_v31, %v5124_v19  ;;  %6597 = vmatprep.mubr.f32.mxu0 %v5478_v22  ;;  %v5028_v60 = vsel %vm1039_vm4, %v4996_v55, %v5012_v63  ;;  %v5156_v23 = vsel %vm1268_vm5, %v5124_v19, %v5140_v31 }
 0x36b   : > { %v5064_v36 = vsel %vm601_vm0, %v5044_v41, -inf  ;;  %6598 = vmatmul.mubr.f32.gmra.mxu0 %v5479_v37  ;;  %v5097_v24 = vmax.f32 %v4969_v38, %v5028_v60  ;;  %v5192_v22 = vsel %vm609_vm1, %v5172_v46, -inf  ;;  %v5300_v41 = vsel %vm1497_vm6, %v5268_v30, %v5252_v2 }
 0x36c   : > { %v5096_v34 = vmax.f32 %v4968_v20, %v5064_v36  ;;  %v10165_v58 = vpop.f32.mrf.mxu1  ;;  %v5428_v20 = vsel %vm1726_vm7, %v5396_v57, %v5380_v61  ;;  %v4909_v38 = vmax.f32 %v4877_v49, %v10089_v13  ;;  %v4908_v55 = vmax.f32 %v4876_v51, %v10099_v15 }
 0x36d   : > { %11007 = vst [vmem:[#allocation64_spill] sm:$0xff] %v10165_v58  ;;  %v4971_v4 = vmax.f32 %v4939_v21, %v10165_v58  ;;  %v5225_v63 = vmax.f32 %v5097_v24, %v5156_v23  ;;  %v5284_v46 = vsel %vm1497_vm6, %v5252_v2, %v5268_v30  ;;  %v5412_v36 = vsel %vm1726_vm7, %v5380_v61, %v5396_v57 }
 0x36e   : > { %v5224_v44 = vmax.f32 %v5096_v34, %v5192_v22  ;;  %v10177_v50 = vpop.f32.mrf.mxu1  ;;  %v5321_v19 = vsel %vm620_vm2, %v5300_v41, -inf  ;;  %v5449_v49 = vsel %vm628_vm3, %v5428_v20, -inf  ;;  %v4941_v20 = vmax.f32 %v4909_v38, %v10165_v58 }
 0x36f   : > { %11008 = vst [vmem:[#allocation65_spill] sm:$0xff] %v10177_v50  ;;  %v4970_v37 = vmax.f32 %v4938_v3, %v10177_v50  ;;  %v5353_v60 = vmax.f32 %v5225_v63, %v5321_v19  ;;  %v5013_v21 = vrot.slane %v4971_v4, 6  ;;  %v5141_v24 = vrot.slane %v4971_v4, 7 }
 0x370   : > { %v5352_v31 = vmax.f32 %v5224_v44, %v5284_v46  ;;  %v4879_v3 = vmax.f32 %v10165_v58, %v10089_v13  ;;  %v5269_v23 = vrot.slane %v4971_v4, 1  ;;  %v4878_v63 = vmax.f32 %v10177_v50, %v10099_v15 }
 0x371   : > { %v4997_v34 = vrot.slane %v4970_v37, 6  ;;  %v5125_v51 = vrot.slane %v4970_v37, 7  ;;  %v5253_v22 = vrot.slane %v4970_v37, 1  ;;  %v5481_v30 = vmax.f32 %v5353_v60, %v5449_v49 }
 0x372   : > { %v5480_v2 = vmax.f32 %v5352_v31, %v5412_v36  ;;  %v5381_v57 = vrot.slane %v4970_v37, 2  ;;  %v5397_v31 = vrot.slane %v4971_v4, 2 }
 0x373   : > { %v5045_v61 = vsel %vm1039_vm4, %v5013_v21, %v4997_v34  ;;  %v5173_v44 = vsel %vm1268_vm5, %v5141_v24, %v5125_v51  ;;  %v5029_v41 = vsel %vm1039_vm4, %v4997_v34, %v5013_v21  ;;  %v5157_v60 = vsel %vm1268_vm5, %v5125_v51, %v5141_v24 }
 0x374   : > { %6600 = vmatprep.mubr.f32.mxu0 %v5480_v2  ;;  %v5066_v46 = vsel %vm601_vm0, %v5045_v61, -inf  ;;  %v5099_v36 = vmax.f32 %v4971_v4, %v5029_v41  ;;  %v5301_v49 = vsel %vm1497_vm6, %v5269_v23, %v5253_v22  ;;  %v4940_v21 = vmax.f32 %v4908_v55, %v10177_v50 }
 0x375   : > { %6601 = vmatmul.mubr.f32.gmra.mxu0 %v5481_v30  ;;  %v5098_v19 = vmax.f32 %v4970_v37, %v5066_v46  ;;  %v5194_v34 = vsel %vm609_vm1, %v5173_v44, -inf  ;;  %v5323_v4 = vsel %vm620_vm2, %v5301_v49, -inf  ;;  %v5429_v37 = vsel %vm1726_vm7, %v5397_v31, %v5381_v57 }
 0x376   : > { %v10207_v38 = vpop.f32.mrf.mxu1  ;;  %v5227_v2 = vmax.f32 %v5099_v36, %v5157_v60  ;;  %v4911_v51 = vmax.f32 %v4879_v3, %v10127_v47  ;;  %v4910_v30 = vmax.f32 %v4878_v63, %v10137_v0  ;;  %v5285_v44 = vsel %vm1497_vm6, %v5253_v22, %v5269_v23 }
 0x377   : > { %11009 = vst [vmem:[#allocation66_spill] sm:$0xff] %v10207_v38  ;;  %v4973_v61 = vmax.f32 %v4941_v20, %v10207_v38  ;;  %v5226_v41 = vmax.f32 %v5098_v19, %v5194_v34  ;;  %v5413_v20 = vsel %vm1726_vm7, %v5381_v57, %v5397_v31  ;;  %v4881_v36 = vmax.f32 %v10207_v38, %v10127_v47 }
 0x378   : > { %v10217_v24 = vpop.f32.mrf.mxu1  ;;  %v5355_v55 = vmax.f32 %v5227_v2, %v5323_v4  ;;  %v5451_v60 = vsel %vm628_vm3, %v5429_v37, -inf  ;;  %v4943_v2 = vmax.f32 %v4911_v51, %v10207_v38 }
 0x379   : > { %11010 = vst [vmem:[#allocation67_spill] sm:$0xff] %v10217_v24  ;;  %v4972_v46 = vmax.f32 %v4940_v21, %v10217_v24  ;;  %v4880_v19 = vmax.f32 %v10217_v24, %v10137_v0  ;;  %v5354_v3 = vmax.f32 %v5226_v41, %v5285_v44  ;;  %v5014_v63 = vrot.slane %v4973_v61, 6 }
 0x37a   : > { %v5142_v21 = vrot.slane %v4973_v61, 7  ;;  %v5483_v23 = vmax.f32 %v5355_v55, %v5451_v60  ;;  %v4942_v37 = vmax.f32 %v4910_v30, %v10217_v24  ;;  %v4913_v0 = vmax.f32 %v4881_v36, %v10165_v58 }
 0x37b   : > { %v4998_v49 = vrot.slane %v4972_v46, 6  ;;  %v5126_v34 = vrot.slane %v4972_v46, 7  ;;  %v5482_v22 = vmax.f32 %v5354_v3, %v5413_v20  ;;  %v5254_v4 = vrot.slane %v4972_v46, 1 }
 0x37c   : > { %v5382_v16 = vrot.slane %v4972_v46, 2  ;;  %v5270_v55 = vrot.slane %v4973_v61, 1  ;;  %v4912_v3 = vmax.f32 %v4880_v19, %v10177_v50  ;;  %v5398_v47 = vrot.slane %v4973_v61, 2 }
 0x37d   : > { %v5046_v57 = vsel %vm1039_vm4, %v5014_v63, %v4998_v49  ;;  %v5174_v31 = vsel %vm1268_vm5, %v5142_v21, %v5126_v34  ;;  %v5030_v41 = vsel %vm1039_vm4, %v4998_v49, %v5014_v63  ;;  %6603 = vmatprep.mubr.f32.mxu0 %v5482_v22  ;;  %v5158_v36 = vsel %vm1268_vm5, %v5126_v34, %v5142_v21 }
 0x37e   : > { %v5068_v51 = vsel %vm601_vm0, %v5046_v57, -inf  ;;  %6604 = vmatmul.mubr.f32.gmra.mxu0 %v5483_v23  ;;  %v5196_v30 = vsel %vm609_vm1, %v5174_v31, -inf  ;;  %v5101_v49 = vmax.f32 %v4973_v61, %v5030_v41  ;;  %v5302_v63 = vsel %vm1497_vm6, %v5270_v55, %v5254_v4 }
 0x37f   : > { %v10239_v44 = vpop.f32.mrf.mxu1  ;;  %v5100_v60 = vmax.f32 %v4972_v46, %v5068_v51  ;;  %v5286_v46 = vsel %vm1497_vm6, %v5254_v4, %v5270_v55  ;;  %v5414_v22 = vsel %vm1726_vm7, %v5382_v16, %v5398_v47  ;;  %v5430_v34 = vsel %vm1726_vm7, %v5398_v47, %v5382_v16 }
 0x380   : > { %11011 = vst [vmem:[#allocation68_spill] sm:$0xff] %v10239_v44  ;;  %v4975_v20 = vmax.f32 %v4943_v2, %v10239_v44  ;;  %v4883_v2 = vmax.f32 %v10239_v44, %v10165_v58  ;;  %v4945_v23 = vmax.f32 %v4913_v0, %v10239_v44  ;;  %v5229_v57 = vmax.f32 %v5101_v49, %v5158_v36 }
 0x381   : > { %v10246_v15 = vpop.f32.mrf.mxu1  ;;  %v5228_v61 = vmax.f32 %v5100_v60, %v5196_v30  ;;  %v5325_v21 = vsel %vm620_vm2, %v5302_v63, -inf  ;;  %v5453_v0 = vsel %vm628_vm3, %v5430_v34, -inf }
 0x382   : > { %11012 = vst [vmem:[#allocation69_spill] sm:$0xff] %v10246_v15  ;;  %v4974_v19 = vmax.f32 %v4942_v37, %v10246_v15  ;;  %v5015_v41 = vrot.slane %v4975_v20, 6  ;;  %v5357_v58 = vmax.f32 %v5229_v57, %v5325_v21  ;;  %v5143_v13 = vrot.slane %v4975_v20, 7 }
 0x383   : > { %v5356_v37 = vmax.f32 %v5228_v61, %v5286_v46  ;;  %v4882_v55 = vmax.f32 %v10246_v15, %v10177_v50  ;;  %v5271_v36 = vrot.slane %v4975_v20, 1  ;;  %v4944_v63 = vmax.f32 %v4912_v3, %v10246_v15 }
 0x384   : > { %v4999_v31 = vrot.slane %v4974_v19, 6  ;;  %v5127_v51 = vrot.slane %v4974_v19, 7  ;;  %v5255_v4 = vrot.slane %v4974_v19, 1  ;;  %v5383_v16 = vrot.slane %v4974_v19, 2 }
 0x385   : > { %v5484_v47 = vmax.f32 %v5356_v37, %v5414_v22  ;;  %v5485_v46 = vmax.f32 %v5357_v58, %v5453_v0  ;;  %v5399_v57 = vrot.slane %v4975_v20, 2  ;;  %v4915_v21 = vmax.f32 %v4883_v2, %v10207_v38 }
 0x386   : > { %v5047_v60 = vsel %vm1039_vm4, %v5015_v41, %v4999_v31  ;;  %v5175_v49 = vsel %vm1268_vm5, %v5143_v13, %v5127_v51  ;;  %v5031_v22 = vsel %vm1039_vm4, %v4999_v31, %v5015_v41  ;;  %v5303_v37 = vsel %vm1497_vm6, %v5271_v36, %v5255_v4 }
 0x387   : > { %v5070_v30 = vsel %vm601_vm0, %v5047_v60, -inf  ;;  %6606 = vmatprep.mubr.f32.mxu0 %v5484_v47  ;;  %v5198_v34 = vsel %vm609_vm1, %v5175_v49, -inf  ;;  %v4914_v50 = vmax.f32 %v4882_v55, %v10217_v24  ;;  %v5103_v3 = vmax.f32 %v4975_v20, %v5031_v22 }
 0x388   : > { %v5102_v61 = vmax.f32 %v4974_v19, %v5070_v30  ;;  %6607 = vmatmul.mubr.f32.gmra.mxu0 %v5485_v46  ;;  %v5431_v2 = vsel %vm1726_vm7, %v5399_v57, %v5383_v16  ;;  %v5287_v31 = vsel %vm1497_vm6, %v5255_v4, %v5271_v36  ;;  %v5159_v41 = vsel %vm1268_vm5, %v5127_v51, %v5143_v13 }
 0x389   : > { %v10284_v60 = vpop.f32.mrf.mxu1  ;;  %v5415_v20 = vsel %vm1726_vm7, %v5383_v16, %v5399_v57  ;;  %v5231_v30 = vmax.f32 %v5103_v3, %v5159_v41  ;;  %v5327_v49 = vsel %vm620_vm2, %v5303_v37, -inf  ;;  %v5455_v13 = vsel %vm628_vm3, %v5431_v2, -inf }
 0x38a   : > { %11013 = vst [vmem:[#allocation70_spill] sm:$0xff] %v10284_v60  ;;  %v5230_v58 = vmax.f32 %v5102_v61, %v5198_v34  ;;  %v4885_v19 = vmax.f32 %v10284_v60, %v10207_v38  ;;  %v4977_v0 = vmax.f32 %v4945_v23, %v10284_v60  ;;  %v4947_v46 = vmax.f32 %v4915_v21, %v10284_v60 }
 0x38b   : > { %v10296_v47 = vpop.f32.mrf.mxu1  ;;  %v5359_v16 = vmax.f32 %v5231_v30, %v5327_v49 }
 0x38c   : > { %11014 = vst [vmem:[#allocation71_spill] sm:$0xff] %v10296_v47  ;;  %v5358_v55 = vmax.f32 %v5230_v58, %v5287_v31  ;;  %v4884_v23 = vmax.f32 %v10296_v47, %v10217_v24  ;;  %v4976_v4 = vmax.f32 %v4944_v63, %v10296_v47  ;;  %v4946_v51 = vmax.f32 %v4914_v50, %v10296_v47 }
 0x38d   : > { %v4917_v36 = vmax.f32 %v4885_v19, %v10239_v44  ;;  %v5016_v34 = vrot.slane %v4977_v0, 6  ;;  %v5144_v37 = vrot.slane %v4977_v0, 7  ;;  %v5487_v58 = vmax.f32 %v5359_v16, %v5455_v13 }
 0x38e   : > { %v5486_v61 = vmax.f32 %v5358_v55, %v5415_v20  ;;  %v5000_v57 = vrot.slane %v4976_v4, 6  ;;  %v5128_v22 = vrot.slane %v4976_v4, 7  ;;  %v4916_v21 = vmax.f32 %v4884_v23, %v10246_v15 }
 0x38f   : > { %v5256_v3 = vrot.slane %v4976_v4, 1  ;;  %v5384_v31 = vrot.slane %v4976_v4, 2  ;;  %v5272_v19 = vrot.slane %v4977_v0, 1  ;;  %v5400_v41 = vrot.slane %v4977_v0, 2 }
 0x390   : > { %6609 = vmatprep.mubr.f32.mxu0 %v5486_v61  ;;  %v10311_v63 = vpop.f32.mrf.mxu1  ;;  %v5048_v2 = vsel %vm1039_vm4, %v5016_v34, %v5000_v57  ;;  %v5176_v50 = vsel %vm1268_vm5, %v5144_v37, %v5128_v22  ;;  %v5032_v30 = vsel %vm1039_vm4, %v5000_v57, %v5016_v34  ;;  %v5160_v49 = vsel %vm1268_vm5, %v5128_v22, %v5144_v37 }
 0x391   : > { %11015 = vst [vmem:[#allocation72_spill] sm:$0xff] %v10311_v63  ;;  %v4887_v55 = vmax.f32 %v10311_v63, %v10239_v44  ;;  %6610 = vmatmul.mubr.f32.gmra.mxu0 %v5487_v58  ;;  %v5072_v20 = vsel %vm601_vm0, %v5048_v2, -inf  ;;  %v4949_v23 = vmax.f32 %v4917_v36, %v10311_v63  ;;  %v4979_v13 = vmax.f32 %v4947_v46, %v10311_v63 }
 0x392   : > { %v10327_v61 = vpop.f32.mrf.mxu1  ;;  %v5104_v16 = vmax.f32 %v4976_v4, %v5072_v20  ;;  %v5200_v44 = vsel %vm609_vm1, %v5176_v50, -inf  ;;  %v5288_v57 = vsel %vm1497_vm6, %v5256_v3, %v5272_v19  ;;  %v5416_v34 = vsel %vm1726_vm7, %v5384_v31, %v5400_v41 }
 0x393   : > { %11016 = vst [vmem:[#allocation73_spill] sm:$0xff] %v10327_v61  ;;  %v4886_v58 = vmax.f32 %v10327_v61, %v10246_v15  ;;  %v4978_v2 = vmax.f32 %v4946_v51, %v10327_v61  ;;  %v5105_v22 = vmax.f32 %v4977_v0, %v5032_v30  ;;  %v5304_v46 = vsel %vm1497_vm6, %v5272_v19, %v5256_v3 }
 0x394   : > { %v5232_v36 = vmax.f32 %v5104_v16, %v5200_v44  ;;  %v5432_v4 = vsel %vm1726_vm7, %v5400_v41, %v5384_v31  ;;  %v4948_v37 = vmax.f32 %v4916_v21, %v10327_v61  ;;  %v4919_v50 = vmax.f32 %v4887_v55, %v10284_v60 }
 0x395   : > { %v4918_v51 = vmax.f32 %v4886_v58, %v10296_v47  ;;  %v5001_v20 = vrot.slane %v4978_v2, 6  ;;  %v5233_v24 = vmax.f32 %v5105_v22, %v5160_v49  ;;  %v5329_v38 = vsel %vm620_vm2, %v5304_v46, -inf }
 0x396   : > { %v5360_v15 = vmax.f32 %v5232_v36, %v5288_v57  ;;  %v5129_v44 = vrot.slane %v4978_v2, 7  ;;  %v5457_v3 = vsel %vm628_vm3, %v5432_v4, -inf  ;;  %v5017_v19 = vrot.slane %v4979_v13, 6 }
 0x397   : > { %v10347_v0 = vpop.f32.mrf.mxu1  ;;  %v5145_v31 = vrot.slane %v4979_v13, 7  ;;  %v5257_v41 = vrot.slane %v4978_v2, 1  ;;  %v5273_v30 = vrot.slane %v4979_v13, 1  ;;  %v5385_v16 = vrot.slane %v4978_v2, 2 }
 0x398   : > { %v4889_v21 = vmax.f32 %v10347_v0, %v10284_v60  ;;  %v5488_v55 = vmax.f32 %v5360_v15, %v5416_v34  ;;  %v4951_v49 = vmax.f32 %v4919_v50, %v10347_v0  ;;  %v5361_v57 = vmax.f32 %v5233_v24, %v5329_v38 }
 0x399   : > { %v10354_v58 = vpop.f32.mrf.mxu1  ;;  %v5049_v36 = vsel %vm1039_vm4, %v5017_v19, %v5001_v20  ;;  %v5177_v22 = vsel %vm1268_vm5, %v5145_v31, %v5129_v44  ;;  %v10361_v46 = vmax.f32 %v4949_v23, %v10347_v0  ;;  %v5289_v34 = vsel %vm1497_vm6, %v5257_v41, %v5273_v30 }
 0x39a   : > { %v4888_v4 = vmax.f32 %v10354_v58, %v10296_v47  ;;  %v4980_v15 = vmax.f32 %v4948_v37, %v10354_v58  ;;  %6612 = vmatprep.mubr.f32.mxu0 %v5488_v55  ;;  %v4950_v38 = vmax.f32 %v4918_v51, %v10354_v58  ;;  %v5489_v24 = vmax.f32 %v5361_v57, %v5457_v3 }
 0x39b   : > { %v5074_v50 = vsel %vm601_vm0, %v5049_v36, -inf  ;;  %v5401_v60 = vrot.slane %v4979_v13, 2  ;;  %v4921_v26 = vmax.f32 %v4889_v21, %v10311_v63  ;;  %v5202_v62 = vsel %vm609_vm1, %v5177_v22, -inf }
 0x39c   : > { %v5106_v23 = vmax.f32 %v4978_v2, %v5074_v50  ;;  %v5033_v37 = vsel %vm1039_vm4, %v5001_v20, %v5017_v19  ;;  %v4920_v55 = vmax.f32 %v4888_v4, %v10327_v61  ;;  %6613 = vmatmul.mubr.f32.gmra.mxu0 %v5489_v24  ;;  %v5305_v51 = vsel %vm1497_vm6, %v5273_v30, %v5257_v41 }
 0x39d   : > { %v5107_v47 = vmax.f32 %v4979_v13, %v5033_v37  ;;  %v5433_v3 = vsel %vm1726_vm7, %v5401_v60, %v5385_v16  ;;  %v5417_v2 = vsel %vm1726_vm7, %v5385_v16, %v5401_v60  ;;  %v5161_v21 = vsel %vm1268_vm5, %v5129_v44, %v5145_v31 }
 0x39e   : > { %v5234_v57 = vmax.f32 %v5106_v23, %v5202_v62  ;;  %v5002_v36 = vrot.slane %v4980_v15, 6  ;;  %v5331_v20 = vsel %vm620_vm2, %v5305_v51, -inf  ;;  %v5459_v13 = vsel %vm628_vm3, %v5433_v3, -inf }
 0x39f   : > { %v5235_v22 = vmax.f32 %v5107_v47, %v5161_v21  ;;  %v5130_v19 = vrot.slane %v4980_v15, 7  ;;  %v5018_v62 = vrot.slane %v10361_v46, 6  ;;  %v5146_v4 = vrot.slane %v10361_v46, 7 }
 0x3a0   : > { %v5362_v30 = vmax.f32 %v5234_v57, %v5289_v34  ;;  %v5258_v60 = vrot.slane %v4980_v15, 1  ;;  %v5274_v47 = vrot.slane %v10361_v46, 1  ;;  %v5386_v16 = vrot.slane %v4980_v15, 2 }
 0x3a1   : > { %v5363_v31 = vmax.f32 %v5235_v22, %v5331_v20  ;;  %v5050_v34 = vsel %vm1039_vm4, %v5018_v62, %v5002_v36  ;;  %v5178_v37 = vsel %vm1268_vm5, %v5146_v4, %v5130_v19  ;;  %v5402_v20 = vrot.slane %v10361_v46, 2 }
 0x3a2   : > { %v10389_v41 = vpop.f32.mrf.mxu1  ;;  %v5490_v23 = vmax.f32 %v5362_v30, %v5417_v2  ;;  %v5076_v22 = vsel %vm601_vm0, %v5050_v34, -inf }
 0x3a3   : > { %v4891_v44 = vmax.f32 %v10389_v41, %v10311_v63  ;;  %v10397_v24 = vmax.f32 %v4951_v49, %v10389_v41  ;;  %v4953_v3 = vmax.f32 %v4921_v26, %v10389_v41  ;;  %v5290_v49 = vsel %vm1497_vm6, %v5258_v60, %v5274_v47 }
 0x3a4   : > { %v10399_v50 = vpop.f32.mrf.mxu1  ;;  %6615 = vmatprep.mubr.f32.mxu0 %v5490_v23  ;;  %v5491_v2 = vmax.f32 %v5363_v31, %v5459_v13  ;;  %v5108_v30 = vmax.f32 %v4980_v15, %v5076_v22  ;;  %v5204_v26 = vsel %vm609_vm1, %v5178_v37, -inf  ;;  %v5306_v31 = vsel %vm1497_vm6, %v5274_v47, %v5258_v60 }
 0x3a5   : > { %v10406_v51 = vmax.f32 %v4950_v38, %v10399_v50  ;;  %v4890_v57 = vmax.f32 %v10399_v50, %v10327_v61  ;;  %v10414_v21 = vmax.f32 %v4891_v44, %v10347_v0  ;;  %v4952_v38 = vmax.f32 %v4920_v55, %v10399_v50 }
 0x3a6   : > { %v5034_v61 = vsel %vm1039_vm4, %v5002_v36, %v5018_v62  ;;  %6616 = vmatmul.mubr.f32.gmra.mxu0 %v5491_v2  ;;  %v5434_v55 = vsel %vm1726_vm7, %v5402_v20, %v5386_v16  ;;  %v5236_v23 = vmax.f32 %v5108_v30, %v5204_v26  ;;  %v5418_v36 = vsel %vm1726_vm7, %v5386_v16, %v5402_v20 }
 0x3a7   : > { %v4922_v44 = vmax.f32 %v4890_v57, %v10354_v58  ;;  %v5109_v13 = vmax.f32 %v10361_v46, %v5034_v61  ;;  %v5162_v62 = vsel %vm1268_vm5, %v5130_v19, %v5146_v4  ;;  %v5003_v47 = vrot.slane %v10406_v51, 6 }
 0x3a8   : > { %v10424_v63 = vpop.f32.mrf.mxu1  ;;  %v5333_v19 = vsel %vm620_vm2, %v5306_v31, -inf  ;;  %v5461_v4 = vsel %vm628_vm3, %v5434_v55, -inf  ;;  %v5364_v16 = vmax.f32 %v5236_v23, %v5290_v49  ;;  %v5019_v2 = vrot.slane %v10397_v24, 6 }
 0x3a9   : > { %v4893_v15 = vmax.f32 %v10424_v63, %v10347_v0  ;;  %v10439_v34 = vmax.f32 %v4953_v3, %v10424_v63  ;;  %v4955_v46 = vmax.f32 %v10414_v21, %v10424_v63  ;;  %v5237_v60 = vmax.f32 %v5109_v13, %v5162_v62 }
 0x3aa   : > { %v10441_v61 = vpop.f32.mrf.mxu1  ;;  %v5131_v21 = vrot.slane %v10406_v51, 7  ;;  %v5147_v30 = vrot.slane %v10397_v24, 7  ;;  %v5492_v26 = vmax.f32 %v5364_v16, %v5418_v36  ;;  %v5051_v13 = vsel %vm1039_vm4, %v5019_v2, %v5003_v47 }
 0x3ab   : > { %v4892_v37 = vmax.f32 %v10441_v61, %v10354_v58  ;;  %v10449_v57 = vmax.f32 %v4952_v38, %v10441_v61  ;;  %v5365_v3 = vmax.f32 %v5237_v60, %v5333_v19  ;;  %v4925_v22 = vmax.f32 %v4893_v15, %v10389_v41 }
 0x3ac   : > { %v4954_v20 = vmax.f32 %v4922_v44, %v10441_v61  ;;  %v5259_v38 = vrot.slane %v10406_v51, 1  ;;  %v5275_v31 = vrot.slane %v10397_v24, 1  ;;  %v5387_v49 = vrot.slane %v10406_v51, 2  ;;  %6618 = vmatprep.mubr.f32.mxu0 %v5492_v26 }
 0x3ad   : > { %v5493_v55 = vmax.f32 %v5365_v3, %v5461_v4  ;;  %v5078_v23 = vsel %vm601_vm0, %v5051_v13, -inf  ;;  %v5179_v15 = vsel %vm1268_vm5, %v5147_v30, %v5131_v21  ;;  %v5403_v44 = vrot.slane %v10397_v24, 2 }
 0x3ae   : > { %v4924_v62 = vmax.f32 %v4892_v37, %v10399_v50  ;;  %v5110_v36 = vmax.f32 %v10406_v51, %v5078_v23  ;;  %v5291_v60 = vsel %vm1497_vm6, %v5259_v38, %v5275_v31  ;;  %v5035_v19 = vsel %vm1039_vm4, %v5003_v47, %v5019_v2 }
 0x3af   : > { %6619 = vmatmul.mubr.f32.gmra.mxu0 %v5493_v55  ;;  %v5206_v4 = vsel %vm609_vm1, %v5179_v15, -inf  ;;  %v5111_v16 = vmax.f32 %v10397_v24, %v5035_v19  ;;  %v5307_v3 = vsel %vm1497_vm6, %v5275_v31, %v5259_v38  ;;  %v5435_v37 = vsel %vm1726_vm7, %v5403_v44, %v5387_v49 }
 0x3b0   : > { %v5238_v51 = vmax.f32 %v5110_v36, %v5206_v4  ;;  %v5419_v13 = vsel %vm1726_vm7, %v5387_v49, %v5403_v44  ;;  %v5163_v47 = vsel %vm1268_vm5, %v5131_v21, %v5147_v30  ;;  %v5004_v2 = vrot.slane %v10449_v57, 6 }
 0x3b1   : > { %v5239_v55 = vmax.f32 %v5111_v16, %v5163_v47  ;;  %v5335_v38 = vsel %vm620_vm2, %v5307_v3, -inf  ;;  %v5463_v31 = vsel %vm628_vm3, %v5435_v37, -inf  ;;  %v5020_v49 = vrot.slane %v10439_v34, 6 }
 0x3b2   : > { %v10483_v26 = vpop.f32.mrf.mxu1  ;;  %v5366_v15 = vmax.f32 %v5238_v51, %v5291_v60  ;;  %v5132_v44 = vrot.slane %v10449_v57, 7  ;;  %v5148_v21 = vrot.slane %v10439_v34, 7 }
 0x3b3   : > { %v4895_v24 = vmax.f32 %v10483_v26, %v10389_v41  ;;  %v10502_v30 = vmax.f32 %v4925_v22, %v10483_v26  ;;  %v10505_v36 = vmax.f32 %v4955_v46, %v10483_v26  ;;  %v5367_v60 = vmax.f32 %v5239_v55, %v5335_v38 }
 0x3b4   : > { %v10496_v23 = vpop.f32.mrf.mxu1  ;;  %v5494_v16 = vmax.f32 %v5366_v15, %v5419_v13  ;;  %v5052_v3 = vsel %vm1039_vm4, %v5020_v49, %v5004_v2  ;;  %v5180_v37 = vsel %vm1268_vm5, %v5148_v21, %v5132_v44  ;;  %v5276_v38 = vrot.slane %v10439_v34, 1 }
 0x3b5   : > { %11017 = vst [vmem:[#allocation74_spill] sm:$0xff] %v10496_v23  ;;  %v4894_v19 = vmax.f32 %v10496_v23, %v10399_v50  ;;  %v10510_v4 = vmax.f32 %v4954_v20, %v10496_v23  ;;  %v10517_v22 = vmax.f32 %v4895_v24, %v10424_v63  ;;  %v10520_v46 = vmax.f32 %v4924_v62, %v10496_v23 }
 0x3b6   : > { %v5080_v51 = vsel %vm601_vm0, %v5052_v3, -inf  ;;  %v5260_v20 = vrot.slane %v10449_v57, 1  ;;  %6621 = vmatprep.mubr.f32.mxu0 %v5494_v16  ;;  %v5495_v13 = vmax.f32 %v5367_v60, %v5463_v31  ;;  %v5388_v15 = vrot.slane %v10449_v57, 2 }
 0x3b7   : > { %v5112_v55 = vmax.f32 %v10449_v57, %v5080_v51  ;;  %v5208_v24 = vsel %vm609_vm1, %v5180_v37, -inf  ;;  %v5404_v62 = vrot.slane %v10439_v34, 2  ;;  %v5036_v23 = vsel %vm1039_vm4, %v5004_v2, %v5020_v49 }
 0x3b8   : > { %v6552_v47 = vpop.f32.mrf.mxu1  ;;  %v5005_v3 = vrot.slane %v10510_v4, 6  ;;  %6622 = vmatmul.mubr.f32.gmra.mxu0 %v5495_v13  ;;  %v5113_v60 = vmax.f32 %v10439_v34, %v5036_v23  ;;  %v5308_v57 = vsel %vm1497_vm6, %v5276_v38, %v5260_v20  ;;  %v5292_v37 = vsel %vm1497_vm6, %v5260_v20, %v5276_v38 }
 0x3b9   : > { %v10535_v47 = vmax.f32 %v4894_v19, %v10441_v61  ;;  %v5240_v16 = vmax.f32 %v5112_v55, %v5208_v24  ;;  %v5420_v51 = vsel %vm1726_vm7, %v5388_v15, %v5404_v62  ;;  %v5164_v2 = vsel %vm1268_vm5, %v5132_v44, %v5148_v21 }
 0x3ba   : > { %v4773_v31 = vpop.f32.mrf.mxu1  ;;  %v5021_v49 = vrot.slane %v10505_v36, 6  ;;  %v5436_v13 = vsel %vm1726_vm7, %v5404_v62, %v5388_v15  ;;  %v5133_v34 = vrot.slane %v10510_v4, 7  ;;  %v5337_v23 = vsel %vm620_vm2, %v5308_v57, -inf }
 0x3bb   : > { %v5368_v19 = vmax.f32 %v5240_v16, %v5292_v37  ;;  %v5241_v31 = vmax.f32 %v5113_v60, %v5164_v2  ;;  %v5149_v55 = vrot.slane %v10505_v36, 7  ;;  %v5261_v38 = vrot.slane %v10510_v4, 1 }
 0x3bc   : > { %v5053_v20 = vsel %vm1039_vm4, %v5021_v49, %v5005_v3  ;;  %v5389_v15 = vrot.slane %v10510_v4, 2  ;;  %v5465_v62 = vsel %vm628_vm3, %v5436_v13, -inf  ;;  %v5277_v37 = vrot.slane %v10505_v36, 1 }
 0x3bd   : > { %v5496_v21 = vmax.f32 %v5368_v19, %v5420_v51  ;;  %v5369_v24 = vmax.f32 %v5241_v31, %v5337_v23  ;;  %v5082_v16 = vsel %vm601_vm0, %v5053_v20, -inf  ;;  %v5181_v57 = vsel %vm1268_vm5, %v5149_v55, %v5133_v34 }
 0x3be   : > { %v6555_v44 = vpop.f32.mrf.mxu1  ;;  %v5114_v60 = vmax.f32 %v10510_v4, %v5082_v16  ;;  %v5210_v51 = vsel %vm609_vm1, %v5181_v57, -inf  ;;  %v5405_v19 = vrot.slane %v10505_v36, 2  ;;  %v5037_v31 = vsel %vm1039_vm4, %v5005_v3, %v5021_v49 }
 0x3bf   : > { %6624 = vmatprep.mubr.f32.mxu0 %v5496_v21  ;;  %v5497_v44 = vmax.f32 %v5369_v24, %v5465_v62  ;;  %v5293_v4 = vsel %vm1497_vm6, %v5261_v38, %v5277_v37  ;;  %v5115_v13 = vmax.f32 %v10505_v36, %v5037_v31  ;;  %v5309_v20 = vsel %vm1497_vm6, %v5277_v37, %v5261_v38 }
 0x3c0   : > { %v4783_v2 = vpop.f32.mrf.mxu1  ;;  %v5242_v23 = vmax.f32 %v5114_v60, %v5210_v51  ;;  %v5421_v21 = vsel %vm1726_vm7, %v5389_v15, %v5405_v19  ;;  %v5165_v24 = vsel %vm1268_vm5, %v5133_v34, %v5149_v55  ;;  %v5006_v16 = vrot.slane %v10520_v46, 6 }
 0x3c1   : > { %6625 = vmatmul.mubr.f32.gmra.mxu0 %v5497_v44  ;;  %v5022_v3 = vrot.slane %v10502_v30, 6  ;;  %v5243_v62 = vmax.f32 %v5115_v13, %v5165_v24  ;;  %v5437_v60 = vsel %vm1726_vm7, %v5405_v19, %v5389_v15  ;;  %v5134_v36 = vrot.slane %v10520_v46, 7 }
 0x3c2   : > { %v5370_v49 = vmax.f32 %v5242_v23, %v5293_v4  ;;  %v5339_v38 = vsel %vm620_vm2, %v5309_v20, -inf  ;;  %v5150_v37 = vrot.slane %v10502_v30, 7  ;;  %v5262_v34 = vrot.slane %v10520_v46, 1 }
 0x3c3   : > { %v5054_v57 = vsel %vm1039_vm4, %v5022_v3, %v5006_v16  ;;  %v5371_v2 = vmax.f32 %v5243_v62, %v5339_v38  ;;  %v5390_v51 = vrot.slane %v10520_v46, 2  ;;  %v5467_v15 = vsel %vm628_vm3, %v5437_v60, -inf }
 0x3c4   : > { %v5498_v55 = vmax.f32 %v5370_v49, %v5421_v21  ;;  %v5084_v44 = vsel %vm601_vm0, %v5054_v57, -inf  ;;  %v5182_v31 = vsel %vm1268_vm5, %v5150_v37, %v5134_v36  ;;  %v5278_v23 = vrot.slane %v10502_v30, 1 }
 0x3c5   : > { %v5116_v19 = vmax.f32 %v10520_v46, %v5084_v44  ;;  %v5499_v13 = vmax.f32 %v5371_v2, %v5467_v15  ;;  %v5212_v20 = vsel %vm609_vm1, %v5182_v31, -inf  ;;  %v5406_v21 = vrot.slane %v10502_v30, 2 }
 0x3c6   : > { %v6344_v4 = vpop.f32.mrf.mxu0  ;;  %6627 = vmatprep.mubr.f32.mxu0 %v5498_v55  ;;  %v5038_v24 = vsel %vm1039_vm4, %v5006_v16, %v5022_v3  ;;  %v5294_v46 = vsel %vm1497_vm6, %v5262_v34, %v5278_v23  ;;  %v5310_v60 = vsel %vm1497_vm6, %v5278_v23, %v5262_v34  ;;  %v5166_v57 = vsel %vm1268_vm5, %v5134_v36, %v5150_v37 }
 0x3c7   : > { %v5244_v49 = vmax.f32 %v5116_v19, %v5212_v20  ;;  %v5117_v62 = vmax.f32 %v10502_v30, %v5038_v24  ;;  %6628 = vmatmul.mubr.f32.gmra.mxu0 %v5499_v13  ;;  %v5438_v55 = vsel %vm1726_vm7, %v5406_v21, %v5390_v51  ;;  %v5007_v2 = vrot.slane %v10535_v47, 6 }
 0x3c8   : > { %v2201_v38 = vpop.f32.mrf.mxu0  ;;  %v5023_v16 = vrot.slane %v10517_v22, 6  ;;  %v5422_v44 = vsel %vm1726_vm7, %v5390_v51, %v5406_v21  ;;  %v5135_v15 = vrot.slane %v10535_v47, 7  ;;  %v5341_v34 = vsel %vm620_vm2, %v5310_v60, -inf }
 0x3c9   : > { %v5372_v3 = vmax.f32 %v5244_v49, %v5294_v46  ;;  %v5245_v30 = vmax.f32 %v5117_v62, %v5166_v57  ;;  %v5151_v37 = vrot.slane %v10517_v22, 7  ;;  %v5263_v19 = vrot.slane %v10535_v47, 1 }
 0x3ca   : > { %v5055_v36 = vsel %vm1039_vm4, %v5023_v16, %v5007_v2  ;;  %v5469_v4 = vsel %vm628_vm3, %v5438_v55, -inf  ;;  %v5279_v21 = vrot.slane %v10517_v22, 1  ;;  %v5391_v24 = vrot.slane %v10535_v47, 2 }
 0x3cb   : > { %v5500_v31 = vmax.f32 %v5372_v3, %v5422_v44  ;;  %v5373_v23 = vmax.f32 %v5245_v30, %v5341_v34  ;;  %v5086_v51 = vsel %vm601_vm0, %v5055_v36, -inf  ;;  %v5183_v20 = vsel %vm1268_vm5, %v5151_v37, %v5135_v15 }
 0x3cc   : > { %v5118_v13 = vmax.f32 %v10535_v47, %v5086_v51  ;;  %v5214_v62 = vsel %vm609_vm1, %v5183_v20, -inf  ;;  %v5039_v60 = vsel %vm1039_vm4, %v5007_v2, %v5023_v16  ;;  %v5407_v38 = vrot.slane %v10517_v22, 2 }
 0x3cd   : > { %v6347_v49 = vpop.f32.mrf.mxu0  ;;  %6630 = vmatprep.mubr.f32.mxu0 %v5500_v31  ;;  %v5501_v46 = vmax.f32 %v5373_v23, %v5469_v4  ;;  %v5119_v57 = vmax.f32 %v10517_v22, %v5039_v60  ;;  %v5311_v55 = vsel %vm1497_vm6, %v5279_v21, %v5263_v19  ;;  %v5295_v47 = vsel %vm1497_vm6, %v5263_v19, %v5279_v21 }
 0x3ce   : > { %v5246_v5 = vmax.f32 %v5118_v13, %v5214_v62  ;;  %v5167_v6 = vsel %vm1268_vm5, %v5135_v15, %v5151_v37  ;;  %v5439_v2 = vsel %vm1726_vm7, %v5407_v38, %v5391_v24  ;;  %v5423_v22 = vsel %vm1726_vm7, %v5391_v24, %v5407_v38  ;;  %v6731_v49 = vld [vmem:[%s7177_s9 + $0x10] sm:$0xff] }
 0x3cf   : > { %v2211_v3 = vpop.f32.mrf.mxu0  ;;  %6631 = vmatmul.mubr.f32.gmra.mxu0 %v5501_v46  ;;  %v5247_v30 = vmax.f32 %v5119_v57, %v5167_v6  ;;  %v5343_v34 = vsel %vm620_vm2, %v5311_v55, -inf  ;;  %v5471_v19 = vsel %vm628_vm3, %v5439_v2, -inf  ;;  %v2262_v46 = vadd.f32 %v6731_v49, %v8011_v29  ;;  %v6732_v55 = vld [vmem:[%s7177_s9 + $0x28] sm:$0xff]  ;;  %v6734_v2 = vld [vmem:[%s7177_s9 + $0x38] sm:$0xff] }
 0x3d0   : > { %v5374_v44 = vmax.f32 %v5246_v5, %v5295_v47  ;;  %v6733_v3 = vld [vmem:[%s7177_s9 + $0x20] sm:$0xff] }
 0x3d1   : > { %v6350_v16 = vpop.f32.mrf.mxu0  ;;  %v5375_v31 = vmax.f32 %v5247_v30, %v5343_v34  ;;  %v3632_v62 = vadd.f32 %v9045_v12, %v2262_v46  ;;  %v2264_v12 = vadd.f32 %v6733_v3, %v8046_v10  ;;  %v11022_v46 = vld [vmem:[#allocation61_spill] sm:$0xff] }
 0x3d2   : > { %v5502_v36 = vmax.f32 %v5374_v44, %v5423_v22 }
 0x3d3   : > { %v2221_v23 = vpop.f32.mrf.mxu0  ;;  %v5503_v15 = vmax.f32 %v5375_v31, %v5471_v19  ;;  %v4794_v5 = vadd.f32 %v9983_v18, %v3632_v62  ;;  %v3634_v18 = vadd.f32 %v9080_v33, %v2264_v12  ;;  %v11026_v12 = vld [vmem:[#allocation62_spill] sm:$0xff] }
 0x3d4   : > { %6633 = vmatprep.mubr.f32.mxu0 %v5502_v36  ;;  %v6736_v23 = vld [vmem:[%s7177_s9 + $0x48] sm:$0xff] }
 0x3d5   : > { %v6353_v37 = vpop.f32.mrf.mxu0  ;;  %6634 = vmatmul.mubr.f32.gmra.mxu0 %v5503_v15  ;;  %v4796_v44 = vadd.f32 %v9996_v8, %v3634_v18  ;;  %v11027_v18 = vld [vmem:[#allocation41_spill] sm:$0xff] }
 0x3d7   : > { %v2231_v4 = vpop.f32.mrf.mxu0 }
 0x3d9   : > { %v6356_v51 = vpop.f32.mrf.mxu0 }
 0x3db   : > { %v2241_v13 = vpop.f32.mrf.mxu0 }
 0x3dd   : > { %v6359_v1 = vpop.f32.mrf.mxu0 }
 0x3de   : > { %v11018_v1 = vld [vmem:[#allocation38_spill] sm:$0xff] }
 0x3df   : > { %v2251_v20 = vpop.f32.mrf.mxu0 }
 0x3e0   : > { %v11019_v20 = vld [vmem:[#allocation17_spill] sm:$0xff] }
 0x410   : > { %v6590_v21 = vpop.f32.mrf.mxu0 }
 0x411   : > { %v5747_v14 = vadd.f32 %v6590_v21, %v9976_v25  ;;  %v11020_v21 = vld [vmem:[#allocation60_spill] sm:$0xff] }
 0x412   : > { %v5587_v24 = vpop.f32.mrf.mxu0 }
 0x413   : > { %5779 = vst [vmem:[%s10656_s22 + $0x8] sm:$0xff] %v5747_v14  ;;  %v5746_v17 = vadd.f32 %v5587_v24, %v9979_v35  ;;  %v2265_v35 = vadd.f32 %v6732_v55, %v8026_v59  ;;  %v11021_v24 = vld [vmem:[#allocation39_spill] sm:$0xff] }
 0x415   : > { %5778 = vst [vmem:[%s10656_s22] sm:$0xff] %v5746_v17  ;;  %v3635_v29 = vadd.f32 %v9067_v43, %v2265_v35  ;;  %v2267_v43 = vadd.f32 %v6734_v2, %v8056_v56  ;;  %v6741_v35 = vld [vmem:[%s7177_s9 + $0x60] sm:$0xff] }
 0x417   : > { %v3637_v10 = vadd.f32 %v9105_v9, %v2267_v43  ;;  %v2269_v9 = vadd.f32 %v6736_v23, %v8089_v40  ;;  %v6738_v40 = vld [vmem:[%s7177_s9 + $0x58] sm:$0xff]  ;;  %v11033_v23 = vld [vmem:[#allocation43_spill] sm:$0xff] }
 0x418   : > { %v6593_v60 = vpop.f32.mrf.mxu0 }
 0x419   : > { %v5749_v25 = vadd.f32 %v6593_v60, %v9994_v42  ;;  %v4797_v42 = vadd.f32 %v9989_v32, %v3635_v29  ;;  %v6735_v32 = vld [vmem:[%s7177_s9 + $0x30] sm:$0xff]  ;;  %v4799_v16 = vadd.f32 %v10008_v48, %v3637_v10  ;;  %v6737_v48 = vld [vmem:[%s7177_s9 + $0x40] sm:$0xff]  ;;  %v6742_v10 = vld [vmem:[%s7177_s9 + $0x78] sm:$0xff] }
 0x41a   : > { %v5597_v38 = vpop.f32.mrf.mxu0  ;;  %v2266_v33 = vadd.f32 %v6735_v32, %v8069_v11  ;;  %v3639_v11 = vadd.f32 %v9148_v52, %v2269_v9  ;;  %v2271_v52 = vadd.f32 %v6738_v40, %v8128_v27  ;;  %v6740_v27 = vld [vmem:[%s7177_s9 + $0x68] sm:$0xff]  ;;  %v11025_v29 = vld [vmem:[#allocation19_spill] sm:$0xff]  ;;  %v11029_v32 = vld [vmem:[#allocation20_spill] sm:$0xff] }
 0x41b   : > { %5781 = vst [vmem:[%s10656_s22 + $0x18] sm:$0xff] %v5749_v25  ;;  %v5748_v57 = vadd.f32 %v5597_v38, %v4794_v5  ;;  %v11023_v5 = vld [vmem:[#allocation18_spill] sm:$0xff]  ;;  %v2272_v3 = vadd.f32 %v6741_v35, %v11025_v29  ;;  %v11044_v35 = vld [vmem:[#allocation68_spill] sm:$0xff] }
 0x41c   : > { %v3636_v8 = vadd.f32 %v9119_v54, %v2266_v33  ;;  %v2268_v54 = vadd.f32 %v6737_v48, %v8103_v45  ;;  %v4801_v19 = vadd.f32 %v10049_v28, %v3639_v11  ;;  %v3641_v45 = vadd.f32 %v11018_v1, %v2271_v52  ;;  %v6739_v28 = vld [vmem:[%s7177_s9 + $0x50] sm:$0xff]  ;;  %v6745_v52 = vld [vmem:[%s7177_s9 + $0x80] sm:$0xff] }
 0x41d   : > { %5780 = vst [vmem:[%s10656_s22 + $0x10] sm:$0xff] %v5748_v57  ;;  %v2273_v38 = vadd.f32 %v6740_v27, %v11023_v5  ;;  %v11024_v57 = vld [vmem:[#allocation40_spill] sm:$0xff]  ;;  %v2275_v33 = vadd.f32 %v6742_v10, %v11029_v32  ;;  %v11037_v1 = vld [vmem:[#allocation23_spill] sm:$0xff]  ;;  %v11042_v27 = vld [vmem:[#allocation46_spill] sm:$0xff] }
 0x41e   : > { %v4798_v36 = vadd.f32 %v10017_v53, %v3636_v8  ;;  %v3638_v53 = vadd.f32 %v9163_v7, %v2268_v54  ;;  %v2270_v7 = vadd.f32 %v6739_v28, %v11019_v20  ;;  %v4803_v14 = vadd.f32 %v11020_v21, %v3641_v45  ;;  %v11034_v54 = vld [vmem:[#allocation65_spill] sm:$0xff]  ;;  %v11038_v28 = vld [vmem:[#allocation66_spill] sm:$0xff]  ;;  %v11048_v10 = vld [vmem:[#allocation48_spill] sm:$0xff] }
 0x41f   : > { %v3643_v55 = vadd.f32 %v11024_v57, %v2273_v38  ;;  %v2276_v45 = vadd.f32 %v6745_v52, %v11037_v1  ;;  %v6747_v38 = vld [vmem:[%s7177_s9 + $0x90] sm:$0xff]  ;;  %v11043_v57 = vld [vmem:[#allocation25_spill] sm:$0xff]  ;;  %v11056_v52 = vld [vmem:[#allocation72_spill] sm:$0xff] }
 0x420   : > { %v4800_v4 = vadd.f32 %v10057_v39, %v3638_v53  ;;  %v3640_v39 = vadd.f32 %v11021_v24, %v2270_v7  ;;  %v11039_v7 = vld [vmem:[#allocation45_spill] sm:$0xff] }
 0x421   : > { %v6596_v47 = vpop.f32.mrf.mxu0  ;;  %v3646_v21 = vadd.f32 %v11039_v7, %v2276_v45  ;;  %v11057_v45 = vld [vmem:[#allocation51_spill] sm:$0xff] }
 0x422   : > { %v5751_v6 = vadd.f32 %v6596_v47, %v4797_v42  ;;  %v4802_v62 = vadd.f32 %v11022_v46, %v3640_v39  ;;  %v4805_v42 = vadd.f32 %v11026_v12, %v3643_v55  ;;  %v3642_v47 = vadd.f32 %v11027_v18, %v2272_v3  ;;  %v11040_v39 = vld [vmem:[#allocation67_spill] sm:$0xff] }
 0x423   : > { %v5607_v30 = vpop.f32.mrf.mxu0  ;;  %v2278_v55 = vadd.f32 %v6747_v38, %v11043_v57  ;;  %v11045_v3 = vld [vmem:[#allocation47_spill] sm:$0xff]  ;;  %v11062_v57 = vld [vmem:[#allocation53_spill] sm:$0xff] }
 0x424   : > { %5783 = vst [vmem:[%s10656_s22 + $0x28] sm:$0xff] %v5751_v6  ;;  %v5750_v59 = vadd.f32 %v5607_v30, %v4796_v44  ;;  %v11028_v30 = vld [vmem:[#allocation63_spill] sm:$0xff] }
 0x425   : > { %v3648_v12 = vadd.f32 %v11045_v3, %v2278_v55 }
 0x426   : > { %5782 = vst [vmem:[%s10656_s22 + $0x20] sm:$0xff] %v5750_v59  ;;  %v4804_v59 = vadd.f32 %v11028_v30, %v3642_v47  ;;  %v11046_v47 = vld [vmem:[#allocation69_spill] sm:$0xff] }
 0x42b   : > { %v6599_v22 = vpop.f32.mrf.mxu0 }
 0x42c   : > { %v5753_v34 = vadd.f32 %v6599_v22, %v4799_v16  ;;  %v11030_v16 = vld [vmem:[#allocation42_spill] sm:$0xff]  ;;  %v6743_v22 = vld [vmem:[%s7177_s9 + $0x70] sm:$0xff] }
 0x42d   : > { %v5617_v31 = vpop.f32.mrf.mxu0  ;;  %v3645_v8 = vadd.f32 %v11030_v16, %v2275_v33  ;;  %v6749_v33 = vld [vmem:[%s7177_s9 + $0xa0] sm:$0xff]  ;;  %v11049_v16 = vld [vmem:[#allocation27_spill] sm:$0xff] }
 0x42e   : > { %5785 = vst [vmem:[%s10656_s22 + $0x38] sm:$0xff] %v5753_v34  ;;  %v5752_v56 = vadd.f32 %v5617_v31, %v4798_v36  ;;  %v11031_v34 = vld [vmem:[#allocation21_spill] sm:$0xff]  ;;  %v11032_v31 = vld [vmem:[#allocation64_spill] sm:$0xff] }
 0x42f   : > { %v2274_v36 = vadd.f32 %v6743_v22, %v11031_v34  ;;  %v11050_v22 = vld [vmem:[#allocation70_spill] sm:$0xff] }
 0x430   : > { %5784 = vst [vmem:[%s10656_s22 + $0x30] sm:$0xff] %v5752_v56  ;;  %v4807_v56 = vadd.f32 %v11032_v31, %v3645_v8  ;;  %v2280_v8 = vadd.f32 %v6749_v33, %v11049_v16 }
 0x431   : > { %v3644_v9 = vadd.f32 %v11033_v23, %v2274_v36  ;;  %v11051_v36 = vld [vmem:[#allocation49_spill] sm:$0xff] }
 0x432   : > { %v3650_v31 = vadd.f32 %v11051_v36, %v2280_v8 }
 0x435   : > { %v6602_v15 = vpop.f32.mrf.mxu0 }
 0x436   : > { %v5755_v37 = vadd.f32 %v6602_v15, %v4801_v19  ;;  %v4806_v19 = vadd.f32 %v11034_v54, %v3644_v9  ;;  %v11052_v9 = vld [vmem:[#allocation71_spill] sm:$0xff] }
 0x437   : > { %v5627_v51 = vpop.f32.mrf.mxu0 }
 0x438   : > { %5787 = vst [vmem:[%s10656_s22 + $0x48] sm:$0xff] %v5755_v37  ;;  %v5754_v13 = vadd.f32 %v5627_v51, %v4800_v4  ;;  %v6744_v37 = vld [vmem:[%s7177_s9 + $0x88] sm:$0xff] }
 0x439   : > { %v11035_v4 = vld [vmem:[#allocation22_spill] sm:$0xff] }
 0x43a   : > { %5786 = vst [vmem:[%s10656_s22 + $0x40] sm:$0xff] %v5754_v13  ;;  %v2277_v51 = vadd.f32 %v6744_v37, %v11035_v4  ;;  %v11036_v13 = vld [vmem:[#allocation44_spill] sm:$0xff]  ;;  %v11054_v37 = vld [vmem:[#allocation50_spill] sm:$0xff] }
 0x43c   : > { %v3647_v40 = vadd.f32 %v11036_v13, %v2277_v51  ;;  %v6751_v51 = vld [vmem:[%s7177_s9 + $0xb0] sm:$0xff]  ;;  %v11055_v13 = vld [vmem:[#allocation29_spill] sm:$0xff] }
 0x43e   : > { %v6605_v17 = vpop.f32.mrf.mxu0  ;;  %v4809_v20 = vadd.f32 %v11038_v28, %v3647_v40  ;;  %v2282_v40 = vadd.f32 %v6751_v51, %v11055_v13  ;;  %v11071_v51 = vld [vmem:[#allocation36_spill] sm:$0xff] }
 0x43f   : > { %v5757_v49 = vadd.f32 %v6605_v17, %v4803_v14  ;;  %v4808_v17 = vadd.f32 %v11040_v39, %v3646_v21  ;;  %v11058_v21 = vld [vmem:[#allocation73_spill] sm:$0xff] }
 0x440   : > { %v5637_v60 = vpop.f32.mrf.mxu0  ;;  %v3652_v28 = vadd.f32 %v11057_v45, %v2282_v40  ;;  %v6759_v45 = vld [vmem:[%s7177_s9 + $0xf0] sm:$0xff] }
 0x441   : > { %5789 = vst [vmem:[%s10656_s22 + $0x58] sm:$0xff] %v5757_v49  ;;  %v5756_v25 = vadd.f32 %v5637_v60, %v4802_v62  ;;  %v6746_v62 = vld [vmem:[%s7177_s9 + $0x98] sm:$0xff] }
 0x442   : > { %v11041_v60 = vld [vmem:[#allocation24_spill] sm:$0xff] }
 0x443   : > { %5788 = vst [vmem:[%s10656_s22 + $0x50] sm:$0xff] %v5756_v25  ;;  %v2279_v25 = vadd.f32 %v6746_v62, %v11041_v60  ;;  %v11060_v62 = vld [vmem:[#allocation52_spill] sm:$0xff] }
 0x445   : > { %v3649_v5 = vadd.f32 %v11042_v27, %v2279_v25  ;;  %v6753_v25 = vld [vmem:[%s7177_s9 + $0xc0] sm:$0xff]  ;;  %v11061_v27 = vld [vmem:[#allocation31_spill] sm:$0xff] }
 0x447   : > { %v4811_v29 = vadd.f32 %v11044_v35, %v3649_v5  ;;  %v2284_v5 = vadd.f32 %v6753_v25, %v11061_v27 }
 0x448   : > { %v6608_v6 = vpop.f32.mrf.mxu0 }
 0x449   : > { %v5759_v44 = vadd.f32 %v6608_v6, %v4805_v42  ;;  %v4810_v6 = vadd.f32 %v11046_v47, %v3648_v12  ;;  %v3654_v55 = vadd.f32 %v11062_v57, %v2284_v5 }
 0x44a   : > { %v5647_v2 = vpop.f32.mrf.mxu0 }
 0x44b   : > { %5791 = vst [vmem:[%s10656_s22 + $0x68] sm:$0xff] %v5759_v44  ;;  %v5758_v43 = vadd.f32 %v5647_v2, %v4804_v59  ;;  %v6748_v59 = vld [vmem:[%s7177_s9 + $0xa8] sm:$0xff]  ;;  %v4816_v3 = vadd.f32 %v10354_v58, %v3654_v55 }
 0x44c   : > { %v11047_v2 = vld [vmem:[#allocation26_spill] sm:$0xff] }
 0x44d   : > { %5790 = vst [vmem:[%s10656_s22 + $0x60] sm:$0xff] %v5758_v43  ;;  %v2281_v43 = vadd.f32 %v6748_v59, %v11047_v2  ;;  %v6755_v59 = vld [vmem:[%s7177_s9 + $0xd0] sm:$0xff]  ;;  %v11065_v2 = vld [vmem:[#allocation33_spill] sm:$0xff] }
 0x44f   : > { %v3651_v32 = vadd.f32 %v11048_v10, %v2281_v43  ;;  %v11066_v10 = vld [vmem:[#allocation55_spill] sm:$0xff] }
 0x451   : > { %v6611_v11 = vpop.f32.mrf.mxu0  ;;  %v4813_v34 = vadd.f32 %v11050_v22, %v3651_v32  ;;  %v6756_v22 = vld [vmem:[%s7177_s9 + $0xe8] sm:$0xff] }
 0x452   : > { %v5761_v48 = vadd.f32 %v6611_v11, %v4807_v56  ;;  %v4812_v11 = vadd.f32 %v11052_v9, %v3650_v31  ;;  %v6757_v9 = vld [vmem:[%s7177_s9 + $0xe0] sm:$0xff] }
 0x453   : > { %v5657_v53 = vpop.f32.mrf.mxu0 }
 0x454   : > { %5793 = vst [vmem:[%s10656_s22 + $0x78] sm:$0xff] %v5761_v48  ;;  %v5760_v15 = vadd.f32 %v5657_v53, %v4806_v19  ;;  %v6750_v19 = vld [vmem:[%s7177_s9 + $0xb8] sm:$0xff] }
 0x455   : > { %v11053_v53 = vld [vmem:[#allocation28_spill] sm:$0xff] }
 0x456   : > { %5792 = vst [vmem:[%s10656_s22 + $0x70] sm:$0xff] %v5760_v15  ;;  %v2283_v15 = vadd.f32 %v6750_v19, %v11053_v53 }
 0x458   : > { %v3653_v4 = vadd.f32 %v11054_v37, %v2283_v15 }
 0x45a   : > { %v4815_v1 = vadd.f32 %v11056_v52, %v3653_v4  ;;  %v6758_v4 = vld [vmem:[%s7177_s9 + $0xf8] sm:$0xff]  ;;  %v11072_v52 = vld [vmem:[#allocation58_spill] sm:$0xff] }
 0x45b   : > { %v2291_v13 = vadd.f32 %v6758_v4, %v11071_v51 }
 0x45c   : > { %v6614_v14 = vpop.f32.mrf.mxu0 }
 0x45d   : > { %v5763_v24 = vadd.f32 %v6614_v14, %v4809_v20  ;;  %v4814_v14 = vadd.f32 %v11058_v21, %v3652_v28 }
 0x45e   : > { %v5667_v49 = vpop.f32.mrf.mxu0 }
 0x45f   : > { %5795 = vst [vmem:[%s10656_s22 + $0x88] sm:$0xff] %v5763_v24  ;;  %v5762_v46 = vadd.f32 %v5667_v49, %v4808_v17  ;;  %v6752_v17 = vld [vmem:[%s7177_s9 + $0xc8] sm:$0xff] }
 0x460   : > { %v11059_v49 = vld [vmem:[#allocation30_spill] sm:$0xff] }
 0x461   : > { %5794 = vst [vmem:[%s10656_s22 + $0x80] sm:$0xff] %v5762_v46  ;;  %v2285_v46 = vadd.f32 %v6752_v17, %v11059_v49 }
 0x463   : > { %v3655_v60 = vadd.f32 %v11060_v62, %v2285_v46 }
 0x465   : > { %v4817_v38 = vadd.f32 %v10347_v0, %v3655_v60  ;;  %v2286_v0 = vadd.f32 %v6755_v59, %v11065_v2 }
 0x466   : > { %v6617_v42 = vpop.f32.mrf.mxu0 }
 0x467   : > { %v5765_v18 = vadd.f32 %v6617_v42, %v4811_v29  ;;  %v6754_v42 = vld [vmem:[%s7177_s9 + $0xd8] sm:$0xff]  ;;  %v3656_v58 = vadd.f32 %v11066_v10, %v2286_v0 }
 0x468   : > { %v5677_v44 = vpop.f32.mrf.mxu0 }
 0x469   : > { %5797 = vst [vmem:[%s10656_s22 + $0x98] sm:$0xff] %v5765_v18  ;;  %v5764_v30 = vadd.f32 %v5677_v44, %v4810_v6  ;;  %v11063_v18 = vld [vmem:[#allocation32_spill] sm:$0xff]  ;;  %v11064_v44 = vld [vmem:[#allocation54_spill] sm:$0xff]  ;;  %v4818_v16 = vadd.f32 %v10399_v50, %v3656_v58 }
 0x46a   : > { %v2287_v47 = vadd.f32 %v6754_v42, %v11063_v18 }
 0x46b   : > { %5796 = vst [vmem:[%s10656_s22 + $0x90] sm:$0xff] %v5764_v30 }
 0x46c   : > { %v3657_v30 = vadd.f32 %v11064_v44, %v2287_v47 }
 0x46e   : > { %v4819_v43 = vadd.f32 %v10389_v41, %v3657_v30 }
 0x46f   : > { %v6620_v56 = vpop.f32.mrf.mxu0 }
 0x470   : > { %v5767_v23 = vadd.f32 %v6620_v56, %v4813_v34  ;;  %v11067_v34 = vld [vmem:[#allocation34_spill] sm:$0xff]  ;;  %v11068_v56 = vld [vmem:[#allocation56_spill] sm:$0xff] }
 0x471   : > { %v5687_v48 = vpop.f32.mrf.mxu0  ;;  %v2289_v36 = vadd.f32 %v6756_v22, %v11067_v34 }
 0x472   : > { %5799 = vst [vmem:[%s10656_s22 + $0xa8] sm:$0xff] %v5767_v23  ;;  %v5766_v54 = vadd.f32 %v5687_v48, %v4812_v11  ;;  %v11069_v11 = vld [vmem:[#allocation35_spill] sm:$0xff] }
 0x473   : > { %v3659_v23 = vadd.f32 %v11068_v56, %v2289_v36  ;;  %v2288_v41 = vadd.f32 %v6757_v9, %v11069_v11 }
 0x474   : > { %5798 = vst [vmem:[%s10656_s22 + $0xa0] sm:$0xff] %v5766_v54  ;;  %v11070_v54 = vld [vmem:[#allocation57_spill] sm:$0xff] }
 0x475   : > { %v4821_v48 = vadd.f32 %v10424_v63, %v3659_v23  ;;  %v3658_v50 = vadd.f32 %v11070_v54, %v2288_v41  ;;  %v11073_v63 = vld [vmem:[#allocation37_spill] sm:$0xff] }
 0x476   : > { %v2290_v28 = vadd.f32 %v6759_v45, %v11073_v63 }
 0x477   : > { %v4820_v15 = vadd.f32 %v10441_v61, %v3658_v50 }
 0x478   : > { %v6623_v20 = vpop.f32.mrf.mxu0 }
 0x479   : > { %v5769_v7 = vadd.f32 %v6623_v20, %v4815_v1  ;;  %v3661_v1 = vadd.f32 %v11072_v52, %v2291_v13 }
 0x47a   : > { %v5697_v24 = vpop.f32.mrf.mxu0 }
 0x47b   : > { %5801 = vst [vmem:[%s10656_s22 + $0xb8] sm:$0xff] %v5769_v7  ;;  %v5768_v39 = vadd.f32 %v5697_v24, %v4814_v14  ;;  %v4823_v20 = vadd.f32 %v10483_v26, %v3661_v1  ;;  %v11074_v7 = vld [vmem:[#allocation59_spill] sm:$0xff]  ;;  %v11075_v24 = vld [vmem:[#allocation74_spill] sm:$0xff] }
 0x47c   : > { %v3660_v61 = vadd.f32 %v11074_v7, %v2290_v28 }
 0x47d   : > { %5800 = vst [vmem:[%s10656_s22 + $0xb0] sm:$0xff] %v5768_v39 }
 0x47e   : > { %v4822_v39 = vadd.f32 %v11075_v24, %v3660_v61 }
 0x481   : > { %v6626_v35 = vpop.f32.mrf.mxu0 }
 0x482   : > { %v5771_v29 = vadd.f32 %v6626_v35, %v4817_v38 }
 0x483   : > { %v5707_v12 = vpop.f32.mrf.mxu0 }
 0x484   : > { %5803 = vst [vmem:[%s10656_s22 + $0xc8] sm:$0xff] %v5771_v29  ;;  %v5770_v6 = vadd.f32 %v5707_v12, %v4816_v3 }
 0x486   : > { %5802 = vst [vmem:[%s10656_s22 + $0xc0] sm:$0xff] %v5770_v6 }
 0x487   : > { %v6629_v32 = vpop.f32.mrf.mxu0 }
 0x488   : > { %v5773_v33 = vadd.f32 %v6629_v32, %v4819_v43 }
 0x489   : > { %v5717_v8 = vpop.f32.mrf.mxu0 }
 0x48a   : > { %5805 = vst [vmem:[%s10656_s22 + $0xd8] sm:$0xff] %v5773_v33  ;;  %v5772_v31 = vadd.f32 %v5717_v8, %v4818_v16 }
 0x48c   : > { %5804 = vst [vmem:[%s10656_s22 + $0xd0] sm:$0xff] %v5772_v31 }
 0x48f   : > { %v6632_v19 = vpop.f32.mrf.mxu0 }
 0x490   : > { %v5775_v53 = vadd.f32 %v6632_v19, %v4821_v48 }
 0x491   : > { %v5727_v37 = vpop.f32.mrf.mxu0 }
 0x492   : > { %5807 = vst [vmem:[%s10656_s22 + $0xe8] sm:$0xff] %v5775_v53  ;;  %v5774_v40 = vadd.f32 %v5727_v37, %v4820_v15 }
 0x494   : > { %5806 = vst [vmem:[%s10656_s22 + $0xe0] sm:$0xff] %v5774_v40 }
 0x495   : > { %v6635_v21 = vpop.f32.mrf.mxu0 }
 0x496   : > { %v5777_v14 = vadd.f32 %v6635_v21, %v4823_v20 }
 0x497   : > { %v5737_v17 = vpop.f32.mrf.mxu0 }
 0x498   : > { %5809 = vst [vmem:[%s10656_s22 + $0xf8] sm:$0xff] %v5777_v14  ;;  %v5776_v26 = vadd.f32 %v5737_v17, %v4822_v39 }
 0x49a   : > { %5808 = vst [vmem:[%s10656_s22 + $0xf0] sm:$0xff] %v5776_v26 }
 0x49b   : > { %6883 = shalt.err (!%p6880_p6)
}
 0x49c   : > { %s6884_s13 = scalar_lea.hbm %s10811_s14, 4096  ;;  %s6888_s24 = scalar_lea.hbm %s10867_s4, 8192 }
 0x49d   : > { %p6885_p9 = scmp.ne.s32.totalorder %s10811_s14, %s6884_s13  ;;  %p6889_p7 = scmp.lt.s32.totalorder %s10811_s14, %s10867_s4 }
 0x49e   : > { %p6890_p2 = scmp.lt.s32.totalorder %s6888_s24, %s6884_s13 }
 0x49f   : > { %p6886_p10 = pnand %p6885_p9, %p7089_p12 }
 0x4a0   : > { %p6891_p11 = por %p6890_p2, %p6889_p7 }
 0x4a1   : > { %p6887_p0 = pneg %p6886_p10 }
 0x4a3   : > { %p6892_p4 = pnand %p6891_p11, %p6887_p0 }
 0x4a5   : > { %6895 = shalt.err (!%p6892_p4)
}
 0x4a6   : > { %s6968_s0 = smov 128   ;;  %s6969_s3 = smov 8  }
 0x4a7   : > { %6646 = dma.vmem_to_hbm [thread:$0]  (%p7089_p12), %s10813_s29, 4096, %s10811_s14, %s5811_s18, %s6968_s0, %s6968_s0, %s6969_s3  }
 0x4a8 PF: > { %s5842_s27 = sand.u32 1, %s6938_s15   ;;  %p11076_p1 = scmp.ge.s32.totalorder %s6958_s20, 2 }
 0x4a9   : > { %s5843_s9 = scalar_lea.sflag [#allocation4], %s5842_s27 }
 0x4aa   : > { %p6663_p3 = pnand %p11076_p1, %p7093_p13 }
 0x4ac   : > { %p6664_p5 = pneg %p6663_p3 }
 0x4ae   : > { %6933 = dma.done.wait (%p6664_p5), %s5843_s9, 4096  }
 0x4af   : > { %6935 = vsyncadd (%p6664_p5), %s5843_s9, 4294963200  ;;  %s24_s20 = sadd.s32 1, %s6958_s20   ;;  %s11077_s18 = sld [smem:[#allocation15_spill]] }
 0x4b0   : > { %p21_p8 = scmp.ge.s32.totalorder %s24_s20, 4   ;;  %s11078_s19 = sld [smem:[#allocation16_spill]] }
 0x4b1   : > { %s11079_s15 = smov %s6942_s16  ;;  %s11080_s16 = smov %s6946_s17 }
 0x4b2   : > { %s11081_s17 = smov %s7046_s26  ;;  %23 = sbr.rel (!%p21_p8) target bundleno = 13 (0xd), region = 112 }
 0x4b7   :  { %5848 = vsyncpa [#allocation3], 1 }
 0x4b8   :  { %5850 = vsyncpa [#allocation3 + $0x1], 1 }
 0x4b9   :  { %5851 = vsyncpa [#allocation6], 1 }
 0x4ba   :  { %5853 = vsyncpa [#allocation6 + $0x1], 1 }
 0x4bb   :  { %5854 = vsyncpa [#allocation9], 1 }
 0x4bc   :  { %5855 = vsyncpa [#allocation4], 1 }
 0x4bd   :  { %5857 = vsyncpa [#allocation4 + $0x1], 1 }

</bundles_post_ra>
